<compile_context>
chip_gen: v6e
topology: v6e:2x2x1
jax: 0.10.0
libtpu: 0.0.40
codegen_flags: <defaults>
</compile_context>

<pallas_src>
import jax
import jax.numpy as jnp
from jax.experimental import pallas as pl
from jax.experimental.pallas import tpu as pltpu


# ---------------------------------------------------------------------------
# Fused kernel
# ---------------------------------------------------------------------------
def _make_gcsa_kernel(H, W, C, groups):
    HW = H * W
    # Flat, vertically zero-padded buffer: the image interior starts at lane
    # offset S (128-aligned so the interior store is an aligned full-vreg store);
    # the 49 tap reads are static lane-offset slices into the same buffer.
    S = pl.cdiv(3 * W + 3, 128) * 128
    padlen = pl.cdiv(S + 3 * W + 3 + HW, 128) * 128
    cpg = C // groups
    # shuffled channel n  <-  original channel perm[n]  (torch channel_shuffle)
    perm = [(n % groups) * cpg + (n // groups) for n in range(C)]

    def kernel(x_ref, lw1_ref, lb1_ref, lw2_ref, lb2_ref,
               cw1_ref, cb1_ref, cw2_ref, cb2_ref, o_ref,
               pad1_ref, col1_ref, pad2_ref, col2_ref):
        x = x_ref[0].astype(jnp.float32)                               # (C, HW)

        # ---- channel attention: per-pixel MLP computed transposed (lane-dense) --
        h = jnp.maximum(
            jnp.dot(lw1_ref[...], x, preferred_element_type=jnp.float32)
            + lb1_ref[...], 0.0)                                       # (Cr, HW)
        att = jax.nn.sigmoid(
            jnp.dot(lw2_ref[...], h, preferred_element_type=jnp.float32)
            + lb2_ref[...])                                            # (C, HW)
        gated = x * att                                                # (C, HW)

        # ---- channel shuffle (groups): static sublane-row permutation in VMEM ---
        x_sh = jnp.concatenate([gated[o:o + 1, :] for o in perm], axis=0)  # (C, HW)

        # Horizontal SAME-pad masks, one per dx tap (hoisted out of the tap loops);
        # vertical padding is the zero cushion built into pad*_ref.
        xcoord = jax.lax.broadcasted_iota(jnp.int32, (1, HW), 1) % W
        xmasks = [(xcoord >= 3 - dx) & (xcoord < W + 3 - dx) for dx in range(7)]

        def conv7(src, pad_ref, col_ref, w_ref, b_ref):
            """7x7 SAME conv as one (cout, 49*cin) @ (49*cin, HW) matmul."""
            cin = src.shape[0]
            pad_ref[...] = jnp.zeros_like(pad_ref)
            pad_ref[:, S:S + HW] = src                                 # aligned store
            for dy in range(7):
                for dx in range(7):
                    off = S + (dy - 3) * W + (dx - 3)                  # static offset
                    tap = dy * 7 + dx
                    col_ref[tap * cin:(tap + 1) * cin, :] = jnp.where(
                        xmasks[dx], pad_ref[:, off:off + HW], 0.0)
            return jnp.dot(w_ref[...], col_ref[...],
                           preferred_element_type=jnp.float32) + b_ref[...]

        mid = jnp.maximum(conv7(x_sh, pad1_ref, col1_ref, cw1_ref, cb1_ref),
                          0.0)                                         # (cmid, HW)
        s_att = jax.nn.sigmoid(conv7(mid, pad2_ref, col2_ref, cw2_ref, cb2_ref))
        o_ref[...] = (x_sh * s_att)[None].astype(o_ref.dtype)          # (1, C, HW)

    return kernel, padlen


# ---------------------------------------------------------------------------
# Wrapper
# ---------------------------------------------------------------------------
def gcsa_forward(x_nchw, params, groups=4):
    B, C, H, W = x_nchw.shape
    HW = H * W
    Cr = params["lw1"].shape[0]
    cmid = params["cw1"].shape[-1]

    x3 = x_nchw.reshape(B, C, HW)                                      # NCHW, pixels flat

    # Kernel-layout parameters (transposed / matrix forms), built once under jit.
    lw1 = params["lw1"]                                                # (Cr, C)
    lb1 = params["lb1"][:, None]                                       # (Cr, 1)
    lw2 = params["lw2"]                                                # (C, Cr)
    lb2 = params["lb2"][:, None]                                       # (C, 1)
    cw1m = params["cw1"].reshape(49 * C, cmid).T                       # (cmid, 49*C)
    cb1 = params["cb1"][:, None]                                       # (cmid, 1)
    cw2m = params["cw2"].reshape(49 * cmid, C).T                       # (C, 49*cmid)
    cb2 = params["cb2"][:, None]                                       # (C, 1)

    kernel, padlen = _make_gcsa_kernel(H, W, C, groups)

    def wspec(r, c):
        return pl.BlockSpec((r, c), lambda b: (0, 0))

    out3 = pl.pallas_call(
        kernel,
        out_shape=jax.ShapeDtypeStruct((B, C, HW), x_nchw.dtype),
        grid=(B,),
        in_specs=[
            pl.BlockSpec((1, C, HW), lambda b: (b, 0, 0)),
            wspec(Cr, C), wspec(Cr, 1), wspec(C, Cr), wspec(C, 1),
            wspec(cmid, 49 * C), wspec(cmid, 1), wspec(C, 49 * cmid), wspec(C, 1),
        ],
        out_specs=pl.BlockSpec((1, C, HW), lambda b: (b, 0, 0)),
        scratch_shapes=[
            pltpu.VMEM((C, padlen), jnp.float32),        # padded flat input (conv1)
            pltpu.VMEM((49 * C, HW), jnp.float32),       # im2col slab      (conv1)
            pltpu.VMEM((cmid, padlen), jnp.float32),     # padded flat mid  (conv2)
            pltpu.VMEM((49 * cmid, HW), jnp.float32),    # im2col slab      (conv2)
        ],
        compiler_params=pltpu.CompilerParams(dimension_semantics=("parallel",)),
    )(x3, lw1, lb1, lw2, lb2, cw1m, cb1, cw2m, cb2)

    return out3.reshape(B, C, H, W)


# ---------------------------------------------------------------------------
# Deterministic synthetic parameters (shapes follow GCSA.__init__ with rate=4).
# BatchNorm (eval mode) stats folded into the conv weights/biases.
# ---------------------------------------------------------------------------
def init_params(key, c, rate=4):
    cr = c // rate
    ks = jax.random.split(key, 8)
    lw1 = jax.random.normal(ks[0], (cr, c), jnp.float32) * 0.2      # Linear(c, c/r) (out, in)
    lb1 = jax.random.normal(ks[1], (cr,), jnp.float32) * 0.1
    lw2 = jax.random.normal(ks[2], (c, cr), jnp.float32) * 0.2      # Linear(c/r, c) (out, in)
    lb2 = jax.random.normal(ks[3], (c,), jnp.float32) * 0.1
    cw1 = jax.random.normal(ks[4], (7, 7, c, cr), jnp.float32) * 0.05   # Conv2d(c, c/r, 7) HWIO
    cb1 = jax.random.normal(ks[5], (cr,), jnp.float32) * 0.1
    cw2 = jax.random.normal(ks[6], (7, 7, cr, c), jnp.float32) * 0.05   # Conv2d(c/r, c, 7) HWIO
    cb2 = jax.random.normal(ks[7], (c,), jnp.float32) * 0.1

    eps = 1e-5
    g1 = 1.0 + 0.1 * jnp.arange(cr, dtype=jnp.float32)
    be1 = 0.05 * jnp.arange(cr, dtype=jnp.float32)
    m1 = 0.02 * jnp.arange(cr, dtype=jnp.float32)
    v1 = 1.0 + 0.01 * jnp.arange(cr, dtype=jnp.float32)
    s1 = g1 / jnp.sqrt(v1 + eps)
    g2 = 1.0 + 0.1 * jnp.arange(c, dtype=jnp.float32)
    be2 = 0.05 * jnp.arange(c, dtype=jnp.float32)
    m2 = 0.02 * jnp.arange(c, dtype=jnp.float32)
    v2 = 1.0 + 0.01 * jnp.arange(c, dtype=jnp.float32)
    s2 = g2 / jnp.sqrt(v2 + eps)

    return dict(
        lw1=lw1, lb1=lb1, lw2=lw2, lb2=lb2,
        cw1=cw1 * s1, cb1=(cb1 - m1) * s1 + be1,
        cw2=cw2 * s2, cb2=(cb2 - m2) * s2 + be2,
    )


# ---------------------------------------------------------------------------
# Pure-JAX reference (same math, no Pallas) for a sanity check.
# ---------------------------------------------------------------------------
def gcsa_reference(x_nchw, p, groups=4):
    B, C, H, W = x_nchw.shape
    x = jnp.transpose(x_nchw, (0, 2, 3, 1))                          # NHWC
    x2d = x.reshape(-1, C)
    h = jnp.maximum(x2d @ p["lw1"].T + p["lb1"], 0.0)
    att = jax.nn.sigmoid(h @ p["lw2"].T + p["lb2"])
    x_ca = (x2d * att).reshape(B, H, W, C)
    x_sh = x_ca.reshape(B, H, W, groups, C // groups).transpose(0, 1, 2, 4, 3).reshape(B, H, W, C)
    dn = ("NHWC", "HWIO", "NHWC")
    mid = jax.lax.conv_general_dilated(x_sh, p["cw1"], (1, 1), "SAME", dimension_numbers=dn,
                                       precision=jax.lax.Precision.HIGHEST) + p["cb1"]
    mid = jnp.maximum(mid, 0.0)
    s = jax.lax.conv_general_dilated(mid, p["cw2"], (1, 1), "SAME", dimension_numbers=dn,
                                     precision=jax.lax.Precision.HIGHEST) + p["cb2"]
    out = x_sh * jax.nn.sigmoid(s)
    return jnp.transpose(out, (0, 3, 1, 2))


if __name__ == "__main__":
    key = jax.random.PRNGKey(0)
    kx, kp = jax.random.split(key)
    B, C, H, W = 2, 8, 16, 16                    # in_channels=8, rate=4 -> hidden=2
    x = jax.random.normal(kx, (B, C, H, W), jnp.float32)
    params = init_params(kp, C, rate=4)

    out = jax.jit(gcsa_forward)(x, params)
    out = jax.block_until_ready(out)

    ref = gcsa_reference(x, params)
    assert out.shape == (B, C, H, W)
    assert bool(jnp.allclose(out, ref, atol=5e-2, rtol=5e-2)), \
        f"max abs diff = {float(jnp.max(jnp.abs(out - ref)))}"
    print("KERNEL_OK")
</pallas_src>

<mosaic_0001>
module attributes {stable_mosaic.version = 11 : i64} {
  func.func @kernel(%arg0: i32, %arg1: memref<1x8x256xf32, #tpu.memory_space<vmem>>, %arg2: memref<2x8xf32, #tpu.memory_space<vmem>>, %arg3: memref<2x1xf32, #tpu.memory_space<vmem>>, %arg4: memref<8x2xf32, #tpu.memory_space<vmem>>, %arg5: memref<8x1xf32, #tpu.memory_space<vmem>>, %arg6: memref<2x392xf32, #tpu.memory_space<vmem>>, %arg7: memref<2x1xf32, #tpu.memory_space<vmem>>, %arg8: memref<8x98xf32, #tpu.memory_space<vmem>>, %arg9: memref<8x1xf32, #tpu.memory_space<vmem>>, %arg10: memref<1x8x256xf32, #tpu.memory_space<vmem>>, %arg11: memref<8x512xf32, #tpu.memory_space<vmem>>, %arg12: memref<392x256xf32, #tpu.memory_space<vmem>>, %arg13: memref<2x512xf32, #tpu.memory_space<vmem>>, %arg14: memref<98x256xf32, #tpu.memory_space<vmem>>) attributes {dimension_semantics = [#tpu.dimension_semantics<parallel>], iteration_bounds = array<i64: 2>, scalar_prefetch = 0 : i64, scratch_operands = 4 : i64, tpu.core_type = #tpu.core_type<tc>, window_params = [{transform_indices = @transform_0, window_bounds = array<i64: 1, 8, 256>}, {pipeline_mode = #tpu.pipeline_mode<synchronous>, transform_indices = @transform_1, window_bounds = array<i64: 2, 8>}, {pipeline_mode = #tpu.pipeline_mode<synchronous>, transform_indices = @transform_2, window_bounds = array<i64: 2, 1>}, {pipeline_mode = #tpu.pipeline_mode<synchronous>, transform_indices = @transform_3, window_bounds = array<i64: 8, 2>}, {pipeline_mode = #tpu.pipeline_mode<synchronous>, transform_indices = @transform_4, window_bounds = array<i64: 8, 1>}, {pipeline_mode = #tpu.pipeline_mode<synchronous>, transform_indices = @transform_5, window_bounds = array<i64: 2, 392>}, {pipeline_mode = #tpu.pipeline_mode<synchronous>, transform_indices = @transform_6, window_bounds = array<i64: 2, 1>}, {pipeline_mode = #tpu.pipeline_mode<synchronous>, transform_indices = @transform_7, window_bounds = array<i64: 8, 98>}, {pipeline_mode = #tpu.pipeline_mode<synchronous>, transform_indices = @transform_8, window_bounds = array<i64: 8, 1>}, {transform_indices = @transform_9, window_bounds = array<i64: 1, 8, 256>}]} {
    %c0 = arith.constant 0 : index
    %c0_0 = arith.constant 0 : index
    %c0_1 = arith.constant 0 : index
    %0 = vector.load %arg1[%c0, %c0_0, %c0_1] : memref<1x8x256xf32, #tpu.memory_space<vmem>>, vector<1x8x256xf32>
    %1 = vector.shape_cast %0 : vector<1x8x256xf32> to vector<8x256xf32>
    %c0_2 = arith.constant 0 : index
    %c0_3 = arith.constant 0 : index
    %2 = vector.load %arg2[%c0_2, %c0_3] : memref<2x8xf32, #tpu.memory_space<vmem>>, vector<2x8xf32>
    %cst = arith.constant dense<0.000000e+00> : vector<2x256xf32>
    %3 = tpu.matmul %2, %1, %cst {dimension_numbers = #tpu.dot_dimension_numbers<[1], [0], [0], [1], [0, 0, 1, 1], [], []>} : vector<2x8xf32>, vector<8x256xf32>, vector<2x256xf32> -> vector<2x256xf32>
    %c0_4 = arith.constant 0 : index
    %c0_5 = arith.constant 0 : index
    %4 = vector.load %arg3[%c0_4, %c0_5] : memref<2x1xf32, #tpu.memory_space<vmem>>, vector<2x1xf32>
    %5 = vector.broadcast %4 : vector<2x1xf32> to vector<2x256xf32>
    %6 = arith.addf %3, %5 : vector<2x256xf32>
    %cst_6 = arith.constant 0.000000e+00 : f32
    %7 = vector.broadcast %cst_6 : f32 to vector<2x256xf32>
    %8 = arith.maximumf %6, %7 : vector<2x256xf32>
    %c0_7 = arith.constant 0 : index
    %c0_8 = arith.constant 0 : index
    %9 = vector.load %arg4[%c0_7, %c0_8] : memref<8x2xf32, #tpu.memory_space<vmem>>, vector<8x2xf32>
    %cst_9 = arith.constant dense<0.000000e+00> : vector<8x256xf32>
    %10 = tpu.matmul %9, %8, %cst_9 {dimension_numbers = #tpu.dot_dimension_numbers<[1], [0], [0], [1], [0, 0, 1, 1], [], []>} : vector<8x2xf32>, vector<2x256xf32>, vector<8x256xf32> -> vector<8x256xf32>
    %c0_10 = arith.constant 0 : index
    %c0_11 = arith.constant 0 : index
    %11 = vector.load %arg5[%c0_10, %c0_11] : memref<8x1xf32, #tpu.memory_space<vmem>>, vector<8x1xf32>
    %12 = vector.broadcast %11 : vector<8x1xf32> to vector<8x256xf32>
    %13 = arith.addf %10, %12 : vector<8x256xf32>
    %14 = arith.negf %13 : vector<8x256xf32>
    %15 = math.exp %14 : vector<8x256xf32>
    %cst_12 = arith.constant 1.000000e+00 : f32
    %16 = vector.broadcast %cst_12 : f32 to vector<8x256xf32>
    %17 = arith.addf %16, %15 : vector<8x256xf32>
    %18 = arith.divf %16, %17 : vector<8x256xf32>
    %19 = arith.mulf %1, %18 : vector<8x256xf32>
    %20 = vector.extract_strided_slice %19 {offsets = [0, 0], sizes = [1, 256], strides = [1, 1]} : vector<8x256xf32> to vector<1x256xf32>
    %21 = vector.extract_strided_slice %19 {offsets = [2, 0], sizes = [1, 256], strides = [1, 1]} : vector<8x256xf32> to vector<1x256xf32>
    %22 = vector.extract_strided_slice %19 {offsets = [4, 0], sizes = [1, 256], strides = [1, 1]} : vector<8x256xf32> to vector<1x256xf32>
    %23 = vector.extract_strided_slice %19 {offsets = [6, 0], sizes = [1, 256], strides = [1, 1]} : vector<8x256xf32> to vector<1x256xf32>
    %24 = vector.extract_strided_slice %19 {offsets = [1, 0], sizes = [1, 256], strides = [1, 1]} : vector<8x256xf32> to vector<1x256xf32>
    %25 = vector.extract_strided_slice %19 {offsets = [3, 0], sizes = [1, 256], strides = [1, 1]} : vector<8x256xf32> to vector<1x256xf32>
    %26 = vector.extract_strided_slice %19 {offsets = [5, 0], sizes = [1, 256], strides = [1, 1]} : vector<8x256xf32> to vector<1x256xf32>
    %27 = vector.extract_strided_slice %19 {offsets = [7, 0], sizes = [1, 256], strides = [1, 1]} : vector<8x256xf32> to vector<1x256xf32>
    %28 = tpu.concatenate %20, %21, %22, %23, %24, %25, %26, %27 in 0 : vector<1x256xf32>, vector<1x256xf32>, vector<1x256xf32>, vector<1x256xf32>, vector<1x256xf32>, vector<1x256xf32>, vector<1x256xf32>, vector<1x256xf32> -> vector<8x256xf32>
    %29 = tpu.iota {dimensions = array<i32: 1>} : vector<1x256xi32>
    %c16_i32 = arith.constant 16 : i32
    %c0_i32 = arith.constant 0 : i32
    %30 = arith.cmpi eq, %c16_i32, %c0_i32 : i32
    %c1_i32 = arith.constant 1 : i32
    %31 = arith.select %30, %c1_i32, %c16_i32 : i32
    %32 = vector.broadcast %31 : i32 to vector<1x256xi32>
    %33 = arith.remsi %29, %32 : vector<1x256xi32>
    %c0_i32_13 = arith.constant 0 : i32
    %34 = vector.broadcast %c0_i32_13 : i32 to vector<1x256xi32>
    %35 = arith.cmpi ne, %33, %34 : vector<1x256xi32>
    %c0_i32_14 = arith.constant 0 : i32
    %36 = vector.broadcast %c0_i32_14 : i32 to vector<1x256xi32>
    %37 = arith.cmpi slt, %33, %36 : vector<1x256xi32>
    %c0_i32_15 = arith.constant 0 : i32
    %38 = arith.cmpi slt, %31, %c0_i32_15 : i32
    %39 = vector.broadcast %38 : i1 to vector<1x256xi1>
    %40 = vector.broadcast %39 : vector<1x256xi1> to vector<1x256xi1>
    %41 = arith.xori %37, %40 : vector<1x256xi1>
    %42 = arith.andi %41, %35 : vector<1x256xi1>
    %43 = vector.broadcast %31 : i32 to vector<1x256xi32>
    %44 = arith.addi %33, %43 : vector<1x256xi32>
    %45 = arith.select %42, %44, %33 : vector<1x256xi1>, vector<1x256xi32>
    %c3_i32 = arith.constant 3 : i32
    %46 = vector.broadcast %c3_i32 : i32 to vector<1x256xi32>
    %47 = arith.cmpi sge, %45, %46 : vector<1x256xi32>
    %c19_i32 = arith.constant 19 : i32
    %48 = vector.broadcast %c19_i32 : i32 to vector<1x256xi32>
    %49 = arith.cmpi slt, %45, %48 : vector<1x256xi32>
    %50 = arith.andi %47, %49 : vector<1x256xi1>
    %c2_i32 = arith.constant 2 : i32
    %51 = vector.broadcast %c2_i32 : i32 to vector<1x256xi32>
    %52 = arith.cmpi sge, %45, %51 : vector<1x256xi32>
    %c18_i32 = arith.constant 18 : i32
    %53 = vector.broadcast %c18_i32 : i32 to vector<1x256xi32>
    %54 = arith.cmpi slt, %45, %53 : vector<1x256xi32>
    %55 = arith.andi %52, %54 : vector<1x256xi1>
    %c1_i32_16 = arith.constant 1 : i32
    %56 = vector.broadcast %c1_i32_16 : i32 to vector<1x256xi32>
    %57 = arith.cmpi sge, %45, %56 : vector<1x256xi32>
    %c17_i32 = arith.constant 17 : i32
    %58 = vector.broadcast %c17_i32 : i32 to vector<1x256xi32>
    %59 = arith.cmpi slt, %45, %58 : vector<1x256xi32>
    %60 = arith.andi %57, %59 : vector<1x256xi1>
    %c0_i32_17 = arith.constant 0 : i32
    %61 = vector.broadcast %c0_i32_17 : i32 to vector<1x256xi32>
    %62 = arith.cmpi sge, %45, %61 : vector<1x256xi32>
    %c16_i32_18 = arith.constant 16 : i32
    %63 = vector.broadcast %c16_i32_18 : i32 to vector<1x256xi32>
    %64 = arith.cmpi slt, %45, %63 : vector<1x256xi32>
    %65 = arith.andi %62, %64 : vector<1x256xi1>
    %c-1_i32 = arith.constant -1 : i32
    %66 = vector.broadcast %c-1_i32 : i32 to vector<1x256xi32>
    %67 = arith.cmpi sge, %45, %66 : vector<1x256xi32>
    %c15_i32 = arith.constant 15 : i32
    %68 = vector.broadcast %c15_i32 : i32 to vector<1x256xi32>
    %69 = arith.cmpi slt, %45, %68 : vector<1x256xi32>
    %70 = arith.andi %67, %69 : vector<1x256xi1>
    %c-2_i32 = arith.constant -2 : i32
    %71 = vector.broadcast %c-2_i32 : i32 to vector<1x256xi32>
    %72 = arith.cmpi sge, %45, %71 : vector<1x256xi32>
    %c14_i32 = arith.constant 14 : i32
    %73 = vector.broadcast %c14_i32 : i32 to vector<1x256xi32>
    %74 = arith.cmpi slt, %45, %73 : vector<1x256xi32>
    %75 = arith.andi %72, %74 : vector<1x256xi1>
    %c-3_i32 = arith.constant -3 : i32
    %76 = vector.broadcast %c-3_i32 : i32 to vector<1x256xi32>
    %77 = arith.cmpi sge, %45, %76 : vector<1x256xi32>
    %c13_i32 = arith.constant 13 : i32
    %78 = vector.broadcast %c13_i32 : i32 to vector<1x256xi32>
    %79 = arith.cmpi slt, %45, %78 : vector<1x256xi32>
    %80 = arith.andi %77, %79 : vector<1x256xi1>
    %cst_19 = arith.constant 0.000000e+00 : f32
    %81 = vector.broadcast %cst_19 : f32 to vector<8x512xf32>
    %c0_20 = arith.constant 0 : index
    %c0_21 = arith.constant 0 : index
    %82 = vector.load %arg11[%c0_20, %c0_21] : memref<8x512xf32, #tpu.memory_space<vmem>>, vector<8x512xf32>
    tpu.vector_store %arg11[%c0_20, %c0_21], %81 {strides = array<i32>} : memref<8x512xf32, #tpu.memory_space<vmem>>, vector<8x512xf32>,
    %c0_22 = arith.constant 0 : index
    %c128 = arith.constant 128 : index
    %83 = vector.load %arg11[%c0_22, %c128] : memref<8x512xf32, #tpu.memory_space<vmem>>, vector<8x256xf32>
    tpu.vector_store %arg11[%c0_22, %c128], %28 {strides = array<i32>} : memref<8x512xf32, #tpu.memory_space<vmem>>, vector<8x256xf32>,
    %c0_23 = arith.constant 0 : index
    %c77 = arith.constant 77 : index
    %84 = vector.load %arg11[%c0_23, %c77] : memref<8x512xf32, #tpu.memory_space<vmem>>, vector<8x256xf32>
    %cst_24 = arith.constant 0.000000e+00 : f32
    %85 = vector.shape_cast %50 : vector<1x256xi1> to vector<1x256xi1>
    %86 = vector.broadcast %85 : vector<1x256xi1> to vector<8x256xi1>
    %87 = vector.broadcast %cst_24 : f32 to vector<8x256xf32>
    %88 = arith.select %86, %84, %87 : vector<8x256xi1>, vector<8x256xf32>
    %c0_25 = arith.constant 0 : index
    %c0_26 = arith.constant 0 : index
    %89 = vector.load %arg12[%c0_25, %c0_26] : memref<392x256xf32, #tpu.memory_space<vmem>>, vector<8x256xf32>
    tpu.vector_store %arg12[%c0_25, %c0_26], %88 {strides = array<i32>} : memref<392x256xf32, #tpu.memory_space<vmem>>, vector<8x256xf32>,
    %c0_27 = arith.constant 0 : index
    %c78 = arith.constant 78 : index
    %90 = vector.load %arg11[%c0_27, %c78] : memref<8x512xf32, #tpu.memory_space<vmem>>, vector<8x256xf32>
    %cst_28 = arith.constant 0.000000e+00 : f32
    %91 = vector.shape_cast %55 : vector<1x256xi1> to vector<1x256xi1>
    %92 = vector.broadcast %91 : vector<1x256xi1> to vector<8x256xi1>
    %93 = vector.broadcast %cst_28 : f32 to vector<8x256xf32>
    %94 = arith.select %92, %90, %93 : vector<8x256xi1>, vector<8x256xf32>
    %c8 = arith.constant 8 : index
    %c0_29 = arith.constant 0 : index
    %95 = vector.load %arg12[%c8, %c0_29] : memref<392x256xf32, #tpu.memory_space<vmem>>, vector<8x256xf32>
    tpu.vector_store %arg12[%c8, %c0_29], %94 {strides = array<i32>} : memref<392x256xf32, #tpu.memory_space<vmem>>, vector<8x256xf32>,
    %c0_30 = arith.constant 0 : index
    %c79 = arith.constant 79 : index
    %96 = vector.load %arg11[%c0_30, %c79] : memref<8x512xf32, #tpu.memory_space<vmem>>, vector<8x256xf32>
    %cst_31 = arith.constant 0.000000e+00 : f32
    %97 = vector.shape_cast %60 : vector<1x256xi1> to vector<1x256xi1>
    %98 = vector.broadcast %97 : vector<1x256xi1> to vector<8x256xi1>
    %99 = vector.broadcast %cst_31 : f32 to vector<8x256xf32>
    %100 = arith.select %98, %96, %99 : vector<8x256xi1>, vector<8x256xf32>
    %c16 = arith.constant 16 : index
    %c0_32 = arith.constant 0 : index
    %101 = vector.load %arg12[%c16, %c0_32] : memref<392x256xf32, #tpu.memory_space<vmem>>, vector<8x256xf32>
    tpu.vector_store %arg12[%c16, %c0_32], %100 {strides = array<i32>} : memref<392x256xf32, #tpu.memory_space<vmem>>, vector<8x256xf32>,
    %c0_33 = arith.constant 0 : index
    %c80 = arith.constant 80 : index
    %102 = vector.load %arg11[%c0_33, %c80] : memref<8x512xf32, #tpu.memory_space<vmem>>, vector<8x256xf32>
    %cst_34 = arith.constant 0.000000e+00 : f32
    %103 = vector.shape_cast %65 : vector<1x256xi1> to vector<1x256xi1>
    %104 = vector.broadcast %103 : vector<1x256xi1> to vector<8x256xi1>
    %105 = vector.broadcast %cst_34 : f32 to vector<8x256xf32>
    %106 = arith.select %104, %102, %105 : vector<8x256xi1>, vector<8x256xf32>
    %c24 = arith.constant 24 : index
    %c0_35 = arith.constant 0 : index
    %107 = vector.load %arg12[%c24, %c0_35] : memref<392x256xf32, #tpu.memory_space<vmem>>, vector<8x256xf32>
    tpu.vector_store %arg12[%c24, %c0_35], %106 {strides = array<i32>} : memref<392x256xf32, #tpu.memory_space<vmem>>, vector<8x256xf32>,
    %c0_36 = arith.constant 0 : index
    %c81 = arith.constant 81 : index
    %108 = vector.load %arg11[%c0_36, %c81] : memref<8x512xf32, #tpu.memory_space<vmem>>, vector<8x256xf32>
    %cst_37 = arith.constant 0.000000e+00 : f32
    %109 = vector.shape_cast %70 : vector<1x256xi1> to vector<1x256xi1>
    %110 = vector.broadcast %109 : vector<1x256xi1> to vector<8x256xi1>
    %111 = vector.broadcast %cst_37 : f32 to vector<8x256xf32>
    %112 = arith.select %110, %108, %111 : vector<8x256xi1>, vector<8x256xf32>
    %c32 = arith.constant 32 : index
    %c0_38 = arith.constant 0 : index
    %113 = vector.load %arg12[%c32, %c0_38] : memref<392x256xf32, #tpu.memory_space<vmem>>, vector<8x256xf32>
    tpu.vector_store %arg12[%c32, %c0_38], %112 {strides = array<i32>} : memref<392x256xf32, #tpu.memory_space<vmem>>, vector<8x256xf32>,
    %c0_39 = arith.constant 0 : index
    %c82 = arith.constant 82 : index
    %114 = vector.load %arg11[%c0_39, %c82] : memref<8x512xf32, #tpu.memory_space<vmem>>, vector<8x256xf32>
    %cst_40 = arith.constant 0.000000e+00 : f32
    %115 = vector.shape_cast %75 : vector<1x256xi1> to vector<1x256xi1>
    %116 = vector.broadcast %115 : vector<1x256xi1> to vector<8x256xi1>
    %117 = vector.broadcast %cst_40 : f32 to vector<8x256xf32>
    %118 = arith.select %116, %114, %117 : vector<8x256xi1>, vector<8x256xf32>
    %c40 = arith.constant 40 : index
    %c0_41 = arith.constant 0 : index
    %119 = vector.load %arg12[%c40, %c0_41] : memref<392x256xf32, #tpu.memory_space<vmem>>, vector<8x256xf32>
    tpu.vector_store %arg12[%c40, %c0_41], %118 {strides = array<i32>} : memref<392x256xf32, #tpu.memory_space<vmem>>, vector<8x256xf32>,
    %c0_42 = arith.constant 0 : index
    %c83 = arith.constant 83 : index
    %120 = vector.load %arg11[%c0_42, %c83] : memref<8x512xf32, #tpu.memory_space<vmem>>, vector<8x256xf32>
    %cst_43 = arith.constant 0.000000e+00 : f32
    %121 = vector.shape_cast %80 : vector<1x256xi1> to vector<1x256xi1>
    %122 = vector.broadcast %121 : vector<1x256xi1> to vector<8x256xi1>
    %123 = vector.broadcast %cst_43 : f32 to vector<8x256xf32>
    %124 = arith.select %122, %120, %123 : vector<8x256xi1>, vector<8x256xf32>
    %c48 = arith.constant 48 : index
    %c0_44 = arith.constant 0 : index
    %125 = vector.load %arg12[%c48, %c0_44] : memref<392x256xf32, #tpu.memory_space<vmem>>, vector<8x256xf32>
    tpu.vector_store %arg12[%c48, %c0_44], %124 {strides = array<i32>} : memref<392x256xf32, #tpu.memory_space<vmem>>, vector<8x256xf32>,
    %c0_45 = arith.constant 0 : index
    %c93 = arith.constant 93 : index
    %126 = vector.load %arg11[%c0_45, %c93] : memref<8x512xf32, #tpu.memory_space<vmem>>, vector<8x256xf32>
    %cst_46 = arith.constant 0.000000e+00 : f32
    %127 = vector.shape_cast %50 : vector<1x256xi1> to vector<1x256xi1>
    %128 = vector.broadcast %127 : vector<1x256xi1> to vector<8x256xi1>
    %129 = vector.broadcast %cst_46 : f32 to vector<8x256xf32>
    %130 = arith.select %128, %126, %129 : vector<8x256xi1>, vector<8x256xf32>
    %c56 = arith.constant 56 : index
    %c0_47 = arith.constant 0 : index
    %131 = vector.load %arg12[%c56, %c0_47] : memref<392x256xf32, #tpu.memory_space<vmem>>, vector<8x256xf32>
    tpu.vector_store %arg12[%c56, %c0_47], %130 {strides = array<i32>} : memref<392x256xf32, #tpu.memory_space<vmem>>, vector<8x256xf32>,
    %c0_48 = arith.constant 0 : index
    %c94 = arith.constant 94 : index
    %132 = vector.load %arg11[%c0_48, %c94] : memref<8x512xf32, #tpu.memory_space<vmem>>, vector<8x256xf32>
    %cst_49 = arith.constant 0.000000e+00 : f32
    %133 = vector.shape_cast %55 : vector<1x256xi1> to vector<1x256xi1>
    %134 = vector.broadcast %133 : vector<1x256xi1> to vector<8x256xi1>
    %135 = vector.broadcast %cst_49 : f32 to vector<8x256xf32>
    %136 = arith.select %134, %132, %135 : vector<8x256xi1>, vector<8x256xf32>
    %c64 = arith.constant 64 : index
    %c0_50 = arith.constant 0 : index
    %137 = vector.load %arg12[%c64, %c0_50] : memref<392x256xf32, #tpu.memory_space<vmem>>, vector<8x256xf32>
    tpu.vector_store %arg12[%c64, %c0_50], %136 {strides = array<i32>} : memref<392x256xf32, #tpu.memory_space<vmem>>, vector<8x256xf32>,
    %c0_51 = arith.constant 0 : index
    %c95 = arith.constant 95 : index
    %138 = vector.load %arg11[%c0_51, %c95] : memref<8x512xf32, #tpu.memory_space<vmem>>, vector<8x256xf32>
    %cst_52 = arith.constant 0.000000e+00 : f32
    %139 = vector.shape_cast %60 : vector<1x256xi1> to vector<1x256xi1>
    %140 = vector.broadcast %139 : vector<1x256xi1> to vector<8x256xi1>
    %141 = vector.broadcast %cst_52 : f32 to vector<8x256xf32>
    %142 = arith.select %140, %138, %141 : vector<8x256xi1>, vector<8x256xf32>
    %c72 = arith.constant 72 : index
    %c0_53 = arith.constant 0 : index
    %143 = vector.load %arg12[%c72, %c0_53] : memref<392x256xf32, #tpu.memory_space<vmem>>, vector<8x256xf32>
    tpu.vector_store %arg12[%c72, %c0_53], %142 {strides = array<i32>} : memref<392x256xf32, #tpu.memory_space<vmem>>, vector<8x256xf32>,
    %c0_54 = arith.constant 0 : index
    %c96 = arith.constant 96 : index
    %144 = vector.load %arg11[%c0_54, %c96] : memref<8x512xf32, #tpu.memory_space<vmem>>, vector<8x256xf32>
    %cst_55 = arith.constant 0.000000e+00 : f32
    %145 = vector.shape_cast %65 : vector<1x256xi1> to vector<1x256xi1>
    %146 = vector.broadcast %145 : vector<1x256xi1> to vector<8x256xi1>
    %147 = vector.broadcast %cst_55 : f32 to vector<8x256xf32>
    %148 = arith.select %146, %144, %147 : vector<8x256xi1>, vector<8x256xf32>
    %c80_56 = arith.constant 80 : index
    %c0_57 = arith.constant 0 : index
    %149 = vector.load %arg12[%c80_56, %c0_57] : memref<392x256xf32, #tpu.memory_space<vmem>>, vector<8x256xf32>
    tpu.vector_store %arg12[%c80_56, %c0_57], %148 {strides = array<i32>} : memref<392x256xf32, #tpu.memory_space<vmem>>, vector<8x256xf32>,
    %c0_58 = arith.constant 0 : index
    %c97 = arith.constant 97 : index
    %150 = vector.load %arg11[%c0_58, %c97] : memref<8x512xf32, #tpu.memory_space<vmem>>, vector<8x256xf32>
    %cst_59 = arith.constant 0.000000e+00 : f32
    %151 = vector.shape_cast %70 : vector<1x256xi1> to vector<1x256xi1>
    %152 = vector.broadcast %151 : vector<1x256xi1> to vector<8x256xi1>
    %153 = vector.broadcast %cst_59 : f32 to vector<8x256xf32>
    %154 = arith.select %152, %150, %153 : vector<8x256xi1>, vector<8x256xf32>
    %c88 = arith.constant 88 : index
    %c0_60 = arith.constant 0 : index
    %155 = vector.load %arg12[%c88, %c0_60] : memref<392x256xf32, #tpu.memory_space<vmem>>, vector<8x256xf32>
    tpu.vector_store %arg12[%c88, %c0_60], %154 {strides = array<i32>} : memref<392x256xf32, #tpu.memory_space<vmem>>, vector<8x256xf32>,
    %c0_61 = arith.constant 0 : index
    %c98 = arith.constant 98 : index
    %156 = vector.load %arg11[%c0_61, %c98] : memref<8x512xf32, #tpu.memory_space<vmem>>, vector<8x256xf32>
    %cst_62 = arith.constant 0.000000e+00 : f32
    %157 = vector.shape_cast %75 : vector<1x256xi1> to vector<1x256xi1>
    %158 = vector.broadcast %157 : vector<1x256xi1> to vector<8x256xi1>
    %159 = vector.broadcast %cst_62 : f32 to vector<8x256xf32>
    %160 = arith.select %158, %156, %159 : vector<8x256xi1>, vector<8x256xf32>
    %c96_63 = arith.constant 96 : index
    %c0_64 = arith.constant 0 : index
    %161 = vector.load %arg12[%c96_63, %c0_64] : memref<392x256xf32, #tpu.memory_space<vmem>>, vector<8x256xf32>
    tpu.vector_store %arg12[%c96_63, %c0_64], %160 {strides = array<i32>} : memref<392x256xf32, #tpu.memory_space<vmem>>, vector<8x256xf32>,
    %c0_65 = arith.constant 0 : index
    %c99 = arith.constant 99 : index
    %162 = vector.load %arg11[%c0_65, %c99] : memref<8x512xf32, #tpu.memory_space<vmem>>, vector<8x256xf32>
    %cst_66 = arith.constant 0.000000e+00 : f32
    %163 = vector.shape_cast %80 : vector<1x256xi1> to vector<1x256xi1>
    %164 = vector.broadcast %163 : vector<1x256xi1> to vector<8x256xi1>
    %165 = vector.broadcast %cst_66 : f32 to vector<8x256xf32>
    %166 = arith.select %164, %162, %165 : vector<8x256xi1>, vector<8x256xf32>
    %c104 = arith.constant 104 : index
    %c0_67 = arith.constant 0 : index
    %167 = vector.load %arg12[%c104, %c0_67] : memref<392x256xf32, #tpu.memory_space<vmem>>, vector<8x256xf32>
    tpu.vector_store %arg12[%c104, %c0_67], %166 {strides = array<i32>} : memref<392x256xf32, #tpu.memory_space<vmem>>, vector<8x256xf32>,
    %c0_68 = arith.constant 0 : index
    %c109 = arith.constant 109 : index
    %168 = vector.load %arg11[%c0_68, %c109] : memref<8x512xf32, #tpu.memory_space<vmem>>, vector<8x256xf32>
    %cst_69 = arith.constant 0.000000e+00 : f32
    %169 = vector.shape_cast %50 : vector<1x256xi1> to vector<1x256xi1>
    %170 = vector.broadcast %169 : vector<1x256xi1> to vector<8x256xi1>
    %171 = vector.broadcast %cst_69 : f32 to vector<8x256xf32>
    %172 = arith.select %170, %168, %171 : vector<8x256xi1>, vector<8x256xf32>
    %c112 = arith.constant 112 : index
    %c0_70 = arith.constant 0 : index
    %173 = vector.load %arg12[%c112, %c0_70] : memref<392x256xf32, #tpu.memory_space<vmem>>, vector<8x256xf32>
    tpu.vector_store %arg12[%c112, %c0_70], %172 {strides = array<i32>} : memref<392x256xf32, #tpu.memory_space<vmem>>, vector<8x256xf32>,
    %c0_71 = arith.constant 0 : index
    %c110 = arith.constant 110 : index
    %174 = vector.load %arg11[%c0_71, %c110] : memref<8x512xf32, #tpu.memory_space<vmem>>, vector<8x256xf32>
    %cst_72 = arith.constant 0.000000e+00 : f32
    %175 = vector.shape_cast %55 : vector<1x256xi1> to vector<1x256xi1>
    %176 = vector.broadcast %175 : vector<1x256xi1> to vector<8x256xi1>
    %177 = vector.broadcast %cst_72 : f32 to vector<8x256xf32>
    %178 = arith.select %176, %174, %177 : vector<8x256xi1>, vector<8x256xf32>
    %c120 = arith.constant 120 : index
    %c0_73 = arith.constant 0 : index
    %179 = vector.load %arg12[%c120, %c0_73] : memref<392x256xf32, #tpu.memory_space<vmem>>, vector<8x256xf32>
    tpu.vector_store %arg12[%c120, %c0_73], %178 {strides = array<i32>} : memref<392x256xf32, #tpu.memory_space<vmem>>, vector<8x256xf32>,
    %c0_74 = arith.constant 0 : index
    %c111 = arith.constant 111 : index
    %180 = vector.load %arg11[%c0_74, %c111] : memref<8x512xf32, #tpu.memory_space<vmem>>, vector<8x256xf32>
    %cst_75 = arith.constant 0.000000e+00 : f32
    %181 = vector.shape_cast %60 : vector<1x256xi1> to vector<1x256xi1>
    %182 = vector.broadcast %181 : vector<1x256xi1> to vector<8x256xi1>
    %183 = vector.broadcast %cst_75 : f32 to vector<8x256xf32>
    %184 = arith.select %182, %180, %183 : vector<8x256xi1>, vector<8x256xf32>
    %c128_76 = arith.constant 128 : index
    %c0_77 = arith.constant 0 : index
    %185 = vector.load %arg12[%c128_76, %c0_77] : memref<392x256xf32, #tpu.memory_space<vmem>>, vector<8x256xf32>
    tpu.vector_store %arg12[%c128_76, %c0_77], %184 {strides = array<i32>} : memref<392x256xf32, #tpu.memory_space<vmem>>, vector<8x256xf32>,
    %c0_78 = arith.constant 0 : index
    %c112_79 = arith.constant 112 : index
    %186 = vector.load %arg11[%c0_78, %c112_79] : memref<8x512xf32, #tpu.memory_space<vmem>>, vector<8x256xf32>
    %cst_80 = arith.constant 0.000000e+00 : f32
    %187 = vector.shape_cast %65 : vector<1x256xi1> to vector<1x256xi1>
    %188 = vector.broadcast %187 : vector<1x256xi1> to vector<8x256xi1>
    %189 = vector.broadcast %cst_80 : f32 to vector<8x256xf32>
    %190 = arith.select %188, %186, %189 : vector<8x256xi1>, vector<8x256xf32>
    %c136 = arith.constant 136 : index
    %c0_81 = arith.constant 0 : index
    %191 = vector.load %arg12[%c136, %c0_81] : memref<392x256xf32, #tpu.memory_space<vmem>>, vector<8x256xf32>
    tpu.vector_store %arg12[%c136, %c0_81], %190 {strides = array<i32>} : memref<392x256xf32, #tpu.memory_space<vmem>>, vector<8x256xf32>,
    %c0_82 = arith.constant 0 : index
    %c113 = arith.constant 113 : index
    %192 = vector.load %arg11[%c0_82, %c113] : memref<8x512xf32, #tpu.memory_space<vmem>>, vector<8x256xf32>
    %cst_83 = arith.constant 0.000000e+00 : f32
    %193 = vector.shape_cast %70 : vector<1x256xi1> to vector<1x256xi1>
    %194 = vector.broadcast %193 : vector<1x256xi1> to vector<8x256xi1>
    %195 = vector.broadcast %cst_83 : f32 to vector<8x256xf32>
    %196 = arith.select %194, %192, %195 : vector<8x256xi1>, vector<8x256xf32>
    %c144 = arith.constant 144 : index
    %c0_84 = arith.constant 0 : index
    %197 = vector.load %arg12[%c144, %c0_84] : memref<392x256xf32, #tpu.memory_space<vmem>>, vector<8x256xf32>
    tpu.vector_store %arg12[%c144, %c0_84], %196 {strides = array<i32>} : memref<392x256xf32, #tpu.memory_space<vmem>>, vector<8x256xf32>,
    %c0_85 = arith.constant 0 : index
    %c114 = arith.constant 114 : index
    %198 = vector.load %arg11[%c0_85, %c114] : memref<8x512xf32, #tpu.memory_space<vmem>>, vector<8x256xf32>
    %cst_86 = arith.constant 0.000000e+00 : f32
    %199 = vector.shape_cast %75 : vector<1x256xi1> to vector<1x256xi1>
    %200 = vector.broadcast %199 : vector<1x256xi1> to vector<8x256xi1>
    %201 = vector.broadcast %cst_86 : f32 to vector<8x256xf32>
    %202 = arith.select %200, %198, %201 : vector<8x256xi1>, vector<8x256xf32>
    %c152 = arith.constant 152 : index
    %c0_87 = arith.constant 0 : index
    %203 = vector.load %arg12[%c152, %c0_87] : memref<392x256xf32, #tpu.memory_space<vmem>>, vector<8x256xf32>
    tpu.vector_store %arg12[%c152, %c0_87], %202 {strides = array<i32>} : memref<392x256xf32, #tpu.memory_space<vmem>>, vector<8x256xf32>,
    %c0_88 = arith.constant 0 : index
    %c115 = arith.constant 115 : index
    %204 = vector.load %arg11[%c0_88, %c115] : memref<8x512xf32, #tpu.memory_space<vmem>>, vector<8x256xf32>
    %cst_89 = arith.constant 0.000000e+00 : f32
    %205 = vector.shape_cast %80 : vector<1x256xi1> to vector<1x256xi1>
    %206 = vector.broadcast %205 : vector<1x256xi1> to vector<8x256xi1>
    %207 = vector.broadcast %cst_89 : f32 to vector<8x256xf32>
    %208 = arith.select %206, %204, %207 : vector<8x256xi1>, vector<8x256xf32>
    %c160 = arith.constant 160 : index
    %c0_90 = arith.constant 0 : index
    %209 = vector.load %arg12[%c160, %c0_90] : memref<392x256xf32, #tpu.memory_space<vmem>>, vector<8x256xf32>
    tpu.vector_store %arg12[%c160, %c0_90], %208 {strides = array<i32>} : memref<392x256xf32, #tpu.memory_space<vmem>>, vector<8x256xf32>,
    %c0_91 = arith.constant 0 : index
    %c125 = arith.constant 125 : index
    %210 = vector.load %arg11[%c0_91, %c125] : memref<8x512xf32, #tpu.memory_space<vmem>>, vector<8x256xf32>
    %cst_92 = arith.constant 0.000000e+00 : f32
    %211 = vector.shape_cast %50 : vector<1x256xi1> to vector<1x256xi1>
    %212 = vector.broadcast %211 : vector<1x256xi1> to vector<8x256xi1>
    %213 = vector.broadcast %cst_92 : f32 to vector<8x256xf32>
    %214 = arith.select %212, %210, %213 : vector<8x256xi1>, vector<8x256xf32>
    %c168 = arith.constant 168 : index
    %c0_93 = arith.constant 0 : index
    %215 = vector.load %arg12[%c168, %c0_93] : memref<392x256xf32, #tpu.memory_space<vmem>>, vector<8x256xf32>
    tpu.vector_store %arg12[%c168, %c0_93], %214 {strides = array<i32>} : memref<392x256xf32, #tpu.memory_space<vmem>>, vector<8x256xf32>,
    %c0_94 = arith.constant 0 : index
    %c126 = arith.constant 126 : index
    %216 = vector.load %arg11[%c0_94, %c126] : memref<8x512xf32, #tpu.memory_space<vmem>>, vector<8x256xf32>
    %cst_95 = arith.constant 0.000000e+00 : f32
    %217 = vector.shape_cast %55 : vector<1x256xi1> to vector<1x256xi1>
    %218 = vector.broadcast %217 : vector<1x256xi1> to vector<8x256xi1>
    %219 = vector.broadcast %cst_95 : f32 to vector<8x256xf32>
    %220 = arith.select %218, %216, %219 : vector<8x256xi1>, vector<8x256xf32>
    %c176 = arith.constant 176 : index
    %c0_96 = arith.constant 0 : index
    %221 = vector.load %arg12[%c176, %c0_96] : memref<392x256xf32, #tpu.memory_space<vmem>>, vector<8x256xf32>
    tpu.vector_store %arg12[%c176, %c0_96], %220 {strides = array<i32>} : memref<392x256xf32, #tpu.memory_space<vmem>>, vector<8x256xf32>,
    %c0_97 = arith.constant 0 : index
    %c127 = arith.constant 127 : index
    %222 = vector.load %arg11[%c0_97, %c127] : memref<8x512xf32, #tpu.memory_space<vmem>>, vector<8x256xf32>
    %cst_98 = arith.constant 0.000000e+00 : f32
    %223 = vector.shape_cast %60 : vector<1x256xi1> to vector<1x256xi1>
    %224 = vector.broadcast %223 : vector<1x256xi1> to vector<8x256xi1>
    %225 = vector.broadcast %cst_98 : f32 to vector<8x256xf32>
    %226 = arith.select %224, %222, %225 : vector<8x256xi1>, vector<8x256xf32>
    %c184 = arith.constant 184 : index
    %c0_99 = arith.constant 0 : index
    %227 = vector.load %arg12[%c184, %c0_99] : memref<392x256xf32, #tpu.memory_space<vmem>>, vector<8x256xf32>
    tpu.vector_store %arg12[%c184, %c0_99], %226 {strides = array<i32>} : memref<392x256xf32, #tpu.memory_space<vmem>>, vector<8x256xf32>,
    %c0_100 = arith.constant 0 : index
    %c128_101 = arith.constant 128 : index
    %228 = vector.load %arg11[%c0_100, %c128_101] : memref<8x512xf32, #tpu.memory_space<vmem>>, vector<8x256xf32>
    %cst_102 = arith.constant 0.000000e+00 : f32
    %229 = vector.shape_cast %65 : vector<1x256xi1> to vector<1x256xi1>
    %230 = vector.broadcast %229 : vector<1x256xi1> to vector<8x256xi1>
    %231 = vector.broadcast %cst_102 : f32 to vector<8x256xf32>
    %232 = arith.select %230, %228, %231 : vector<8x256xi1>, vector<8x256xf32>
    %c192 = arith.constant 192 : index
    %c0_103 = arith.constant 0 : index
    %233 = vector.load %arg12[%c192, %c0_103] : memref<392x256xf32, #tpu.memory_space<vmem>>, vector<8x256xf32>
    tpu.vector_store %arg12[%c192, %c0_103], %232 {strides = array<i32>} : memref<392x256xf32, #tpu.memory_space<vmem>>, vector<8x256xf32>,
    %c0_104 = arith.constant 0 : index
    %c129 = arith.constant 129 : index
    %234 = vector.load %arg11[%c0_104, %c129] : memref<8x512xf32, #tpu.memory_space<vmem>>, vector<8x256xf32>
    %cst_105 = arith.constant 0.000000e+00 : f32
    %235 = vector.shape_cast %70 : vector<1x256xi1> to vector<1x256xi1>
    %236 = vector.broadcast %235 : vector<1x256xi1> to vector<8x256xi1>
    %237 = vector.broadcast %cst_105 : f32 to vector<8x256xf32>
    %238 = arith.select %236, %234, %237 : vector<8x256xi1>, vector<8x256xf32>
    %c200 = arith.constant 200 : index
    %c0_106 = arith.constant 0 : index
    %239 = vector.load %arg12[%c200, %c0_106] : memref<392x256xf32, #tpu.memory_space<vmem>>, vector<8x256xf32>
    tpu.vector_store %arg12[%c200, %c0_106], %238 {strides = array<i32>} : memref<392x256xf32, #tpu.memory_space<vmem>>, vector<8x256xf32>,
    %c0_107 = arith.constant 0 : index
    %c130 = arith.constant 130 : index
    %240 = vector.load %arg11[%c0_107, %c130] : memref<8x512xf32, #tpu.memory_space<vmem>>, vector<8x256xf32>
    %cst_108 = arith.constant 0.000000e+00 : f32
    %241 = vector.shape_cast %75 : vector<1x256xi1> to vector<1x256xi1>
    %242 = vector.broadcast %241 : vector<1x256xi1> to vector<8x256xi1>
    %243 = vector.broadcast %cst_108 : f32 to vector<8x256xf32>
    %244 = arith.select %242, %240, %243 : vector<8x256xi1>, vector<8x256xf32>
    %c208 = arith.constant 208 : index
    %c0_109 = arith.constant 0 : index
    %245 = vector.load %arg12[%c208, %c0_109] : memref<392x256xf32, #tpu.memory_space<vmem>>, vector<8x256xf32>
    tpu.vector_store %arg12[%c208, %c0_109], %244 {strides = array<i32>} : memref<392x256xf32, #tpu.memory_space<vmem>>, vector<8x256xf32>,
    %c0_110 = arith.constant 0 : index
    %c131 = arith.constant 131 : index
    %246 = vector.load %arg11[%c0_110, %c131] : memref<8x512xf32, #tpu.memory_space<vmem>>, vector<8x256xf32>
    %cst_111 = arith.constant 0.000000e+00 : f32
    %247 = vector.shape_cast %80 : vector<1x256xi1> to vector<1x256xi1>
    %248 = vector.broadcast %247 : vector<1x256xi1> to vector<8x256xi1>
    %249 = vector.broadcast %cst_111 : f32 to vector<8x256xf32>
    %250 = arith.select %248, %246, %249 : vector<8x256xi1>, vector<8x256xf32>
    %c216 = arith.constant 216 : index
    %c0_112 = arith.constant 0 : index
    %251 = vector.load %arg12[%c216, %c0_112] : memref<392x256xf32, #tpu.memory_space<vmem>>, vector<8x256xf32>
    tpu.vector_store %arg12[%c216, %c0_112], %250 {strides = array<i32>} : memref<392x256xf32, #tpu.memory_space<vmem>>, vector<8x256xf32>,
    %c0_113 = arith.constant 0 : index
    %c141 = arith.constant 141 : index
    %252 = vector.load %arg11[%c0_113, %c141] : memref<8x512xf32, #tpu.memory_space<vmem>>, vector<8x256xf32>
    %cst_114 = arith.constant 0.000000e+00 : f32
    %253 = vector.shape_cast %50 : vector<1x256xi1> to vector<1x256xi1>
    %254 = vector.broadcast %253 : vector<1x256xi1> to vector<8x256xi1>
    %255 = vector.broadcast %cst_114 : f32 to vector<8x256xf32>
    %256 = arith.select %254, %252, %255 : vector<8x256xi1>, vector<8x256xf32>
    %c224 = arith.constant 224 : index
    %c0_115 = arith.constant 0 : index
    %257 = vector.load %arg12[%c224, %c0_115] : memref<392x256xf32, #tpu.memory_space<vmem>>, vector<8x256xf32>
    tpu.vector_store %arg12[%c224, %c0_115], %256 {strides = array<i32>} : memref<392x256xf32, #tpu.memory_space<vmem>>, vector<8x256xf32>,
    %c0_116 = arith.constant 0 : index
    %c142 = arith.constant 142 : index
    %258 = vector.load %arg11[%c0_116, %c142] : memref<8x512xf32, #tpu.memory_space<vmem>>, vector<8x256xf32>
    %cst_117 = arith.constant 0.000000e+00 : f32
    %259 = vector.shape_cast %55 : vector<1x256xi1> to vector<1x256xi1>
    %260 = vector.broadcast %259 : vector<1x256xi1> to vector<8x256xi1>
    %261 = vector.broadcast %cst_117 : f32 to vector<8x256xf32>
    %262 = arith.select %260, %258, %261 : vector<8x256xi1>, vector<8x256xf32>
    %c232 = arith.constant 232 : index
    %c0_118 = arith.constant 0 : index
    %263 = vector.load %arg12[%c232, %c0_118] : memref<392x256xf32, #tpu.memory_space<vmem>>, vector<8x256xf32>
    tpu.vector_store %arg12[%c232, %c0_118], %262 {strides = array<i32>} : memref<392x256xf32, #tpu.memory_space<vmem>>, vector<8x256xf32>,
    %c0_119 = arith.constant 0 : index
    %c143 = arith.constant 143 : index
    %264 = vector.load %arg11[%c0_119, %c143] : memref<8x512xf32, #tpu.memory_space<vmem>>, vector<8x256xf32>
    %cst_120 = arith.constant 0.000000e+00 : f32
    %265 = vector.shape_cast %60 : vector<1x256xi1> to vector<1x256xi1>
    %266 = vector.broadcast %265 : vector<1x256xi1> to vector<8x256xi1>
    %267 = vector.broadcast %cst_120 : f32 to vector<8x256xf32>
    %268 = arith.select %266, %264, %267 : vector<8x256xi1>, vector<8x256xf32>
    %c240 = arith.constant 240 : index
    %c0_121 = arith.constant 0 : index
    %269 = vector.load %arg12[%c240, %c0_121] : memref<392x256xf32, #tpu.memory_space<vmem>>, vector<8x256xf32>
    tpu.vector_store %arg12[%c240, %c0_121], %268 {strides = array<i32>} : memref<392x256xf32, #tpu.memory_space<vmem>>, vector<8x256xf32>,
    %c0_122 = arith.constant 0 : index
    %c144_123 = arith.constant 144 : index
    %270 = vector.load %arg11[%c0_122, %c144_123] : memref<8x512xf32, #tpu.memory_space<vmem>>, vector<8x256xf32>
    %cst_124 = arith.constant 0.000000e+00 : f32
    %271 = vector.shape_cast %65 : vector<1x256xi1> to vector<1x256xi1>
    %272 = vector.broadcast %271 : vector<1x256xi1> to vector<8x256xi1>
    %273 = vector.broadcast %cst_124 : f32 to vector<8x256xf32>
    %274 = arith.select %272, %270, %273 : vector<8x256xi1>, vector<8x256xf32>
    %c248 = arith.constant 248 : index
    %c0_125 = arith.constant 0 : index
    %275 = vector.load %arg12[%c248, %c0_125] : memref<392x256xf32, #tpu.memory_space<vmem>>, vector<8x256xf32>
    tpu.vector_store %arg12[%c248, %c0_125], %274 {strides = array<i32>} : memref<392x256xf32, #tpu.memory_space<vmem>>, vector<8x256xf32>,
    %c0_126 = arith.constant 0 : index
    %c145 = arith.constant 145 : index
    %276 = vector.load %arg11[%c0_126, %c145] : memref<8x512xf32, #tpu.memory_space<vmem>>, vector<8x256xf32>
    %cst_127 = arith.constant 0.000000e+00 : f32
    %277 = vector.shape_cast %70 : vector<1x256xi1> to vector<1x256xi1>
    %278 = vector.broadcast %277 : vector<1x256xi1> to vector<8x256xi1>
    %279 = vector.broadcast %cst_127 : f32 to vector<8x256xf32>
    %280 = arith.select %278, %276, %279 : vector<8x256xi1>, vector<8x256xf32>
    %c256 = arith.constant 256 : index
    %c0_128 = arith.constant 0 : index
    %281 = vector.load %arg12[%c256, %c0_128] : memref<392x256xf32, #tpu.memory_space<vmem>>, vector<8x256xf32>
    tpu.vector_store %arg12[%c256, %c0_128], %280 {strides = array<i32>} : memref<392x256xf32, #tpu.memory_space<vmem>>, vector<8x256xf32>,
    %c0_129 = arith.constant 0 : index
    %c146 = arith.constant 146 : index
    %282 = vector.load %arg11[%c0_129, %c146] : memref<8x512xf32, #tpu.memory_space<vmem>>, vector<8x256xf32>
    %cst_130 = arith.constant 0.000000e+00 : f32
    %283 = vector.shape_cast %75 : vector<1x256xi1> to vector<1x256xi1>
    %284 = vector.broadcast %283 : vector<1x256xi1> to vector<8x256xi1>
    %285 = vector.broadcast %cst_130 : f32 to vector<8x256xf32>
    %286 = arith.select %284, %282, %285 : vector<8x256xi1>, vector<8x256xf32>
    %c264 = arith.constant 264 : index
    %c0_131 = arith.constant 0 : index
    %287 = vector.load %arg12[%c264, %c0_131] : memref<392x256xf32, #tpu.memory_space<vmem>>, vector<8x256xf32>
    tpu.vector_store %arg12[%c264, %c0_131], %286 {strides = array<i32>} : memref<392x256xf32, #tpu.memory_space<vmem>>, vector<8x256xf32>,
    %c0_132 = arith.constant 0 : index
    %c147 = arith.constant 147 : index
    %288 = vector.load %arg11[%c0_132, %c147] : memref<8x512xf32, #tpu.memory_space<vmem>>, vector<8x256xf32>
    %cst_133 = arith.constant 0.000000e+00 : f32
    %289 = vector.shape_cast %80 : vector<1x256xi1> to vector<1x256xi1>
    %290 = vector.broadcast %289 : vector<1x256xi1> to vector<8x256xi1>
    %291 = vector.broadcast %cst_133 : f32 to vector<8x256xf32>
    %292 = arith.select %290, %288, %291 : vector<8x256xi1>, vector<8x256xf32>
    %c272 = arith.constant 272 : index
    %c0_134 = arith.constant 0 : index
    %293 = vector.load %arg12[%c272, %c0_134] : memref<392x256xf32, #tpu.memory_space<vmem>>, vector<8x256xf32>
    tpu.vector_store %arg12[%c272, %c0_134], %292 {strides = array<i32>} : memref<392x256xf32, #tpu.memory_space<vmem>>, vector<8x256xf32>,
    %c0_135 = arith.constant 0 : index
    %c157 = arith.constant 157 : index
    %294 = vector.load %arg11[%c0_135, %c157] : memref<8x512xf32, #tpu.memory_space<vmem>>, vector<8x256xf32>
    %cst_136 = arith.constant 0.000000e+00 : f32
    %295 = vector.shape_cast %50 : vector<1x256xi1> to vector<1x256xi1>
    %296 = vector.broadcast %295 : vector<1x256xi1> to vector<8x256xi1>
    %297 = vector.broadcast %cst_136 : f32 to vector<8x256xf32>
    %298 = arith.select %296, %294, %297 : vector<8x256xi1>, vector<8x256xf32>
    %c280 = arith.constant 280 : index
    %c0_137 = arith.constant 0 : index
    %299 = vector.load %arg12[%c280, %c0_137] : memref<392x256xf32, #tpu.memory_space<vmem>>, vector<8x256xf32>
    tpu.vector_store %arg12[%c280, %c0_137], %298 {strides = array<i32>} : memref<392x256xf32, #tpu.memory_space<vmem>>, vector<8x256xf32>,
    %c0_138 = arith.constant 0 : index
    %c158 = arith.constant 158 : index
    %300 = vector.load %arg11[%c0_138, %c158] : memref<8x512xf32, #tpu.memory_space<vmem>>, vector<8x256xf32>
    %cst_139 = arith.constant 0.000000e+00 : f32
    %301 = vector.shape_cast %55 : vector<1x256xi1> to vector<1x256xi1>
    %302 = vector.broadcast %301 : vector<1x256xi1> to vector<8x256xi1>
    %303 = vector.broadcast %cst_139 : f32 to vector<8x256xf32>
    %304 = arith.select %302, %300, %303 : vector<8x256xi1>, vector<8x256xf32>
    %c288 = arith.constant 288 : index
    %c0_140 = arith.constant 0 : index
    %305 = vector.load %arg12[%c288, %c0_140] : memref<392x256xf32, #tpu.memory_space<vmem>>, vector<8x256xf32>
    tpu.vector_store %arg12[%c288, %c0_140], %304 {strides = array<i32>} : memref<392x256xf32, #tpu.memory_space<vmem>>, vector<8x256xf32>,
    %c0_141 = arith.constant 0 : index
    %c159 = arith.constant 159 : index
    %306 = vector.load %arg11[%c0_141, %c159] : memref<8x512xf32, #tpu.memory_space<vmem>>, vector<8x256xf32>
    %cst_142 = arith.constant 0.000000e+00 : f32
    %307 = vector.shape_cast %60 : vector<1x256xi1> to vector<1x256xi1>
    %308 = vector.broadcast %307 : vector<1x256xi1> to vector<8x256xi1>
    %309 = vector.broadcast %cst_142 : f32 to vector<8x256xf32>
    %310 = arith.select %308, %306, %309 : vector<8x256xi1>, vector<8x256xf32>
    %c296 = arith.constant 296 : index
    %c0_143 = arith.constant 0 : index
    %311 = vector.load %arg12[%c296, %c0_143] : memref<392x256xf32, #tpu.memory_space<vmem>>, vector<8x256xf32>
    tpu.vector_store %arg12[%c296, %c0_143], %310 {strides = array<i32>} : memref<392x256xf32, #tpu.memory_space<vmem>>, vector<8x256xf32>,
    %c0_144 = arith.constant 0 : index
    %c160_145 = arith.constant 160 : index
    %312 = vector.load %arg11[%c0_144, %c160_145] : memref<8x512xf32, #tpu.memory_space<vmem>>, vector<8x256xf32>
    %cst_146 = arith.constant 0.000000e+00 : f32
    %313 = vector.shape_cast %65 : vector<1x256xi1> to vector<1x256xi1>
    %314 = vector.broadcast %313 : vector<1x256xi1> to vector<8x256xi1>
    %315 = vector.broadcast %cst_146 : f32 to vector<8x256xf32>
    %316 = arith.select %314, %312, %315 : vector<8x256xi1>, vector<8x256xf32>
    %c304 = arith.constant 304 : index
    %c0_147 = arith.constant 0 : index
    %317 = vector.load %arg12[%c304, %c0_147] : memref<392x256xf32, #tpu.memory_space<vmem>>, vector<8x256xf32>
    tpu.vector_store %arg12[%c304, %c0_147], %316 {strides = array<i32>} : memref<392x256xf32, #tpu.memory_space<vmem>>, vector<8x256xf32>,
    %c0_148 = arith.constant 0 : index
    %c161 = arith.constant 161 : index
    %318 = vector.load %arg11[%c0_148, %c161] : memref<8x512xf32, #tpu.memory_space<vmem>>, vector<8x256xf32>
    %cst_149 = arith.constant 0.000000e+00 : f32
    %319 = vector.shape_cast %70 : vector<1x256xi1> to vector<1x256xi1>
    %320 = vector.broadcast %319 : vector<1x256xi1> to vector<8x256xi1>
    %321 = vector.broadcast %cst_149 : f32 to vector<8x256xf32>
    %322 = arith.select %320, %318, %321 : vector<8x256xi1>, vector<8x256xf32>
    %c312 = arith.constant 312 : index
    %c0_150 = arith.constant 0 : index
    %323 = vector.load %arg12[%c312, %c0_150] : memref<392x256xf32, #tpu.memory_space<vmem>>, vector<8x256xf32>
    tpu.vector_store %arg12[%c312, %c0_150], %322 {strides = array<i32>} : memref<392x256xf32, #tpu.memory_space<vmem>>, vector<8x256xf32>,
    %c0_151 = arith.constant 0 : index
    %c162 = arith.constant 162 : index
    %324 = vector.load %arg11[%c0_151, %c162] : memref<8x512xf32, #tpu.memory_space<vmem>>, vector<8x256xf32>
    %cst_152 = arith.constant 0.000000e+00 : f32
    %325 = vector.shape_cast %75 : vector<1x256xi1> to vector<1x256xi1>
    %326 = vector.broadcast %325 : vector<1x256xi1> to vector<8x256xi1>
    %327 = vector.broadcast %cst_152 : f32 to vector<8x256xf32>
    %328 = arith.select %326, %324, %327 : vector<8x256xi1>, vector<8x256xf32>
    %c320 = arith.constant 320 : index
    %c0_153 = arith.constant 0 : index
    %329 = vector.load %arg12[%c320, %c0_153] : memref<392x256xf32, #tpu.memory_space<vmem>>, vector<8x256xf32>
    tpu.vector_store %arg12[%c320, %c0_153], %328 {strides = array<i32>} : memref<392x256xf32, #tpu.memory_space<vmem>>, vector<8x256xf32>,
    %c0_154 = arith.constant 0 : index
    %c163 = arith.constant 163 : index
    %330 = vector.load %arg11[%c0_154, %c163] : memref<8x512xf32, #tpu.memory_space<vmem>>, vector<8x256xf32>
    %cst_155 = arith.constant 0.000000e+00 : f32
    %331 = vector.shape_cast %80 : vector<1x256xi1> to vector<1x256xi1>
    %332 = vector.broadcast %331 : vector<1x256xi1> to vector<8x256xi1>
    %333 = vector.broadcast %cst_155 : f32 to vector<8x256xf32>
    %334 = arith.select %332, %330, %333 : vector<8x256xi1>, vector<8x256xf32>
    %c328 = arith.constant 328 : index
    %c0_156 = arith.constant 0 : index
    %335 = vector.load %arg12[%c328, %c0_156] : memref<392x256xf32, #tpu.memory_space<vmem>>, vector<8x256xf32>
    tpu.vector_store %arg12[%c328, %c0_156], %334 {strides = array<i32>} : memref<392x256xf32, #tpu.memory_space<vmem>>, vector<8x256xf32>,
    %c0_157 = arith.constant 0 : index
    %c173 = arith.constant 173 : index
    %336 = vector.load %arg11[%c0_157, %c173] : memref<8x512xf32, #tpu.memory_space<vmem>>, vector<8x256xf32>
    %cst_158 = arith.constant 0.000000e+00 : f32
    %337 = vector.shape_cast %50 : vector<1x256xi1> to vector<1x256xi1>
    %338 = vector.broadcast %337 : vector<1x256xi1> to vector<8x256xi1>
    %339 = vector.broadcast %cst_158 : f32 to vector<8x256xf32>
    %340 = arith.select %338, %336, %339 : vector<8x256xi1>, vector<8x256xf32>
    %c336 = arith.constant 336 : index
    %c0_159 = arith.constant 0 : index
    %341 = vector.load %arg12[%c336, %c0_159] : memref<392x256xf32, #tpu.memory_space<vmem>>, vector<8x256xf32>
    tpu.vector_store %arg12[%c336, %c0_159], %340 {strides = array<i32>} : memref<392x256xf32, #tpu.memory_space<vmem>>, vector<8x256xf32>,
    %c0_160 = arith.constant 0 : index
    %c174 = arith.constant 174 : index
    %342 = vector.load %arg11[%c0_160, %c174] : memref<8x512xf32, #tpu.memory_space<vmem>>, vector<8x256xf32>
    %cst_161 = arith.constant 0.000000e+00 : f32
    %343 = vector.shape_cast %55 : vector<1x256xi1> to vector<1x256xi1>
    %344 = vector.broadcast %343 : vector<1x256xi1> to vector<8x256xi1>
    %345 = vector.broadcast %cst_161 : f32 to vector<8x256xf32>
    %346 = arith.select %344, %342, %345 : vector<8x256xi1>, vector<8x256xf32>
    %c344 = arith.constant 344 : index
    %c0_162 = arith.constant 0 : index
    %347 = vector.load %arg12[%c344, %c0_162] : memref<392x256xf32, #tpu.memory_space<vmem>>, vector<8x256xf32>
    tpu.vector_store %arg12[%c344, %c0_162], %346 {strides = array<i32>} : memref<392x256xf32, #tpu.memory_space<vmem>>, vector<8x256xf32>,
    %c0_163 = arith.constant 0 : index
    %c175 = arith.constant 175 : index
    %348 = vector.load %arg11[%c0_163, %c175] : memref<8x512xf32, #tpu.memory_space<vmem>>, vector<8x256xf32>
    %cst_164 = arith.constant 0.000000e+00 : f32
    %349 = vector.shape_cast %60 : vector<1x256xi1> to vector<1x256xi1>
    %350 = vector.broadcast %349 : vector<1x256xi1> to vector<8x256xi1>
    %351 = vector.broadcast %cst_164 : f32 to vector<8x256xf32>
    %352 = arith.select %350, %348, %351 : vector<8x256xi1>, vector<8x256xf32>
    %c352 = arith.constant 352 : index
    %c0_165 = arith.constant 0 : index
    %353 = vector.load %arg12[%c352, %c0_165] : memref<392x256xf32, #tpu.memory_space<vmem>>, vector<8x256xf32>
    tpu.vector_store %arg12[%c352, %c0_165], %352 {strides = array<i32>} : memref<392x256xf32, #tpu.memory_space<vmem>>, vector<8x256xf32>,
    %c0_166 = arith.constant 0 : index
    %c176_167 = arith.constant 176 : index
    %354 = vector.load %arg11[%c0_166, %c176_167] : memref<8x512xf32, #tpu.memory_space<vmem>>, vector<8x256xf32>
    %cst_168 = arith.constant 0.000000e+00 : f32
    %355 = vector.shape_cast %65 : vector<1x256xi1> to vector<1x256xi1>
    %356 = vector.broadcast %355 : vector<1x256xi1> to vector<8x256xi1>
    %357 = vector.broadcast %cst_168 : f32 to vector<8x256xf32>
    %358 = arith.select %356, %354, %357 : vector<8x256xi1>, vector<8x256xf32>
    %c360 = arith.constant 360 : index
    %c0_169 = arith.constant 0 : index
    %359 = vector.load %arg12[%c360, %c0_169] : memref<392x256xf32, #tpu.memory_space<vmem>>, vector<8x256xf32>
    tpu.vector_store %arg12[%c360, %c0_169], %358 {strides = array<i32>} : memref<392x256xf32, #tpu.memory_space<vmem>>, vector<8x256xf32>,
    %c0_170 = arith.constant 0 : index
    %c177 = arith.constant 177 : index
    %360 = vector.load %arg11[%c0_170, %c177] : memref<8x512xf32, #tpu.memory_space<vmem>>, vector<8x256xf32>
    %cst_171 = arith.constant 0.000000e+00 : f32
    %361 = vector.shape_cast %70 : vector<1x256xi1> to vector<1x256xi1>
    %362 = vector.broadcast %361 : vector<1x256xi1> to vector<8x256xi1>
    %363 = vector.broadcast %cst_171 : f32 to vector<8x256xf32>
    %364 = arith.select %362, %360, %363 : vector<8x256xi1>, vector<8x256xf32>
    %c368 = arith.constant 368 : index
    %c0_172 = arith.constant 0 : index
    %365 = vector.load %arg12[%c368, %c0_172] : memref<392x256xf32, #tpu.memory_space<vmem>>, vector<8x256xf32>
    tpu.vector_store %arg12[%c368, %c0_172], %364 {strides = array<i32>} : memref<392x256xf32, #tpu.memory_space<vmem>>, vector<8x256xf32>,
    %c0_173 = arith.constant 0 : index
    %c178 = arith.constant 178 : index
    %366 = vector.load %arg11[%c0_173, %c178] : memref<8x512xf32, #tpu.memory_space<vmem>>, vector<8x256xf32>
    %cst_174 = arith.constant 0.000000e+00 : f32
    %367 = vector.shape_cast %75 : vector<1x256xi1> to vector<1x256xi1>
    %368 = vector.broadcast %367 : vector<1x256xi1> to vector<8x256xi1>
    %369 = vector.broadcast %cst_174 : f32 to vector<8x256xf32>
    %370 = arith.select %368, %366, %369 : vector<8x256xi1>, vector<8x256xf32>
    %c376 = arith.constant 376 : index
    %c0_175 = arith.constant 0 : index
    %371 = vector.load %arg12[%c376, %c0_175] : memref<392x256xf32, #tpu.memory_space<vmem>>, vector<8x256xf32>
    tpu.vector_store %arg12[%c376, %c0_175], %370 {strides = array<i32>} : memref<392x256xf32, #tpu.memory_space<vmem>>, vector<8x256xf32>,
    %c0_176 = arith.constant 0 : index
    %c179 = arith.constant 179 : index
    %372 = vector.load %arg11[%c0_176, %c179] : memref<8x512xf32, #tpu.memory_space<vmem>>, vector<8x256xf32>
    %cst_177 = arith.constant 0.000000e+00 : f32
    %373 = vector.shape_cast %80 : vector<1x256xi1> to vector<1x256xi1>
    %374 = vector.broadcast %373 : vector<1x256xi1> to vector<8x256xi1>
    %375 = vector.broadcast %cst_177 : f32 to vector<8x256xf32>
    %376 = arith.select %374, %372, %375 : vector<8x256xi1>, vector<8x256xf32>
    %c384 = arith.constant 384 : index
    %c0_178 = arith.constant 0 : index
    %377 = vector.load %arg12[%c384, %c0_178] : memref<392x256xf32, #tpu.memory_space<vmem>>, vector<8x256xf32>
    tpu.vector_store %arg12[%c384, %c0_178], %376 {strides = array<i32>} : memref<392x256xf32, #tpu.memory_space<vmem>>, vector<8x256xf32>,
    %c0_179 = arith.constant 0 : index
    %c0_180 = arith.constant 0 : index
    %378 = vector.load %arg6[%c0_179, %c0_180] : memref<2x392xf32, #tpu.memory_space<vmem>>, vector<2x392xf32>
    %c0_181 = arith.constant 0 : index
    %c0_182 = arith.constant 0 : index
    %379 = vector.load %arg12[%c0_181, %c0_182] : memref<392x256xf32, #tpu.memory_space<vmem>>, vector<392x256xf32>
    %cst_183 = arith.constant dense<0.000000e+00> : vector<2x256xf32>
    %380 = tpu.matmul %378, %379, %cst_183 {dimension_numbers = #tpu.dot_dimension_numbers<[1], [0], [0], [1], [0, 0, 1, 1], [], []>} : vector<2x392xf32>, vector<392x256xf32>, vector<2x256xf32> -> vector<2x256xf32>
    %c0_184 = arith.constant 0 : index
    %c0_185 = arith.constant 0 : index
    %381 = vector.load %arg7[%c0_184, %c0_185] : memref<2x1xf32, #tpu.memory_space<vmem>>, vector<2x1xf32>
    %382 = vector.broadcast %381 : vector<2x1xf32> to vector<2x256xf32>
    %383 = arith.addf %380, %382 : vector<2x256xf32>
    %cst_186 = arith.constant 0.000000e+00 : f32
    %384 = vector.broadcast %cst_186 : f32 to vector<2x256xf32>
    %385 = arith.maximumf %383, %384 : vector<2x256xf32>
    %cst_187 = arith.constant 0.000000e+00 : f32
    %386 = vector.broadcast %cst_187 : f32 to vector<2x512xf32>
    %c0_188 = arith.constant 0 : index
    %c0_189 = arith.constant 0 : index
    %387 = vector.load %arg13[%c0_188, %c0_189] : memref<2x512xf32, #tpu.memory_space<vmem>>, vector<2x512xf32>
    tpu.vector_store %arg13[%c0_188, %c0_189], %386 {strides = array<i32>} : memref<2x512xf32, #tpu.memory_space<vmem>>, vector<2x512xf32>,
    %c0_190 = arith.constant 0 : index
    %c128_191 = arith.constant 128 : index
    %388 = vector.load %arg13[%c0_190, %c128_191] : memref<2x512xf32, #tpu.memory_space<vmem>>, vector<2x256xf32>
    tpu.vector_store %arg13[%c0_190, %c128_191], %385 {strides = array<i32>} : memref<2x512xf32, #tpu.memory_space<vmem>>, vector<2x256xf32>,
    %c0_192 = arith.constant 0 : index
    %c77_193 = arith.constant 77 : index
    %389 = vector.load %arg13[%c0_192, %c77_193] : memref<2x512xf32, #tpu.memory_space<vmem>>, vector<2x256xf32>
    %cst_194 = arith.constant 0.000000e+00 : f32
    %390 = vector.shape_cast %50 : vector<1x256xi1> to vector<1x256xi1>
    %391 = vector.broadcast %390 : vector<1x256xi1> to vector<2x256xi1>
    %392 = vector.broadcast %cst_194 : f32 to vector<2x256xf32>
    %393 = arith.select %391, %389, %392 : vector<2x256xi1>, vector<2x256xf32>
    %c0_195 = arith.constant 0 : index
    %c0_196 = arith.constant 0 : index
    %394 = vector.load %arg14[%c0_195, %c0_196] : memref<98x256xf32, #tpu.memory_space<vmem>>, vector<2x256xf32>
    tpu.vector_store %arg14[%c0_195, %c0_196], %393 {strides = array<i32>} : memref<98x256xf32, #tpu.memory_space<vmem>>, vector<2x256xf32>,
    %c0_197 = arith.constant 0 : index
    %c78_198 = arith.constant 78 : index
    %395 = vector.load %arg13[%c0_197, %c78_198] : memref<2x512xf32, #tpu.memory_space<vmem>>, vector<2x256xf32>
    %cst_199 = arith.constant 0.000000e+00 : f32
    %396 = vector.shape_cast %55 : vector<1x256xi1> to vector<1x256xi1>
    %397 = vector.broadcast %396 : vector<1x256xi1> to vector<2x256xi1>
    %398 = vector.broadcast %cst_199 : f32 to vector<2x256xf32>
    %399 = arith.select %397, %395, %398 : vector<2x256xi1>, vector<2x256xf32>
    %c2 = arith.constant 2 : index
    %c0_200 = arith.constant 0 : index
    %400 = vector.load %arg14[%c2, %c0_200] : memref<98x256xf32, #tpu.memory_space<vmem>>, vector<2x256xf32>
    tpu.vector_store %arg14[%c2, %c0_200], %399 {strides = array<i32>} : memref<98x256xf32, #tpu.memory_space<vmem>>, vector<2x256xf32>,
    %c0_201 = arith.constant 0 : index
    %c79_202 = arith.constant 79 : index
    %401 = vector.load %arg13[%c0_201, %c79_202] : memref<2x512xf32, #tpu.memory_space<vmem>>, vector<2x256xf32>
    %cst_203 = arith.constant 0.000000e+00 : f32
    %402 = vector.shape_cast %60 : vector<1x256xi1> to vector<1x256xi1>
    %403 = vector.broadcast %402 : vector<1x256xi1> to vector<2x256xi1>
    %404 = vector.broadcast %cst_203 : f32 to vector<2x256xf32>
    %405 = arith.select %403, %401, %404 : vector<2x256xi1>, vector<2x256xf32>
    %c4 = arith.constant 4 : index
    %c0_204 = arith.constant 0 : index
    %406 = vector.load %arg14[%c4, %c0_204] : memref<98x256xf32, #tpu.memory_space<vmem>>, vector<2x256xf32>
    tpu.vector_store %arg14[%c4, %c0_204], %405 {strides = array<i32>} : memref<98x256xf32, #tpu.memory_space<vmem>>, vector<2x256xf32>,
    %c0_205 = arith.constant 0 : index
    %c80_206 = arith.constant 80 : index
    %407 = vector.load %arg13[%c0_205, %c80_206] : memref<2x512xf32, #tpu.memory_space<vmem>>, vector<2x256xf32>
    %cst_207 = arith.constant 0.000000e+00 : f32
    %408 = vector.shape_cast %65 : vector<1x256xi1> to vector<1x256xi1>
    %409 = vector.broadcast %408 : vector<1x256xi1> to vector<2x256xi1>
    %410 = vector.broadcast %cst_207 : f32 to vector<2x256xf32>
    %411 = arith.select %409, %407, %410 : vector<2x256xi1>, vector<2x256xf32>
    %c6 = arith.constant 6 : index
    %c0_208 = arith.constant 0 : index
    %412 = vector.load %arg14[%c6, %c0_208] : memref<98x256xf32, #tpu.memory_space<vmem>>, vector<2x256xf32>
    tpu.vector_store %arg14[%c6, %c0_208], %411 {strides = array<i32>} : memref<98x256xf32, #tpu.memory_space<vmem>>, vector<2x256xf32>,
    %c0_209 = arith.constant 0 : index
    %c81_210 = arith.constant 81 : index
    %413 = vector.load %arg13[%c0_209, %c81_210] : memref<2x512xf32, #tpu.memory_space<vmem>>, vector<2x256xf32>
    %cst_211 = arith.constant 0.000000e+00 : f32
    %414 = vector.shape_cast %70 : vector<1x256xi1> to vector<1x256xi1>
    %415 = vector.broadcast %414 : vector<1x256xi1> to vector<2x256xi1>
    %416 = vector.broadcast %cst_211 : f32 to vector<2x256xf32>
    %417 = arith.select %415, %413, %416 : vector<2x256xi1>, vector<2x256xf32>
    %c8_212 = arith.constant 8 : index
    %c0_213 = arith.constant 0 : index
    %418 = vector.load %arg14[%c8_212, %c0_213] : memref<98x256xf32, #tpu.memory_space<vmem>>, vector<2x256xf32>
    tpu.vector_store %arg14[%c8_212, %c0_213], %417 {strides = array<i32>} : memref<98x256xf32, #tpu.memory_space<vmem>>, vector<2x256xf32>,
    %c0_214 = arith.constant 0 : index
    %c82_215 = arith.constant 82 : index
    %419 = vector.load %arg13[%c0_214, %c82_215] : memref<2x512xf32, #tpu.memory_space<vmem>>, vector<2x256xf32>
    %cst_216 = arith.constant 0.000000e+00 : f32
    %420 = vector.shape_cast %75 : vector<1x256xi1> to vector<1x256xi1>
    %421 = vector.broadcast %420 : vector<1x256xi1> to vector<2x256xi1>
    %422 = vector.broadcast %cst_216 : f32 to vector<2x256xf32>
    %423 = arith.select %421, %419, %422 : vector<2x256xi1>, vector<2x256xf32>
    %c10 = arith.constant 10 : index
    %c0_217 = arith.constant 0 : index
    %424 = vector.load %arg14[%c10, %c0_217] : memref<98x256xf32, #tpu.memory_space<vmem>>, vector<2x256xf32>
    tpu.vector_store %arg14[%c10, %c0_217], %423 {strides = array<i32>} : memref<98x256xf32, #tpu.memory_space<vmem>>, vector<2x256xf32>,
    %c0_218 = arith.constant 0 : index
    %c83_219 = arith.constant 83 : index
    %425 = vector.load %arg13[%c0_218, %c83_219] : memref<2x512xf32, #tpu.memory_space<vmem>>, vector<2x256xf32>
    %cst_220 = arith.constant 0.000000e+00 : f32
    %426 = vector.shape_cast %80 : vector<1x256xi1> to vector<1x256xi1>
    %427 = vector.broadcast %426 : vector<1x256xi1> to vector<2x256xi1>
    %428 = vector.broadcast %cst_220 : f32 to vector<2x256xf32>
    %429 = arith.select %427, %425, %428 : vector<2x256xi1>, vector<2x256xf32>
    %c12 = arith.constant 12 : index
    %c0_221 = arith.constant 0 : index
    %430 = vector.load %arg14[%c12, %c0_221] : memref<98x256xf32, #tpu.memory_space<vmem>>, vector<2x256xf32>
    tpu.vector_store %arg14[%c12, %c0_221], %429 {strides = array<i32>} : memref<98x256xf32, #tpu.memory_space<vmem>>, vector<2x256xf32>,
    %c0_222 = arith.constant 0 : index
    %c93_223 = arith.constant 93 : index
    %431 = vector.load %arg13[%c0_222, %c93_223] : memref<2x512xf32, #tpu.memory_space<vmem>>, vector<2x256xf32>
    %cst_224 = arith.constant 0.000000e+00 : f32
    %432 = vector.shape_cast %50 : vector<1x256xi1> to vector<1x256xi1>
    %433 = vector.broadcast %432 : vector<1x256xi1> to vector<2x256xi1>
    %434 = vector.broadcast %cst_224 : f32 to vector<2x256xf32>
    %435 = arith.select %433, %431, %434 : vector<2x256xi1>, vector<2x256xf32>
    %c14 = arith.constant 14 : index
    %c0_225 = arith.constant 0 : index
    %436 = vector.load %arg14[%c14, %c0_225] : memref<98x256xf32, #tpu.memory_space<vmem>>, vector<2x256xf32>
    tpu.vector_store %arg14[%c14, %c0_225], %435 {strides = array<i32>} : memref<98x256xf32, #tpu.memory_space<vmem>>, vector<2x256xf32>,
    %c0_226 = arith.constant 0 : index
    %c94_227 = arith.constant 94 : index
    %437 = vector.load %arg13[%c0_226, %c94_227] : memref<2x512xf32, #tpu.memory_space<vmem>>, vector<2x256xf32>
    %cst_228 = arith.constant 0.000000e+00 : f32
    %438 = vector.shape_cast %55 : vector<1x256xi1> to vector<1x256xi1>
    %439 = vector.broadcast %438 : vector<1x256xi1> to vector<2x256xi1>
    %440 = vector.broadcast %cst_228 : f32 to vector<2x256xf32>
    %441 = arith.select %439, %437, %440 : vector<2x256xi1>, vector<2x256xf32>
    %c16_229 = arith.constant 16 : index
    %c0_230 = arith.constant 0 : index
    %442 = vector.load %arg14[%c16_229, %c0_230] : memref<98x256xf32, #tpu.memory_space<vmem>>, vector<2x256xf32>
    tpu.vector_store %arg14[%c16_229, %c0_230], %441 {strides = array<i32>} : memref<98x256xf32, #tpu.memory_space<vmem>>, vector<2x256xf32>,
    %c0_231 = arith.constant 0 : index
    %c95_232 = arith.constant 95 : index
    %443 = vector.load %arg13[%c0_231, %c95_232] : memref<2x512xf32, #tpu.memory_space<vmem>>, vector<2x256xf32>
    %cst_233 = arith.constant 0.000000e+00 : f32
    %444 = vector.shape_cast %60 : vector<1x256xi1> to vector<1x256xi1>
    %445 = vector.broadcast %444 : vector<1x256xi1> to vector<2x256xi1>
    %446 = vector.broadcast %cst_233 : f32 to vector<2x256xf32>
    %447 = arith.select %445, %443, %446 : vector<2x256xi1>, vector<2x256xf32>
    %c18 = arith.constant 18 : index
    %c0_234 = arith.constant 0 : index
    %448 = vector.load %arg14[%c18, %c0_234] : memref<98x256xf32, #tpu.memory_space<vmem>>, vector<2x256xf32>
    tpu.vector_store %arg14[%c18, %c0_234], %447 {strides = array<i32>} : memref<98x256xf32, #tpu.memory_space<vmem>>, vector<2x256xf32>,
    %c0_235 = arith.constant 0 : index
    %c96_236 = arith.constant 96 : index
    %449 = vector.load %arg13[%c0_235, %c96_236] : memref<2x512xf32, #tpu.memory_space<vmem>>, vector<2x256xf32>
    %cst_237 = arith.constant 0.000000e+00 : f32
    %450 = vector.shape_cast %65 : vector<1x256xi1> to vector<1x256xi1>
    %451 = vector.broadcast %450 : vector<1x256xi1> to vector<2x256xi1>
    %452 = vector.broadcast %cst_237 : f32 to vector<2x256xf32>
    %453 = arith.select %451, %449, %452 : vector<2x256xi1>, vector<2x256xf32>
    %c20 = arith.constant 20 : index
    %c0_238 = arith.constant 0 : index
    %454 = vector.load %arg14[%c20, %c0_238] : memref<98x256xf32, #tpu.memory_space<vmem>>, vector<2x256xf32>
    tpu.vector_store %arg14[%c20, %c0_238], %453 {strides = array<i32>} : memref<98x256xf32, #tpu.memory_space<vmem>>, vector<2x256xf32>,
    %c0_239 = arith.constant 0 : index
    %c97_240 = arith.constant 97 : index
    %455 = vector.load %arg13[%c0_239, %c97_240] : memref<2x512xf32, #tpu.memory_space<vmem>>, vector<2x256xf32>
    %cst_241 = arith.constant 0.000000e+00 : f32
    %456 = vector.shape_cast %70 : vector<1x256xi1> to vector<1x256xi1>
    %457 = vector.broadcast %456 : vector<1x256xi1> to vector<2x256xi1>
    %458 = vector.broadcast %cst_241 : f32 to vector<2x256xf32>
    %459 = arith.select %457, %455, %458 : vector<2x256xi1>, vector<2x256xf32>
    %c22 = arith.constant 22 : index
    %c0_242 = arith.constant 0 : index
    %460 = vector.load %arg14[%c22, %c0_242] : memref<98x256xf32, #tpu.memory_space<vmem>>, vector<2x256xf32>
    tpu.vector_store %arg14[%c22, %c0_242], %459 {strides = array<i32>} : memref<98x256xf32, #tpu.memory_space<vmem>>, vector<2x256xf32>,
    %c0_243 = arith.constant 0 : index
    %c98_244 = arith.constant 98 : index
    %461 = vector.load %arg13[%c0_243, %c98_244] : memref<2x512xf32, #tpu.memory_space<vmem>>, vector<2x256xf32>
    %cst_245 = arith.constant 0.000000e+00 : f32
    %462 = vector.shape_cast %75 : vector<1x256xi1> to vector<1x256xi1>
    %463 = vector.broadcast %462 : vector<1x256xi1> to vector<2x256xi1>
    %464 = vector.broadcast %cst_245 : f32 to vector<2x256xf32>
    %465 = arith.select %463, %461, %464 : vector<2x256xi1>, vector<2x256xf32>
    %c24_246 = arith.constant 24 : index
    %c0_247 = arith.constant 0 : index
    %466 = vector.load %arg14[%c24_246, %c0_247] : memref<98x256xf32, #tpu.memory_space<vmem>>, vector<2x256xf32>
    tpu.vector_store %arg14[%c24_246, %c0_247], %465 {strides = array<i32>} : memref<98x256xf32, #tpu.memory_space<vmem>>, vector<2x256xf32>,
    %c0_248 = arith.constant 0 : index
    %c99_249 = arith.constant 99 : index
    %467 = vector.load %arg13[%c0_248, %c99_249] : memref<2x512xf32, #tpu.memory_space<vmem>>, vector<2x256xf32>
    %cst_250 = arith.constant 0.000000e+00 : f32
    %468 = vector.shape_cast %80 : vector<1x256xi1> to vector<1x256xi1>
    %469 = vector.broadcast %468 : vector<1x256xi1> to vector<2x256xi1>
    %470 = vector.broadcast %cst_250 : f32 to vector<2x256xf32>
    %471 = arith.select %469, %467, %470 : vector<2x256xi1>, vector<2x256xf32>
    %c26 = arith.constant 26 : index
    %c0_251 = arith.constant 0 : index
    %472 = vector.load %arg14[%c26, %c0_251] : memref<98x256xf32, #tpu.memory_space<vmem>>, vector<2x256xf32>
    tpu.vector_store %arg14[%c26, %c0_251], %471 {strides = array<i32>} : memref<98x256xf32, #tpu.memory_space<vmem>>, vector<2x256xf32>,
    %c0_252 = arith.constant 0 : index
    %c109_253 = arith.constant 109 : index
    %473 = vector.load %arg13[%c0_252, %c109_253] : memref<2x512xf32, #tpu.memory_space<vmem>>, vector<2x256xf32>
    %cst_254 = arith.constant 0.000000e+00 : f32
    %474 = vector.shape_cast %50 : vector<1x256xi1> to vector<1x256xi1>
    %475 = vector.broadcast %474 : vector<1x256xi1> to vector<2x256xi1>
    %476 = vector.broadcast %cst_254 : f32 to vector<2x256xf32>
    %477 = arith.select %475, %473, %476 : vector<2x256xi1>, vector<2x256xf32>
    %c28 = arith.constant 28 : index
    %c0_255 = arith.constant 0 : index
    %478 = vector.load %arg14[%c28, %c0_255] : memref<98x256xf32, #tpu.memory_space<vmem>>, vector<2x256xf32>
    tpu.vector_store %arg14[%c28, %c0_255], %477 {strides = array<i32>} : memref<98x256xf32, #tpu.memory_space<vmem>>, vector<2x256xf32>,
    %c0_256 = arith.constant 0 : index
    %c110_257 = arith.constant 110 : index
    %479 = vector.load %arg13[%c0_256, %c110_257] : memref<2x512xf32, #tpu.memory_space<vmem>>, vector<2x256xf32>
    %cst_258 = arith.constant 0.000000e+00 : f32
    %480 = vector.shape_cast %55 : vector<1x256xi1> to vector<1x256xi1>
    %481 = vector.broadcast %480 : vector<1x256xi1> to vector<2x256xi1>
    %482 = vector.broadcast %cst_258 : f32 to vector<2x256xf32>
    %483 = arith.select %481, %479, %482 : vector<2x256xi1>, vector<2x256xf32>
    %c30 = arith.constant 30 : index
    %c0_259 = arith.constant 0 : index
    %484 = vector.load %arg14[%c30, %c0_259] : memref<98x256xf32, #tpu.memory_space<vmem>>, vector<2x256xf32>
    tpu.vector_store %arg14[%c30, %c0_259], %483 {strides = array<i32>} : memref<98x256xf32, #tpu.memory_space<vmem>>, vector<2x256xf32>,
    %c0_260 = arith.constant 0 : index
    %c111_261 = arith.constant 111 : index
    %485 = vector.load %arg13[%c0_260, %c111_261] : memref<2x512xf32, #tpu.memory_space<vmem>>, vector<2x256xf32>
    %cst_262 = arith.constant 0.000000e+00 : f32
    %486 = vector.shape_cast %60 : vector<1x256xi1> to vector<1x256xi1>
    %487 = vector.broadcast %486 : vector<1x256xi1> to vector<2x256xi1>
    %488 = vector.broadcast %cst_262 : f32 to vector<2x256xf32>
    %489 = arith.select %487, %485, %488 : vector<2x256xi1>, vector<2x256xf32>
    %c32_263 = arith.constant 32 : index
    %c0_264 = arith.constant 0 : index
    %490 = vector.load %arg14[%c32_263, %c0_264] : memref<98x256xf32, #tpu.memory_space<vmem>>, vector<2x256xf32>
    tpu.vector_store %arg14[%c32_263, %c0_264], %489 {strides = array<i32>} : memref<98x256xf32, #tpu.memory_space<vmem>>, vector<2x256xf32>,
    %c0_265 = arith.constant 0 : index
    %c112_266 = arith.constant 112 : index
    %491 = vector.load %arg13[%c0_265, %c112_266] : memref<2x512xf32, #tpu.memory_space<vmem>>, vector<2x256xf32>
    %cst_267 = arith.constant 0.000000e+00 : f32
    %492 = vector.shape_cast %65 : vector<1x256xi1> to vector<1x256xi1>
    %493 = vector.broadcast %492 : vector<1x256xi1> to vector<2x256xi1>
    %494 = vector.broadcast %cst_267 : f32 to vector<2x256xf32>
    %495 = arith.select %493, %491, %494 : vector<2x256xi1>, vector<2x256xf32>
    %c34 = arith.constant 34 : index
    %c0_268 = arith.constant 0 : index
    %496 = vector.load %arg14[%c34, %c0_268] : memref<98x256xf32, #tpu.memory_space<vmem>>, vector<2x256xf32>
    tpu.vector_store %arg14[%c34, %c0_268], %495 {strides = array<i32>} : memref<98x256xf32, #tpu.memory_space<vmem>>, vector<2x256xf32>,
    %c0_269 = arith.constant 0 : index
    %c113_270 = arith.constant 113 : index
    %497 = vector.load %arg13[%c0_269, %c113_270] : memref<2x512xf32, #tpu.memory_space<vmem>>, vector<2x256xf32>
    %cst_271 = arith.constant 0.000000e+00 : f32
    %498 = vector.shape_cast %70 : vector<1x256xi1> to vector<1x256xi1>
    %499 = vector.broadcast %498 : vector<1x256xi1> to vector<2x256xi1>
    %500 = vector.broadcast %cst_271 : f32 to vector<2x256xf32>
    %501 = arith.select %499, %497, %500 : vector<2x256xi1>, vector<2x256xf32>
    %c36 = arith.constant 36 : index
    %c0_272 = arith.constant 0 : index
    %502 = vector.load %arg14[%c36, %c0_272] : memref<98x256xf32, #tpu.memory_space<vmem>>, vector<2x256xf32>
    tpu.vector_store %arg14[%c36, %c0_272], %501 {strides = array<i32>} : memref<98x256xf32, #tpu.memory_space<vmem>>, vector<2x256xf32>,
    %c0_273 = arith.constant 0 : index
    %c114_274 = arith.constant 114 : index
    %503 = vector.load %arg13[%c0_273, %c114_274] : memref<2x512xf32, #tpu.memory_space<vmem>>, vector<2x256xf32>
    %cst_275 = arith.constant 0.000000e+00 : f32
    %504 = vector.shape_cast %75 : vector<1x256xi1> to vector<1x256xi1>
    %505 = vector.broadcast %504 : vector<1x256xi1> to vector<2x256xi1>
    %506 = vector.broadcast %cst_275 : f32 to vector<2x256xf32>
    %507 = arith.select %505, %503, %506 : vector<2x256xi1>, vector<2x256xf32>
    %c38 = arith.constant 38 : index
    %c0_276 = arith.constant 0 : index
    %508 = vector.load %arg14[%c38, %c0_276] : memref<98x256xf32, #tpu.memory_space<vmem>>, vector<2x256xf32>
    tpu.vector_store %arg14[%c38, %c0_276], %507 {strides = array<i32>} : memref<98x256xf32, #tpu.memory_space<vmem>>, vector<2x256xf32>,
    %c0_277 = arith.constant 0 : index
    %c115_278 = arith.constant 115 : index
    %509 = vector.load %arg13[%c0_277, %c115_278] : memref<2x512xf32, #tpu.memory_space<vmem>>, vector<2x256xf32>
    %cst_279 = arith.constant 0.000000e+00 : f32
    %510 = vector.shape_cast %80 : vector<1x256xi1> to vector<1x256xi1>
    %511 = vector.broadcast %510 : vector<1x256xi1> to vector<2x256xi1>
    %512 = vector.broadcast %cst_279 : f32 to vector<2x256xf32>
    %513 = arith.select %511, %509, %512 : vector<2x256xi1>, vector<2x256xf32>
    %c40_280 = arith.constant 40 : index
    %c0_281 = arith.constant 0 : index
    %514 = vector.load %arg14[%c40_280, %c0_281] : memref<98x256xf32, #tpu.memory_space<vmem>>, vector<2x256xf32>
    tpu.vector_store %arg14[%c40_280, %c0_281], %513 {strides = array<i32>} : memref<98x256xf32, #tpu.memory_space<vmem>>, vector<2x256xf32>,
    %c0_282 = arith.constant 0 : index
    %c125_283 = arith.constant 125 : index
    %515 = vector.load %arg13[%c0_282, %c125_283] : memref<2x512xf32, #tpu.memory_space<vmem>>, vector<2x256xf32>
    %cst_284 = arith.constant 0.000000e+00 : f32
    %516 = vector.shape_cast %50 : vector<1x256xi1> to vector<1x256xi1>
    %517 = vector.broadcast %516 : vector<1x256xi1> to vector<2x256xi1>
    %518 = vector.broadcast %cst_284 : f32 to vector<2x256xf32>
    %519 = arith.select %517, %515, %518 : vector<2x256xi1>, vector<2x256xf32>
    %c42 = arith.constant 42 : index
    %c0_285 = arith.constant 0 : index
    %520 = vector.load %arg14[%c42, %c0_285] : memref<98x256xf32, #tpu.memory_space<vmem>>, vector<2x256xf32>
    tpu.vector_store %arg14[%c42, %c0_285], %519 {strides = array<i32>} : memref<98x256xf32, #tpu.memory_space<vmem>>, vector<2x256xf32>,
    %c0_286 = arith.constant 0 : index
    %c126_287 = arith.constant 126 : index
    %521 = vector.load %arg13[%c0_286, %c126_287] : memref<2x512xf32, #tpu.memory_space<vmem>>, vector<2x256xf32>
    %cst_288 = arith.constant 0.000000e+00 : f32
    %522 = vector.shape_cast %55 : vector<1x256xi1> to vector<1x256xi1>
    %523 = vector.broadcast %522 : vector<1x256xi1> to vector<2x256xi1>
    %524 = vector.broadcast %cst_288 : f32 to vector<2x256xf32>
    %525 = arith.select %523, %521, %524 : vector<2x256xi1>, vector<2x256xf32>
    %c44 = arith.constant 44 : index
    %c0_289 = arith.constant 0 : index
    %526 = vector.load %arg14[%c44, %c0_289] : memref<98x256xf32, #tpu.memory_space<vmem>>, vector<2x256xf32>
    tpu.vector_store %arg14[%c44, %c0_289], %525 {strides = array<i32>} : memref<98x256xf32, #tpu.memory_space<vmem>>, vector<2x256xf32>,
    %c0_290 = arith.constant 0 : index
    %c127_291 = arith.constant 127 : index
    %527 = vector.load %arg13[%c0_290, %c127_291] : memref<2x512xf32, #tpu.memory_space<vmem>>, vector<2x256xf32>
    %cst_292 = arith.constant 0.000000e+00 : f32
    %528 = vector.shape_cast %60 : vector<1x256xi1> to vector<1x256xi1>
    %529 = vector.broadcast %528 : vector<1x256xi1> to vector<2x256xi1>
    %530 = vector.broadcast %cst_292 : f32 to vector<2x256xf32>
    %531 = arith.select %529, %527, %530 : vector<2x256xi1>, vector<2x256xf32>
    %c46 = arith.constant 46 : index
    %c0_293 = arith.constant 0 : index
    %532 = vector.load %arg14[%c46, %c0_293] : memref<98x256xf32, #tpu.memory_space<vmem>>, vector<2x256xf32>
    tpu.vector_store %arg14[%c46, %c0_293], %531 {strides = array<i32>} : memref<98x256xf32, #tpu.memory_space<vmem>>, vector<2x256xf32>,
    %c0_294 = arith.constant 0 : index
    %c128_295 = arith.constant 128 : index
    %533 = vector.load %arg13[%c0_294, %c128_295] : memref<2x512xf32, #tpu.memory_space<vmem>>, vector<2x256xf32>
    %cst_296 = arith.constant 0.000000e+00 : f32
    %534 = vector.shape_cast %65 : vector<1x256xi1> to vector<1x256xi1>
    %535 = vector.broadcast %534 : vector<1x256xi1> to vector<2x256xi1>
    %536 = vector.broadcast %cst_296 : f32 to vector<2x256xf32>
    %537 = arith.select %535, %533, %536 : vector<2x256xi1>, vector<2x256xf32>
    %c48_297 = arith.constant 48 : index
    %c0_298 = arith.constant 0 : index
    %538 = vector.load %arg14[%c48_297, %c0_298] : memref<98x256xf32, #tpu.memory_space<vmem>>, vector<2x256xf32>
    tpu.vector_store %arg14[%c48_297, %c0_298], %537 {strides = array<i32>} : memref<98x256xf32, #tpu.memory_space<vmem>>, vector<2x256xf32>,
    %c0_299 = arith.constant 0 : index
    %c129_300 = arith.constant 129 : index
    %539 = vector.load %arg13[%c0_299, %c129_300] : memref<2x512xf32, #tpu.memory_space<vmem>>, vector<2x256xf32>
    %cst_301 = arith.constant 0.000000e+00 : f32
    %540 = vector.shape_cast %70 : vector<1x256xi1> to vector<1x256xi1>
    %541 = vector.broadcast %540 : vector<1x256xi1> to vector<2x256xi1>
    %542 = vector.broadcast %cst_301 : f32 to vector<2x256xf32>
    %543 = arith.select %541, %539, %542 : vector<2x256xi1>, vector<2x256xf32>
    %c50 = arith.constant 50 : index
    %c0_302 = arith.constant 0 : index
    %544 = vector.load %arg14[%c50, %c0_302] : memref<98x256xf32, #tpu.memory_space<vmem>>, vector<2x256xf32>
    tpu.vector_store %arg14[%c50, %c0_302], %543 {strides = array<i32>} : memref<98x256xf32, #tpu.memory_space<vmem>>, vector<2x256xf32>,
    %c0_303 = arith.constant 0 : index
    %c130_304 = arith.constant 130 : index
    %545 = vector.load %arg13[%c0_303, %c130_304] : memref<2x512xf32, #tpu.memory_space<vmem>>, vector<2x256xf32>
    %cst_305 = arith.constant 0.000000e+00 : f32
    %546 = vector.shape_cast %75 : vector<1x256xi1> to vector<1x256xi1>
    %547 = vector.broadcast %546 : vector<1x256xi1> to vector<2x256xi1>
    %548 = vector.broadcast %cst_305 : f32 to vector<2x256xf32>
    %549 = arith.select %547, %545, %548 : vector<2x256xi1>, vector<2x256xf32>
    %c52 = arith.constant 52 : index
    %c0_306 = arith.constant 0 : index
    %550 = vector.load %arg14[%c52, %c0_306] : memref<98x256xf32, #tpu.memory_space<vmem>>, vector<2x256xf32>
    tpu.vector_store %arg14[%c52, %c0_306], %549 {strides = array<i32>} : memref<98x256xf32, #tpu.memory_space<vmem>>, vector<2x256xf32>,
    %c0_307 = arith.constant 0 : index
    %c131_308 = arith.constant 131 : index
    %551 = vector.load %arg13[%c0_307, %c131_308] : memref<2x512xf32, #tpu.memory_space<vmem>>, vector<2x256xf32>
    %cst_309 = arith.constant 0.000000e+00 : f32
    %552 = vector.shape_cast %80 : vector<1x256xi1> to vector<1x256xi1>
    %553 = vector.broadcast %552 : vector<1x256xi1> to vector<2x256xi1>
    %554 = vector.broadcast %cst_309 : f32 to vector<2x256xf32>
    %555 = arith.select %553, %551, %554 : vector<2x256xi1>, vector<2x256xf32>
    %c54 = arith.constant 54 : index
    %c0_310 = arith.constant 0 : index
    %556 = vector.load %arg14[%c54, %c0_310] : memref<98x256xf32, #tpu.memory_space<vmem>>, vector<2x256xf32>
    tpu.vector_store %arg14[%c54, %c0_310], %555 {strides = array<i32>} : memref<98x256xf32, #tpu.memory_space<vmem>>, vector<2x256xf32>,
    %c0_311 = arith.constant 0 : index
    %c141_312 = arith.constant 141 : index
    %557 = vector.load %arg13[%c0_311, %c141_312] : memref<2x512xf32, #tpu.memory_space<vmem>>, vector<2x256xf32>
    %cst_313 = arith.constant 0.000000e+00 : f32
    %558 = vector.shape_cast %50 : vector<1x256xi1> to vector<1x256xi1>
    %559 = vector.broadcast %558 : vector<1x256xi1> to vector<2x256xi1>
    %560 = vector.broadcast %cst_313 : f32 to vector<2x256xf32>
    %561 = arith.select %559, %557, %560 : vector<2x256xi1>, vector<2x256xf32>
    %c56_314 = arith.constant 56 : index
    %c0_315 = arith.constant 0 : index
    %562 = vector.load %arg14[%c56_314, %c0_315] : memref<98x256xf32, #tpu.memory_space<vmem>>, vector<2x256xf32>
    tpu.vector_store %arg14[%c56_314, %c0_315], %561 {strides = array<i32>} : memref<98x256xf32, #tpu.memory_space<vmem>>, vector<2x256xf32>,
    %c0_316 = arith.constant 0 : index
    %c142_317 = arith.constant 142 : index
    %563 = vector.load %arg13[%c0_316, %c142_317] : memref<2x512xf32, #tpu.memory_space<vmem>>, vector<2x256xf32>
    %cst_318 = arith.constant 0.000000e+00 : f32
    %564 = vector.shape_cast %55 : vector<1x256xi1> to vector<1x256xi1>
    %565 = vector.broadcast %564 : vector<1x256xi1> to vector<2x256xi1>
    %566 = vector.broadcast %cst_318 : f32 to vector<2x256xf32>
    %567 = arith.select %565, %563, %566 : vector<2x256xi1>, vector<2x256xf32>
    %c58 = arith.constant 58 : index
    %c0_319 = arith.constant 0 : index
    %568 = vector.load %arg14[%c58, %c0_319] : memref<98x256xf32, #tpu.memory_space<vmem>>, vector<2x256xf32>
    tpu.vector_store %arg14[%c58, %c0_319], %567 {strides = array<i32>} : memref<98x256xf32, #tpu.memory_space<vmem>>, vector<2x256xf32>,
    %c0_320 = arith.constant 0 : index
    %c143_321 = arith.constant 143 : index
    %569 = vector.load %arg13[%c0_320, %c143_321] : memref<2x512xf32, #tpu.memory_space<vmem>>, vector<2x256xf32>
    %cst_322 = arith.constant 0.000000e+00 : f32
    %570 = vector.shape_cast %60 : vector<1x256xi1> to vector<1x256xi1>
    %571 = vector.broadcast %570 : vector<1x256xi1> to vector<2x256xi1>
    %572 = vector.broadcast %cst_322 : f32 to vector<2x256xf32>
    %573 = arith.select %571, %569, %572 : vector<2x256xi1>, vector<2x256xf32>
    %c60 = arith.constant 60 : index
    %c0_323 = arith.constant 0 : index
    %574 = vector.load %arg14[%c60, %c0_323] : memref<98x256xf32, #tpu.memory_space<vmem>>, vector<2x256xf32>
    tpu.vector_store %arg14[%c60, %c0_323], %573 {strides = array<i32>} : memref<98x256xf32, #tpu.memory_space<vmem>>, vector<2x256xf32>,
    %c0_324 = arith.constant 0 : index
    %c144_325 = arith.constant 144 : index
    %575 = vector.load %arg13[%c0_324, %c144_325] : memref<2x512xf32, #tpu.memory_space<vmem>>, vector<2x256xf32>
    %cst_326 = arith.constant 0.000000e+00 : f32
    %576 = vector.shape_cast %65 : vector<1x256xi1> to vector<1x256xi1>
    %577 = vector.broadcast %576 : vector<1x256xi1> to vector<2x256xi1>
    %578 = vector.broadcast %cst_326 : f32 to vector<2x256xf32>
    %579 = arith.select %577, %575, %578 : vector<2x256xi1>, vector<2x256xf32>
    %c62 = arith.constant 62 : index
    %c0_327 = arith.constant 0 : index
    %580 = vector.load %arg14[%c62, %c0_327] : memref<98x256xf32, #tpu.memory_space<vmem>>, vector<2x256xf32>
    tpu.vector_store %arg14[%c62, %c0_327], %579 {strides = array<i32>} : memref<98x256xf32, #tpu.memory_space<vmem>>, vector<2x256xf32>,
    %c0_328 = arith.constant 0 : index
    %c145_329 = arith.constant 145 : index
    %581 = vector.load %arg13[%c0_328, %c145_329] : memref<2x512xf32, #tpu.memory_space<vmem>>, vector<2x256xf32>
    %cst_330 = arith.constant 0.000000e+00 : f32
    %582 = vector.shape_cast %70 : vector<1x256xi1> to vector<1x256xi1>
    %583 = vector.broadcast %582 : vector<1x256xi1> to vector<2x256xi1>
    %584 = vector.broadcast %cst_330 : f32 to vector<2x256xf32>
    %585 = arith.select %583, %581, %584 : vector<2x256xi1>, vector<2x256xf32>
    %c64_331 = arith.constant 64 : index
    %c0_332 = arith.constant 0 : index
    %586 = vector.load %arg14[%c64_331, %c0_332] : memref<98x256xf32, #tpu.memory_space<vmem>>, vector<2x256xf32>
    tpu.vector_store %arg14[%c64_331, %c0_332], %585 {strides = array<i32>} : memref<98x256xf32, #tpu.memory_space<vmem>>, vector<2x256xf32>,
    %c0_333 = arith.constant 0 : index
    %c146_334 = arith.constant 146 : index
    %587 = vector.load %arg13[%c0_333, %c146_334] : memref<2x512xf32, #tpu.memory_space<vmem>>, vector<2x256xf32>
    %cst_335 = arith.constant 0.000000e+00 : f32
    %588 = vector.shape_cast %75 : vector<1x256xi1> to vector<1x256xi1>
    %589 = vector.broadcast %588 : vector<1x256xi1> to vector<2x256xi1>
    %590 = vector.broadcast %cst_335 : f32 to vector<2x256xf32>
    %591 = arith.select %589, %587, %590 : vector<2x256xi1>, vector<2x256xf32>
    %c66 = arith.constant 66 : index
    %c0_336 = arith.constant 0 : index
    %592 = vector.load %arg14[%c66, %c0_336] : memref<98x256xf32, #tpu.memory_space<vmem>>, vector<2x256xf32>
    tpu.vector_store %arg14[%c66, %c0_336], %591 {strides = array<i32>} : memref<98x256xf32, #tpu.memory_space<vmem>>, vector<2x256xf32>,
    %c0_337 = arith.constant 0 : index
    %c147_338 = arith.constant 147 : index
    %593 = vector.load %arg13[%c0_337, %c147_338] : memref<2x512xf32, #tpu.memory_space<vmem>>, vector<2x256xf32>
    %cst_339 = arith.constant 0.000000e+00 : f32
    %594 = vector.shape_cast %80 : vector<1x256xi1> to vector<1x256xi1>
    %595 = vector.broadcast %594 : vector<1x256xi1> to vector<2x256xi1>
    %596 = vector.broadcast %cst_339 : f32 to vector<2x256xf32>
    %597 = arith.select %595, %593, %596 : vector<2x256xi1>, vector<2x256xf32>
    %c68 = arith.constant 68 : index
    %c0_340 = arith.constant 0 : index
    %598 = vector.load %arg14[%c68, %c0_340] : memref<98x256xf32, #tpu.memory_space<vmem>>, vector<2x256xf32>
    tpu.vector_store %arg14[%c68, %c0_340], %597 {strides = array<i32>} : memref<98x256xf32, #tpu.memory_space<vmem>>, vector<2x256xf32>,
    %c0_341 = arith.constant 0 : index
    %c157_342 = arith.constant 157 : index
    %599 = vector.load %arg13[%c0_341, %c157_342] : memref<2x512xf32, #tpu.memory_space<vmem>>, vector<2x256xf32>
    %cst_343 = arith.constant 0.000000e+00 : f32
    %600 = vector.shape_cast %50 : vector<1x256xi1> to vector<1x256xi1>
    %601 = vector.broadcast %600 : vector<1x256xi1> to vector<2x256xi1>
    %602 = vector.broadcast %cst_343 : f32 to vector<2x256xf32>
    %603 = arith.select %601, %599, %602 : vector<2x256xi1>, vector<2x256xf32>
    %c70 = arith.constant 70 : index
    %c0_344 = arith.constant 0 : index
    %604 = vector.load %arg14[%c70, %c0_344] : memref<98x256xf32, #tpu.memory_space<vmem>>, vector<2x256xf32>
    tpu.vector_store %arg14[%c70, %c0_344], %603 {strides = array<i32>} : memref<98x256xf32, #tpu.memory_space<vmem>>, vector<2x256xf32>,
    %c0_345 = arith.constant 0 : index
    %c158_346 = arith.constant 158 : index
    %605 = vector.load %arg13[%c0_345, %c158_346] : memref<2x512xf32, #tpu.memory_space<vmem>>, vector<2x256xf32>
    %cst_347 = arith.constant 0.000000e+00 : f32
    %606 = vector.shape_cast %55 : vector<1x256xi1> to vector<1x256xi1>
    %607 = vector.broadcast %606 : vector<1x256xi1> to vector<2x256xi1>
    %608 = vector.broadcast %cst_347 : f32 to vector<2x256xf32>
    %609 = arith.select %607, %605, %608 : vector<2x256xi1>, vector<2x256xf32>
    %c72_348 = arith.constant 72 : index
    %c0_349 = arith.constant 0 : index
    %610 = vector.load %arg14[%c72_348, %c0_349] : memref<98x256xf32, #tpu.memory_space<vmem>>, vector<2x256xf32>
    tpu.vector_store %arg14[%c72_348, %c0_349], %609 {strides = array<i32>} : memref<98x256xf32, #tpu.memory_space<vmem>>, vector<2x256xf32>,
    %c0_350 = arith.constant 0 : index
    %c159_351 = arith.constant 159 : index
    %611 = vector.load %arg13[%c0_350, %c159_351] : memref<2x512xf32, #tpu.memory_space<vmem>>, vector<2x256xf32>
    %cst_352 = arith.constant 0.000000e+00 : f32
    %612 = vector.shape_cast %60 : vector<1x256xi1> to vector<1x256xi1>
    %613 = vector.broadcast %612 : vector<1x256xi1> to vector<2x256xi1>
    %614 = vector.broadcast %cst_352 : f32 to vector<2x256xf32>
    %615 = arith.select %613, %611, %614 : vector<2x256xi1>, vector<2x256xf32>
    %c74 = arith.constant 74 : index
    %c0_353 = arith.constant 0 : index
    %616 = vector.load %arg14[%c74, %c0_353] : memref<98x256xf32, #tpu.memory_space<vmem>>, vector<2x256xf32>
    tpu.vector_store %arg14[%c74, %c0_353], %615 {strides = array<i32>} : memref<98x256xf32, #tpu.memory_space<vmem>>, vector<2x256xf32>,
    %c0_354 = arith.constant 0 : index
    %c160_355 = arith.constant 160 : index
    %617 = vector.load %arg13[%c0_354, %c160_355] : memref<2x512xf32, #tpu.memory_space<vmem>>, vector<2x256xf32>
    %cst_356 = arith.constant 0.000000e+00 : f32
    %618 = vector.shape_cast %65 : vector<1x256xi1> to vector<1x256xi1>
    %619 = vector.broadcast %618 : vector<1x256xi1> to vector<2x256xi1>
    %620 = vector.broadcast %cst_356 : f32 to vector<2x256xf32>
    %621 = arith.select %619, %617, %620 : vector<2x256xi1>, vector<2x256xf32>
    %c76 = arith.constant 76 : index
    %c0_357 = arith.constant 0 : index
    %622 = vector.load %arg14[%c76, %c0_357] : memref<98x256xf32, #tpu.memory_space<vmem>>, vector<2x256xf32>
    tpu.vector_store %arg14[%c76, %c0_357], %621 {strides = array<i32>} : memref<98x256xf32, #tpu.memory_space<vmem>>, vector<2x256xf32>,
    %c0_358 = arith.constant 0 : index
    %c161_359 = arith.constant 161 : index
    %623 = vector.load %arg13[%c0_358, %c161_359] : memref<2x512xf32, #tpu.memory_space<vmem>>, vector<2x256xf32>
    %cst_360 = arith.constant 0.000000e+00 : f32
    %624 = vector.shape_cast %70 : vector<1x256xi1> to vector<1x256xi1>
    %625 = vector.broadcast %624 : vector<1x256xi1> to vector<2x256xi1>
    %626 = vector.broadcast %cst_360 : f32 to vector<2x256xf32>
    %627 = arith.select %625, %623, %626 : vector<2x256xi1>, vector<2x256xf32>
    %c78_361 = arith.constant 78 : index
    %c0_362 = arith.constant 0 : index
    %628 = vector.load %arg14[%c78_361, %c0_362] : memref<98x256xf32, #tpu.memory_space<vmem>>, vector<2x256xf32>
    tpu.vector_store %arg14[%c78_361, %c0_362], %627 {strides = array<i32>} : memref<98x256xf32, #tpu.memory_space<vmem>>, vector<2x256xf32>,
    %c0_363 = arith.constant 0 : index
    %c162_364 = arith.constant 162 : index
    %629 = vector.load %arg13[%c0_363, %c162_364] : memref<2x512xf32, #tpu.memory_space<vmem>>, vector<2x256xf32>
    %cst_365 = arith.constant 0.000000e+00 : f32
    %630 = vector.shape_cast %75 : vector<1x256xi1> to vector<1x256xi1>
    %631 = vector.broadcast %630 : vector<1x256xi1> to vector<2x256xi1>
    %632 = vector.broadcast %cst_365 : f32 to vector<2x256xf32>
    %633 = arith.select %631, %629, %632 : vector<2x256xi1>, vector<2x256xf32>
    %c80_366 = arith.constant 80 : index
    %c0_367 = arith.constant 0 : index
    %634 = vector.load %arg14[%c80_366, %c0_367] : memref<98x256xf32, #tpu.memory_space<vmem>>, vector<2x256xf32>
    tpu.vector_store %arg14[%c80_366, %c0_367], %633 {strides = array<i32>} : memref<98x256xf32, #tpu.memory_space<vmem>>, vector<2x256xf32>,
    %c0_368 = arith.constant 0 : index
    %c163_369 = arith.constant 163 : index
    %635 = vector.load %arg13[%c0_368, %c163_369] : memref<2x512xf32, #tpu.memory_space<vmem>>, vector<2x256xf32>
    %cst_370 = arith.constant 0.000000e+00 : f32
    %636 = vector.shape_cast %80 : vector<1x256xi1> to vector<1x256xi1>
    %637 = vector.broadcast %636 : vector<1x256xi1> to vector<2x256xi1>
    %638 = vector.broadcast %cst_370 : f32 to vector<2x256xf32>
    %639 = arith.select %637, %635, %638 : vector<2x256xi1>, vector<2x256xf32>
    %c82_371 = arith.constant 82 : index
    %c0_372 = arith.constant 0 : index
    %640 = vector.load %arg14[%c82_371, %c0_372] : memref<98x256xf32, #tpu.memory_space<vmem>>, vector<2x256xf32>
    tpu.vector_store %arg14[%c82_371, %c0_372], %639 {strides = array<i32>} : memref<98x256xf32, #tpu.memory_space<vmem>>, vector<2x256xf32>,
    %c0_373 = arith.constant 0 : index
    %c173_374 = arith.constant 173 : index
    %641 = vector.load %arg13[%c0_373, %c173_374] : memref<2x512xf32, #tpu.memory_space<vmem>>, vector<2x256xf32>
    %cst_375 = arith.constant 0.000000e+00 : f32
    %642 = vector.shape_cast %50 : vector<1x256xi1> to vector<1x256xi1>
    %643 = vector.broadcast %642 : vector<1x256xi1> to vector<2x256xi1>
    %644 = vector.broadcast %cst_375 : f32 to vector<2x256xf32>
    %645 = arith.select %643, %641, %644 : vector<2x256xi1>, vector<2x256xf32>
    %c84 = arith.constant 84 : index
    %c0_376 = arith.constant 0 : index
    %646 = vector.load %arg14[%c84, %c0_376] : memref<98x256xf32, #tpu.memory_space<vmem>>, vector<2x256xf32>
    tpu.vector_store %arg14[%c84, %c0_376], %645 {strides = array<i32>} : memref<98x256xf32, #tpu.memory_space<vmem>>, vector<2x256xf32>,
    %c0_377 = arith.constant 0 : index
    %c174_378 = arith.constant 174 : index
    %647 = vector.load %arg13[%c0_377, %c174_378] : memref<2x512xf32, #tpu.memory_space<vmem>>, vector<2x256xf32>
    %cst_379 = arith.constant 0.000000e+00 : f32
    %648 = vector.shape_cast %55 : vector<1x256xi1> to vector<1x256xi1>
    %649 = vector.broadcast %648 : vector<1x256xi1> to vector<2x256xi1>
    %650 = vector.broadcast %cst_379 : f32 to vector<2x256xf32>
    %651 = arith.select %649, %647, %650 : vector<2x256xi1>, vector<2x256xf32>
    %c86 = arith.constant 86 : index
    %c0_380 = arith.constant 0 : index
    %652 = vector.load %arg14[%c86, %c0_380] : memref<98x256xf32, #tpu.memory_space<vmem>>, vector<2x256xf32>
    tpu.vector_store %arg14[%c86, %c0_380], %651 {strides = array<i32>} : memref<98x256xf32, #tpu.memory_space<vmem>>, vector<2x256xf32>,
    %c0_381 = arith.constant 0 : index
    %c175_382 = arith.constant 175 : index
    %653 = vector.load %arg13[%c0_381, %c175_382] : memref<2x512xf32, #tpu.memory_space<vmem>>, vector<2x256xf32>
    %cst_383 = arith.constant 0.000000e+00 : f32
    %654 = vector.shape_cast %60 : vector<1x256xi1> to vector<1x256xi1>
    %655 = vector.broadcast %654 : vector<1x256xi1> to vector<2x256xi1>
    %656 = vector.broadcast %cst_383 : f32 to vector<2x256xf32>
    %657 = arith.select %655, %653, %656 : vector<2x256xi1>, vector<2x256xf32>
    %c88_384 = arith.constant 88 : index
    %c0_385 = arith.constant 0 : index
    %658 = vector.load %arg14[%c88_384, %c0_385] : memref<98x256xf32, #tpu.memory_space<vmem>>, vector<2x256xf32>
    tpu.vector_store %arg14[%c88_384, %c0_385], %657 {strides = array<i32>} : memref<98x256xf32, #tpu.memory_space<vmem>>, vector<2x256xf32>,
    %c0_386 = arith.constant 0 : index
    %c176_387 = arith.constant 176 : index
    %659 = vector.load %arg13[%c0_386, %c176_387] : memref<2x512xf32, #tpu.memory_space<vmem>>, vector<2x256xf32>
    %cst_388 = arith.constant 0.000000e+00 : f32
    %660 = vector.shape_cast %65 : vector<1x256xi1> to vector<1x256xi1>
    %661 = vector.broadcast %660 : vector<1x256xi1> to vector<2x256xi1>
    %662 = vector.broadcast %cst_388 : f32 to vector<2x256xf32>
    %663 = arith.select %661, %659, %662 : vector<2x256xi1>, vector<2x256xf32>
    %c90 = arith.constant 90 : index
    %c0_389 = arith.constant 0 : index
    %664 = vector.load %arg14[%c90, %c0_389] : memref<98x256xf32, #tpu.memory_space<vmem>>, vector<2x256xf32>
    tpu.vector_store %arg14[%c90, %c0_389], %663 {strides = array<i32>} : memref<98x256xf32, #tpu.memory_space<vmem>>, vector<2x256xf32>,
    %c0_390 = arith.constant 0 : index
    %c177_391 = arith.constant 177 : index
    %665 = vector.load %arg13[%c0_390, %c177_391] : memref<2x512xf32, #tpu.memory_space<vmem>>, vector<2x256xf32>
    %cst_392 = arith.constant 0.000000e+00 : f32
    %666 = vector.shape_cast %70 : vector<1x256xi1> to vector<1x256xi1>
    %667 = vector.broadcast %666 : vector<1x256xi1> to vector<2x256xi1>
    %668 = vector.broadcast %cst_392 : f32 to vector<2x256xf32>
    %669 = arith.select %667, %665, %668 : vector<2x256xi1>, vector<2x256xf32>
    %c92 = arith.constant 92 : index
    %c0_393 = arith.constant 0 : index
    %670 = vector.load %arg14[%c92, %c0_393] : memref<98x256xf32, #tpu.memory_space<vmem>>, vector<2x256xf32>
    tpu.vector_store %arg14[%c92, %c0_393], %669 {strides = array<i32>} : memref<98x256xf32, #tpu.memory_space<vmem>>, vector<2x256xf32>,
    %c0_394 = arith.constant 0 : index
    %c178_395 = arith.constant 178 : index
    %671 = vector.load %arg13[%c0_394, %c178_395] : memref<2x512xf32, #tpu.memory_space<vmem>>, vector<2x256xf32>
    %cst_396 = arith.constant 0.000000e+00 : f32
    %672 = vector.shape_cast %75 : vector<1x256xi1> to vector<1x256xi1>
    %673 = vector.broadcast %672 : vector<1x256xi1> to vector<2x256xi1>
    %674 = vector.broadcast %cst_396 : f32 to vector<2x256xf32>
    %675 = arith.select %673, %671, %674 : vector<2x256xi1>, vector<2x256xf32>
    %c94_397 = arith.constant 94 : index
    %c0_398 = arith.constant 0 : index
    %676 = vector.load %arg14[%c94_397, %c0_398] : memref<98x256xf32, #tpu.memory_space<vmem>>, vector<2x256xf32>
    tpu.vector_store %arg14[%c94_397, %c0_398], %675 {strides = array<i32>} : memref<98x256xf32, #tpu.memory_space<vmem>>, vector<2x256xf32>,
    %c0_399 = arith.constant 0 : index
    %c179_400 = arith.constant 179 : index
    %677 = vector.load %arg13[%c0_399, %c179_400] : memref<2x512xf32, #tpu.memory_space<vmem>>, vector<2x256xf32>
    %cst_401 = arith.constant 0.000000e+00 : f32
    %678 = vector.shape_cast %80 : vector<1x256xi1> to vector<1x256xi1>
    %679 = vector.broadcast %678 : vector<1x256xi1> to vector<2x256xi1>
    %680 = vector.broadcast %cst_401 : f32 to vector<2x256xf32>
    %681 = arith.select %679, %677, %680 : vector<2x256xi1>, vector<2x256xf32>
    %c96_402 = arith.constant 96 : index
    %c0_403 = arith.constant 0 : index
    %682 = vector.load %arg14[%c96_402, %c0_403] : memref<98x256xf32, #tpu.memory_space<vmem>>, vector<2x256xf32>
    tpu.vector_store %arg14[%c96_402, %c0_403], %681 {strides = array<i32>} : memref<98x256xf32, #tpu.memory_space<vmem>>, vector<2x256xf32>,
    %c0_404 = arith.constant 0 : index
    %c0_405 = arith.constant 0 : index
    %683 = vector.load %arg8[%c0_404, %c0_405] : memref<8x98xf32, #tpu.memory_space<vmem>>, vector<8x98xf32>
    %c0_406 = arith.constant 0 : index
    %c0_407 = arith.constant 0 : index
    %684 = vector.load %arg14[%c0_406, %c0_407] : memref<98x256xf32, #tpu.memory_space<vmem>>, vector<98x256xf32>
    %cst_408 = arith.constant dense<0.000000e+00> : vector<8x256xf32>
    %685 = tpu.matmul %683, %684, %cst_408 {dimension_numbers = #tpu.dot_dimension_numbers<[1], [0], [0], [1], [0, 0, 1, 1], [], []>} : vector<8x98xf32>, vector<98x256xf32>, vector<8x256xf32> -> vector<8x256xf32>
    %c0_409 = arith.constant 0 : index
    %c0_410 = arith.constant 0 : index
    %686 = vector.load %arg9[%c0_409, %c0_410] : memref<8x1xf32, #tpu.memory_space<vmem>>, vector<8x1xf32>
    %687 = vector.broadcast %686 : vector<8x1xf32> to vector<8x256xf32>
    %688 = arith.addf %685, %687 : vector<8x256xf32>
    %689 = arith.negf %688 : vector<8x256xf32>
    %690 = math.exp %689 : vector<8x256xf32>
    %cst_411 = arith.constant 1.000000e+00 : f32
    %691 = vector.broadcast %cst_411 : f32 to vector<8x256xf32>
    %692 = arith.addf %691, %690 : vector<8x256xf32>
    %693 = arith.divf %691, %692 : vector<8x256xf32>
    %694 = arith.mulf %28, %693 : vector<8x256xf32>
    %695 = vector.shape_cast %694 : vector<8x256xf32> to vector<1x8x256xf32>
    %c0_412 = arith.constant 0 : index
    %c0_413 = arith.constant 0 : index
    %c0_414 = arith.constant 0 : index
    %696 = vector.load %arg10[%c0_412, %c0_413, %c0_414] : memref<1x8x256xf32, #tpu.memory_space<vmem>>, vector<1x8x256xf32>
    tpu.vector_store %arg10[%c0_412, %c0_413, %c0_414], %695 {strides = array<i32>} : memref<1x8x256xf32, #tpu.memory_space<vmem>>, vector<1x8x256xf32>,
    return
  }
  func.func @transform_0(%arg0: i32) -> (i32, i32, i32) {
    %c0_i32 = arith.constant 0 : i32
    %c0_i32_0 = arith.constant 0 : i32
    %c0_i32_1 = arith.constant 0 : i32
    return %arg0, %c0_i32, %c0_i32_0 : i32, i32, i32
  }
  func.func @transform_1(%arg0: i32) -> (i32, i32) {
    %c0_i32 = arith.constant 0 : i32
    %c0_i32_0 = arith.constant 0 : i32
    %c0_i32_1 = arith.constant 0 : i32
    return %c0_i32, %c0_i32_0 : i32, i32
  }
  func.func @transform_2(%arg0: i32) -> (i32, i32) {
    %c0_i32 = arith.constant 0 : i32
    %c0_i32_0 = arith.constant 0 : i32
    %c0_i32_1 = arith.constant 0 : i32
    return %c0_i32, %c0_i32_0 : i32, i32
  }
  func.func @transform_3(%arg0: i32) -> (i32, i32) {
    %c0_i32 = arith.constant 0 : i32
    %c0_i32_0 = arith.constant 0 : i32
    %c0_i32_1 = arith.constant 0 : i32
    return %c0_i32, %c0_i32_0 : i32, i32
  }
  func.func @transform_4(%arg0: i32) -> (i32, i32) {
    %c0_i32 = arith.constant 0 : i32
    %c0_i32_0 = arith.constant 0 : i32
    %c0_i32_1 = arith.constant 0 : i32
    return %c0_i32, %c0_i32_0 : i32, i32
  }
  func.func @transform_5(%arg0: i32) -> (i32, i32) {
    %c0_i32 = arith.constant 0 : i32
    %c0_i32_0 = arith.constant 0 : i32
    %c0_i32_1 = arith.constant 0 : i32
    return %c0_i32, %c0_i32_0 : i32, i32
  }
  func.func @transform_6(%arg0: i32) -> (i32, i32) {
    %c0_i32 = arith.constant 0 : i32
    %c0_i32_0 = arith.constant 0 : i32
    %c0_i32_1 = arith.constant 0 : i32
    return %c0_i32, %c0_i32_0 : i32, i32
  }
  func.func @transform_7(%arg0: i32) -> (i32, i32) {
    %c0_i32 = arith.constant 0 : i32
    %c0_i32_0 = arith.constant 0 : i32
    %c0_i32_1 = arith.constant 0 : i32
    return %c0_i32, %c0_i32_0 : i32, i32
  }
  func.func @transform_8(%arg0: i32) -> (i32, i32) {
    %c0_i32 = arith.constant 0 : i32
    %c0_i32_0 = arith.constant 0 : i32
    %c0_i32_1 = arith.constant 0 : i32
    return %c0_i32, %c0_i32_0 : i32, i32
  }
  func.func @transform_9(%arg0: i32) -> (i32, i32, i32) {
    %c0_i32 = arith.constant 0 : i32
    %c0_i32_0 = arith.constant 0 : i32
    %c0_i32_1 = arith.constant 0 : i32
    return %arg0, %c0_i32, %c0_i32_0 : i32, i32, i32
  }
}

</mosaic_0001>

<bundles_post_ra>
// kernel: gcsa_forward.1
= control target key start
LH: loop header
LB: loop body
LE: loop exit
PB: predicated region body
PF: predicated region fallthrough
CT: control target
= control target key end

     0   :  { %s4268_s30 = smov 0   ;;  %s6347_s0 = inlined_call_operand.vmem [shape: f32[2,8,256], index: 0, kind: input, shape index: {}]   ;;  %s6348_s1 = inlined_call_operand.vmem [shape: f32[2,8], index: 1, kind: input, shape index: {}]   ;;  %s6349_s2 = inlined_call_operand.vmem [shape: f32[2,1], index: 2, kind: input, shape index: {}]   ;;  %s6350_s3 = inlined_call_operand.vmem [shape: f32[8,2], index: 3, kind: input, shape index: {}]   ;;  %s6351_s4 = inlined_call_operand.vmem [shape: f32[8,1], index: 4, kind: input, shape index: {}]   ;;  %s6352_s5 = inlined_call_operand.vmem [shape: f32[2,392], index: 5, kind: input, shape index: {}]   ;;  %s6353_s6 = inlined_call_operand.vmem [shape: f32[2,1], index: 6, kind: input, shape index: {}]   ;;  %s6354_s7 = inlined_call_operand.vmem [shape: f32[8,98], index: 7, kind: input, shape index: {}]   ;;  %s6355_s8 = inlined_call_operand.vmem [shape: f32[8,1], index: 8, kind: input, shape index: {}]   ;;  %s6356_s9 = inlined_call_operand.vmem [shape: f32[2,8,256], index: 9, kind: output, shape index: {}]  }
   0x1   :  { %6558 = sst [smem:[#allocation54_spill]] %s6347_s0 }
   0x2   :  { %6559 = sst [smem:[#allocation55_spill]] %s6348_s1 }
   0x3   :  { %6560 = sst [smem:[#allocation56_spill]] %s6349_s2 }
   0x4   :  { %6561 = sst [smem:[#allocation57_spill]] %s6350_s3 }
   0x5   :  { %6562 = sst [smem:[#allocation58_spill]] %s6351_s4 }
   0x6   :  { %6563 = sst [smem:[#allocation59_spill]] %s6352_s5 }
   0x7   :  { %6564 = sst [smem:[#allocation60_spill]] %s6353_s6 }
   0x8   :  { %6565 = sst [smem:[#allocation61_spill]] %s6354_s7 }
   0x9   :  { %6566 = sst [smem:[#allocation62_spill]] %s6355_s8 }
   0xa   :  { %6567 = sst [smem:[#allocation63_spill]] %s6356_s9 }
   0xb LB: > { %6568 = sst [smem:[#allocation6_spill]] %s4165_s30  ;;  %s3921_s10 = sadd.s32 4294967295, %s4165_s30   ;;  %s4165_s30 = sphi %s4268_s30, %s19_s30  }
   0xc   : > { %p3925_p0 = scmp.ge.s32.totalorder %s4165_s30, 1  ;;  %p287_p1 = scmp.lt.s32.totalorder %s4165_s30, 3 }
   0xe   : > { %p288_p2 = pnand %p3925_p0, %p287_p1 }
  0x10   : > { %291 = sbr.rel (%p288_p2) target bundleno = 1661 (0x67d), region = 56 }
  0x15   : > { %p323_p3 = scmp.lt.s32.totalorder %s3921_s10, 1  ;;  %v6456_v0 = vmov 0.0   ;;  %v4168_v1 = vmov 0   ;;  %s6569_s2 = sld [smem:[#allocation56_spill]]  ;;  %vm342_vm0 = vcmask 64512   ;;  %vm6474_vm1 = vcmask 1041408  }
  0x16   : > { %410 = vmatprep.mubr.f32.mxu0 %v6456_v0  ;;  %1956 = vst [vmem:[#allocation4] sm:$0xff] %v6456_v0  ;;  %4091 = vset.pattern.permute.xlu0 %v4168_v1  ;;  %s6571_s4 = sld [smem:[#allocation58_spill]]  ;;  %s6440_s21 = smov 19   ;;  %vm6475_vm2 = vcmask 15360   ;;  %vm548_vm3 = vcmask 1040384   ;;  %vm553_vm4 = vcmask 1042432  }
  0x17   : > { %s6956_s10 = smov (!%p323_p3, %s3921_s10), 1  ;;  %501 = vmatprep.mubr.f32.mxu1 %v6456_v0  ;;  %4092 = vset.pattern.permute.xlu1 %v4168_v1  ;;  %s6572_s0 = sld [smem:[#allocation54_spill]]  ;;  %vm556_vm5 = vcmask 1043456   ;;  %vm559_vm6 = vcmask 1044480   ;;  %vm562_vm7 = vcmask 1045504   ;;  %vm565_vm8 = vcmask 1046528  }
  0x18   : > { %6570 = sst [smem:[#allocation7_spill]] %s6956_s10  ;;  %s6357_s15 = sshll.u32 %s6956_s10, 4  ;;  %971 = vrot.lane.b32.xlu1 %v6456_v0, %s6440_s21  ;;  %vm6469_vm9 = vcmask 146432   ;;  %vm6470_vm12 = vcmask 154624   ;;  %vm6472_vm15 = vcmask 236544  }
  0x19   : > { %s6573_s1 = sld [smem:[#allocation55_spill]]  ;;  %s6436_s22 = smov 30  }
  0x1a   : > { %s6432_s23 = smov 32   ;;  %s6434_s24 = smov 18  }
  0x1b   : > { %v336_v2 = vld [vmem:[%s6569_s2] sm:$0x3]  ;;  %s6428_s25 = smov 34   ;;  %s6430_s26 = smov 29  }
  0x1c   : > { %339 = vperm.xlu0 %4091, %v336_v2   ;;  %v420_v3 = vld [vmem:[%s6571_s4] sm:$0xff]  ;;  %929 = vrot.lane.b32.xlu1 %v6456_v0, %s6436_s22  ;;  %s6424_s27 = smov 45   ;;  %s6426_s28 = smov 31  }
  0x1d   : > { %s327_s18 = scalar_lea.vmem %s6572_s0, %s6357_s15  ;;  %s6392_s29 = smov 47  }
  0x1e   : > { %v4293_v4 = vld [vmem:[%s327_s18 + $0x8] sm:$0xff]  ;;  %v4295_v5 = vld [vmem:[%s327_s18] sm:$0xff]  ;;  %s6418_s11 = smov 33   ;;  %s6384_s12 = smov 49  }
  0x1f   : > { %v335_v6 = vld [vmem:[%s6573_s1] sm:$0x3]  ;;  %376 = vmatprep.subr.mxu0 %v4293_v4  ;;  %s6414_s13 = smov 35   ;;  %s6358_s14 = smov 51  }
  0x20   : > { %423 = vperm.xlu0 %4091, %v420_v3   ;;  %377 = vmatpush1.msra.mxu0 %v4295_v5  ;;  %s6388_s16 = smov 112   ;;  %s6360_s17 = smov 78  }
  0x21   : > { %3930 = vmatmul.mubr.msk.f32.vlgmr.msra.gmra.mxu0 %vm342_vm0, %v335_v6  ;;  %887 = vrot.lane.b32.xlu1 %v6456_v0, %s6432_s23  ;;  %s6362_s18 = smov 113   ;;  %s6364_s19 = smov 79  }
  0x22   : > { %s6366_s20 = smov 114   ;;  %s6368_s15 = smov 80  }
  0x23   : > { %s6574_s3 = sld [smem:[#allocation57_spill]]  ;;  %s6602_s0 = smov 96  }
  0x24   : > { %992 = vrot.lane.b32.xlu0 %v6456_v0, %s6434_s24  ;;  %s6603_s1 = smov 1   ;;  %s6606_s2 = smov 97  }
  0x25   : > { %845 = vrot.lane.b32.xlu1 %v6456_v0, %s6428_s25  ;;  %s6608_s4 = smov 98   ;;  %s6609_s30 = smov 3  }
  0x26   : > { %s6612_s9 = smov 99   ;;  %s6613_s10 = smov 13  }
  0x27   : > { %s6616_s7 = smov 109   ;;  %s6617_s8 = smov 14  }
  0x28   : > { %950 = vrot.lane.b32.xlu0 %v6456_v0, %s6430_s26  ;;  %s6618_s6 = smov 110   ;;  %s6619_s5 = smov 15  }
  0x29   : > { %803 = vrot.lane.b32.xlu1 %v6456_v0, %s6424_s27  ;;  %v419_v14 = vld [vmem:[%s6574_s3] sm:$0xff]  ;;  %s6607_s3 = smov 2  }
  0x2c   : > { %908 = vrot.lane.b32.xlu0 %v6456_v0, %s6426_s28 }
  0x2d   : > { %753 = vrot.lane.b32.xlu1 %v6456_v0, %s6392_s29  ;;  %s6404_s29 = smov 97  }
  0x30   : > { %866 = vrot.lane.b32.xlu0 %v6456_v0, %s6418_s11 }
  0x31   : > { %703 = vrot.lane.b32.xlu1 %v6456_v0, %s6384_s12  ;;  %s6396_s12 = smov 95  }
  0x34   : > { %824 = vrot.lane.b32.xlu0 %v6456_v0, %s6414_s13 }
  0x35   : > { %653 = vrot.lane.b32.xlu1 %v6456_v0, %s6358_s14  ;;  %s6380_s14 = smov 115  }
  0x39   : > { %1316 = vrot.lane.b32.xlu1 %v6456_v0, %s6388_s16  ;;  %s6400_s16 = smov 96  }
  0x3d   : > { %1652 = vrot.lane.b32.xlu1 %v6456_v0, %s6360_s17  ;;  %s6370_s17 = smov 81  }
  0x41   : > { %1295 = vrot.lane.b32.xlu1 %v6456_v0, %s6362_s18  ;;  %s6372_s18 = smov 125  }
  0x45   : > { %1631 = vrot.lane.b32.xlu1 %v6456_v0, %s6364_s19  ;;  %s6376_s19 = smov 82  }
  0x49   : > { %1274 = vrot.lane.b32.xlu1 %v6456_v0, %s6366_s20  ;;  %s6378_s20 = smov 126  }
  0x4d   : > { %1610 = vrot.lane.b32.xlu1 %v6456_v0, %s6368_s15  ;;  %s6374_s15 = smov 83  }
  0x51   : > { %1253 = vrot.lane.b32.xlu1 %v6456_v0, %s6380_s14  ;;  %s6422_s14 = smov 50  }
  0x55   : > { %1589 = vrot.lane.b32.xlu1 %v6456_v0, %s6370_s17  ;;  %s6420_s17 = smov 48  }
  0x59   : > { %1232 = vrot.lane.b32.xlu1 %v6456_v0, %s6372_s18  ;;  %s6390_s18 = smov 94  }
  0x5d   : > { %1568 = vrot.lane.b32.xlu1 %v6456_v0, %s6376_s19  ;;  %s6416_s19 = smov 46  }
  0x5e   : > { %778 = vrot.lane.b32.xlu0 %v6456_v0, %s6416_s19 }
  0x61   : > { %1211 = vrot.lane.b32.xlu1 %v6456_v0, %s6378_s20  ;;  %s6386_s20 = smov 93  }
  0x62   : > { %728 = vrot.lane.b32.xlu0 %v6456_v0, %s6420_s17 }
  0x65   : > { %1547 = vrot.lane.b32.xlu1 %v6456_v0, %s6374_s15  ;;  %s6382_s15 = smov 127  }
  0x66   : > { %678 = vrot.lane.b32.xlu0 %v6456_v0, %s6422_s14 }
  0x69   : > { %1190 = vrot.lane.b32.xlu1 %v6456_v0, %s6382_s15  ;;  %s6394_s15 = smov 1  }
  0x6a   : > { %1484 = vrot.lane.b32.xlu0 %v6456_v0, %s6396_s12  ;;  %s6408_s12 = smov 98  }
  0x6d   : > { %1526 = vrot.lane.b32.xlu1 %v6456_v0, %s6386_s20  ;;  %s6398_s20 = smov 2  }
  0x6e   : > { %1463 = vrot.lane.b32.xlu0 %v6456_v0, %s6400_s16  ;;  %s6412_s16 = smov 99  }
  0x71   : > { %1505 = vrot.lane.b32.xlu1 %v6456_v0, %s6390_s18  ;;  %s6402_s18 = smov 3  }
  0x72   : > { %1442 = vrot.lane.b32.xlu0 %v6456_v0, %s6404_s29  ;;  %s6450_s29 = smov 109  }
  0x75   : > { %1159 = vrot.lane.b32.xlu1 %v6456_v0, %s6394_s15  ;;  %s6406_s15 = smov 13  }
  0x76   : > { %1421 = vrot.lane.b32.xlu0 %v6456_v0, %s6408_s12  ;;  %s6448_s12 = smov 110  }
  0x79   : > { %1139 = vrot.lane.b32.xlu1 %v6456_v0, %s6398_s20  ;;  %s6410_s20 = smov 14  }
  0x7a   : > { %1400 = vrot.lane.b32.xlu0 %v6456_v0, %s6412_s16  ;;  %s6444_s16 = smov 111  }
  0x7d   : > { %1118 = vrot.lane.b32.xlu1 %v6456_v0, %s6402_s18  ;;  %s6446_s18 = smov 15  }
  0x7e   : > { %1379 = vrot.lane.b32.xlu0 %v6456_v0, %s6450_s29  ;;  %s6600_s29 = smov 93  }
  0x81   : > { %1097 = vrot.lane.b32.xlu1 %v6456_v0, %s6406_s15  ;;  %s6442_s15 = smov 16  }
  0x82   : > { %1358 = vrot.lane.b32.xlu0 %v6456_v0, %s6448_s12  ;;  %s6599_s12 = smov 95  }
  0x85   : > { %1076 = vrot.lane.b32.xlu1 %v6456_v0, %s6410_s20  ;;  %s6438_s20 = smov 17  }
  0x86   : > { %1337 = vrot.lane.b32.xlu0 %v6456_v0, %s6444_s16  ;;  %s6597_s16 = smov 94  }
  0x89   : > { %1055 = vrot.lane.b32.xlu1 %v6456_v0, %s6446_s18  ;;  %s6598_s18 = smov 83  }
  0x8a   : > { %v4403_v15 = vpop.permute.xlu1 %971 }
  0x8d   : > { %1034 = vrot.lane.b32.xlu1 %v6456_v0, %s6442_s15  ;;  %s6595_s15 = smov 82  }
  0x8e   : > { %v4405_v16 = vpop.permute.xlu1 %929 }
  0x91   : > { %1013 = vrot.lane.b32.xlu1 %v6456_v0, %s6438_s20  ;;  %s6592_s20 = smov 81  }
  0x93   : > { %v4407_v17 = vpop.permute.xlu1 %887 }
  0x97   : > { %v340_v8 = vpop.permute.xlu0 %339  ;;  %v4409_v18 = vpop.permute.xlu1 %845 }
  0x9b   : > { %v4411_v19 = vpop.permute.xlu1 %803  ;;  %v424_v20 = vpop.permute.xlu0 %423 }
  0x9f   : > { %v4413_v26 = vpop.permute.xlu1 %753 }
  0xa3   : > { %v4415_v28 = vpop.permute.xlu1 %703 }
  0xa7   : > { %v4417_v29 = vpop.permute.xlu1 %653 }
  0xab   : > { %v4419_v34 = vpop.permute.xlu1 %1316 }
  0xaf   : > { %v4421_v35 = vpop.permute.xlu1 %1652 }
  0xb3   : > { %v4423_v37 = vpop.permute.xlu1 %1295 }
  0xb7   : > { %v4429_v49 = vpop.permute.xlu1 %1631 }
  0xbb   : > { %v4447_v3 = vpop.permute.xlu1 %1274 }
  0xbf   : > { %v4457_v6 = vpop.permute.xlu1 %1610 }
  0xe1   : > { %v412_v7 = vpop.f32.mrf.mxu0 }
  0xe2   : > { %v413_v9 = vadd.f32 %v412_v7, %v340_v8  ;;  %v4467_v7 = vpop.permute.xlu1 %1253 }
  0xe3   : > { %v414_v10 = vpop.f32.mrf.mxu0 }
  0xe4   : > { %v415_v11 = vadd.f32 %v414_v10, %v340_v8  ;;  %v417_v13 = vmax.f32 %v413_v9, 0.0  ;;  %v4475_v9 = vpop.permute.xlu0 %992 }
  0xe6   : > { %v418_v12 = vmax.f32 %v415_v11, 0.0  ;;  %v4473_v8 = vpop.permute.xlu1 %1589 }
  0xe8   : > { %3931 = vmatprep.subr.msk.mxu1 %vm6474_vm1, %v418_v12  ;;  %v4487_v11 = vpop.permute.xlu0 %950 }
  0xe9   : > { %3932 = vmatpush1.msk.msra.mxu1 %vm6474_vm1, %v417_v13 }
  0xea   : > { %3933 = vmatmul.mubr.msk.f32.vlgmr.msra.gmra.mxu1 %vm6475_vm2, %v419_v14  ;;  %v4485_v10 = vpop.permute.xlu1 %1232  ;;  %vm6478_vm2 = vcmask 285696  }
  0xec   : > { %v4495_v13 = vpop.permute.xlu0 %908 }
  0xee   : > { %v4493_v12 = vpop.permute.xlu1 %1568 }
  0xef   : > { %6580 = vst [vmem:[#allocation10_spill] sm:$0xff] %v4493_v12 }
  0xf2   : > { %v4505_v14 = vpop.permute.xlu1 %1211 }
  0xf3   : > { %6585 = vst [vmem:[#allocation11_spill] sm:$0xff] %v4505_v14 }
 0x1aa   : > { %v503_v21 = vpop.f32.mrf.mxu1 }
 0x1ab   : > { %v504_v22 = vadd.f32 %v503_v21, %v424_v20  ;;  %v4513_v21 = vpop.permute.xlu1 %1547 }
 0x1ac   : > { %v505_v23 = vpop.f32.mrf.mxu1  ;;  %6588 = vst [vmem:[#allocation12_spill] sm:$0xff] %v4513_v21 }
 0x1ad   : > { %v3934_v24 = vmul.f32 -1.442695, %v504_v22  ;;  %v506_v25 = vadd.f32 %v505_v23, %v424_v20  ;;  %v4507_v20 = vpop.permute.xlu0 %866 }
 0x1af   : > { %4142 = vpow2.f32 %v3934_v24  ;;  %v3935_v27 = vmul.f32 -1.442695, %v506_v25  ;;  %v4525_v23 = vpop.permute.xlu1 %1190 }
 0x1b0   : > { %6593 = vst [vmem:[#allocation13_spill] sm:$0xff] %v4525_v23 }
 0x1b1   : > { %4144 = vpow2.f32 %v3935_v27  ;;  %v4515_v22 = vpop.permute.xlu0 %824 }
 0x1b3   : > { %v4533_v25 = vpop.permute.xlu1 %1526 }
 0x1b4   : > { %6596 = vst [vmem:[#allocation14_spill] sm:$0xff] %v4533_v25 }
 0x1b5   : > { %v4527_v24 = vpop.permute.xlu0 %778 }
 0x1b9   : > { %v4535_v27 = vpop.permute.xlu0 %728 }
 0x1bc   : > { %v4143_v30 = vpop.eup %4142 }
 0x1bd   : > { %v514_v31 = vadd.f32 1.0, %v4143_v30  ;;  %v4545_v30 = vpop.permute.xlu1 %1505 }
 0x1be   : > { %v4145_v32 = vpop.eup %4144  ;;  %6601 = vst [vmem:[#allocation15_spill] sm:$0xff] %v4545_v30 }
 0x1bf   : > { %4146 = vrcp.f32 %v514_v31  ;;  %v515_v33 = vadd.f32 1.0, %v4145_v32  ;;  %v4547_v31 = vpop.permute.xlu0 %678 }
 0x1c1   : > { %4148 = vrcp.f32 %v515_v33  ;;  %v4553_v32 = vpop.permute.xlu1 %1159 }
 0x1c2   : > { %6604 = vst [vmem:[#allocation16_spill] sm:$0xff] %v4553_v32 }
 0x1c3   : > { %v4555_v33 = vpop.permute.xlu0 %1484 }
 0x1c4   : > { %6605 = vst [vmem:[#allocation17_spill] sm:$0xff] %v4555_v33 }
 0x1cc   : > { %v4147_v36 = vpop.eup %4146 }
 0x1cd   : > { %v520_v38 = vmul.f32 %v4147_v36, %v4295_v5  ;;  %v4565_v36 = vpop.permute.xlu1 %1139 }
 0x1ce   : > { %v4149_v39 = vpop.eup %4148  ;;  %6610 = vst [vmem:[#allocation18_spill] sm:$0xff] %v4565_v36 }
 0x1cf   : > { %v524_v40 = vrot.slane %v520_v38, 1  ;;  %v528_v41 = vrot.slane %v520_v38, 2  ;;  %v521_v42 = vmul.f32 %v4149_v39, %v4293_v4  ;;  %v532_v43 = vrot.slane %v520_v38, 3 }
 0x1d0   : > { %v536_v45 = vrot.slane %v520_v38, 5  ;;  %v540_v50 = vrot.slane %v520_v38, 6  ;;  %v544_v52 = vrot.slane %v520_v38, 7 }
 0x1d1   : > { %v549_v44 = vsel %vm548_vm3, %v520_v38, %v524_v40  ;;  %v525_v47 = vrot.slane %v521_v42, 1  ;;  %v529_v48 = vrot.slane %v521_v42, 2  ;;  %v533_v54 = vrot.slane %v521_v42, 3  ;;  %v4573_v39 = vpop.permute.xlu1 %1118 }
 0x1d2   : > { %v551_v46 = vsel %vm6474_vm1, %v549_v44, %v528_v41  ;;  %v537_v57 = vrot.slane %v521_v42, 5  ;;  %v541_v60 = vrot.slane %v521_v42, 6  ;;  %v545_v63 = vrot.slane %v521_v42, 7  ;;  %6614 = vst [vmem:[#allocation20_spill] sm:$0xff] %v4573_v39 }
 0x1d3   : > { %v554_v51 = vsel %vm553_vm4, %v551_v46, %v532_v43  ;;  %v550_v55 = vsel %vm548_vm3, %v521_v42, %v525_v47 }
 0x1d4   : > { %v557_v53 = vsel %vm556_vm5, %v554_v51, %v536_v45  ;;  %v552_v58 = vsel %vm6474_vm1, %v550_v55, %v529_v48  ;;  %vm6477_vm1 = vcmask 277504  }
 0x1d5   : > { %v560_v56 = vsel %vm559_vm6, %v557_v53, %v540_v50  ;;  %v555_v61 = vsel %vm553_vm4, %v552_v58, %v533_v54  ;;  %v4585_v41 = vpop.permute.xlu1 %1097  ;;  %vm6471_vm4 = vcmask 244736  }
 0x1d6   : > { %v563_v59 = vsel %vm562_vm7, %v560_v56, %v544_v52  ;;  %v558_v1 = vsel %vm556_vm5, %v555_v61, %v537_v57  ;;  %6620 = vst [vmem:[#allocation22_spill] sm:$0xff] %v4585_v41 }
 0x1d7   : > { %v4439_v62 = vsel %vm565_vm8, %v563_v59, %v520_v38  ;;  %v561_v2 = vsel %vm559_vm6, %v558_v1, %v541_v60  ;;  %v4567_v38 = vpop.permute.xlu0 %1463 }
 0x1d8   : > { %6575 = vst [vmem:[#allocation8_spill] sm:$0xff] %v4439_v62  ;;  %952 = vrot.lane.b32.xlu0 %v4439_v62, %s6430_s26  ;;  %994 = vrot.lane.b32.xlu1 %v4439_v62, %s6434_s24  ;;  %v564_v4 = vsel %vm562_vm7, %v561_v2, %v545_v63  ;;  %s6587_s26 = smov 79   ;;  %s6590_s24 = smov 80   ;;  %6611 = vst [vmem:[#allocation19_spill] sm:$0xff] %v4567_v38  ;;  %vm6473_vm7 = vcmask 252928  }
 0x1d9   : > { %v4451_v5 = vsel %vm565_vm8, %v564_v4, %v521_v42  ;;  %v4593_v43 = vpop.permute.xlu1 %1076 }
 0x1da   : > { %6576 = vst [vmem:[#allocation9_spill] sm:$0xff] %v4451_v5  ;;  %6624 = vst [vmem:[#allocation24_spill] sm:$0xff] %v4593_v43 }
 0x1db   : > { %v4575_v40 = vpop.permute.xlu0 %1442 }
 0x1dc   : > { %910 = vrot.lane.b32.xlu0 %v4439_v62, %s6426_s28  ;;  %973 = vrot.lane.b32.xlu1 %v4439_v62, %s6440_s21  ;;  %s6584_s28 = smov 78   ;;  %s6594_s21 = smov 127   ;;  %6615 = vst [vmem:[#allocation21_spill] sm:$0xff] %v4575_v40 }
 0x1dd   : > { %v4605_v45 = vpop.permute.xlu1 %1055 }
 0x1de   : > { %6630 = vst [vmem:[#allocation26_spill] sm:$0xff] %v4605_v45 }
 0x1df   : > { %v4587_v42 = vpop.permute.xlu0 %1421 }
 0x1e0   : > { %868 = vrot.lane.b32.xlu0 %v4439_v62, %s6418_s11  ;;  %931 = vrot.lane.b32.xlu1 %v4439_v62, %s6436_s22  ;;  %s6579_s11 = smov 49   ;;  %s6591_s22 = smov 126   ;;  %6621 = vst [vmem:[#allocation23_spill] sm:$0xff] %v4587_v42 }
 0x1e1   : > { %v4613_v47 = vpop.permute.xlu1 %1034 }
 0x1e2   : > { %6634 = vst [vmem:[#allocation28_spill] sm:$0xff] %v4613_v47 }
 0x1e3   : > { %v4595_v44 = vpop.permute.xlu0 %1400 }
 0x1e4   : > { %826 = vrot.lane.b32.xlu0 %v4439_v62, %s6414_s13  ;;  %889 = vrot.lane.b32.xlu1 %v4439_v62, %s6432_s23  ;;  %s6577_s13 = smov 47   ;;  %s6589_s23 = smov 125   ;;  %6625 = vst [vmem:[#allocation25_spill] sm:$0xff] %v4595_v44 }
 0x1e5   : > { %v4625_v50 = vpop.permute.xlu1 %1013 }
 0x1e6   : > { %6640 = vst [vmem:[#allocation30_spill] sm:$0xff] %v4625_v50 }
 0x1e7   : > { %v4607_v46 = vpop.permute.xlu0 %1379 }
 0x1e8   : > { %780 = vrot.lane.b32.xlu0 %v4439_v62, %s6416_s19  ;;  %847 = vrot.lane.b32.xlu1 %v4439_v62, %s6428_s25  ;;  %s6578_s19 = smov 112   ;;  %s6586_s25 = smov 115   ;;  %6631 = vst [vmem:[#allocation27_spill] sm:$0xff] %v4607_v46 }
 0x1eb   : > { %v4615_v48 = vpop.permute.xlu0 %1358 }
 0x1ec   : > { %730 = vrot.lane.b32.xlu0 %v4439_v62, %s6420_s17  ;;  %805 = vrot.lane.b32.xlu1 %v4439_v62, %s6424_s27  ;;  %s6581_s17 = smov 113   ;;  %s6583_s27 = smov 114   ;;  %6635 = vst [vmem:[#allocation29_spill] sm:$0xff] %v4615_v48 }
 0x1ef   : > { %v4627_v51 = vpop.permute.xlu0 %1337 }
 0x1f0   : > { %680 = vrot.lane.b32.xlu0 %v4439_v62, %s6422_s14  ;;  %755 = vrot.lane.b32.xlu1 %v4439_v62, %s6577_s13  ;;  %s6582_s14 = smov 51   ;;  %6641 = vst [vmem:[#allocation31_spill] sm:$0xff] %v4627_v51 }
 0x1f4   : > { %1312 = vrot.lane.b32.xlu0 %v4439_v62, %s6578_s19  ;;  %705 = vrot.lane.b32.xlu1 %v4439_v62, %s6579_s11 }
 0x1f8   : > { %1291 = vrot.lane.b32.xlu0 %v4439_v62, %s6581_s17  ;;  %655 = vrot.lane.b32.xlu1 %v4439_v62, %s6582_s14 }
 0x1fc   : > { %1270 = vrot.lane.b32.xlu0 %v4439_v62, %s6583_s27  ;;  %1648 = vrot.lane.b32.xlu1 %v4439_v62, %s6584_s28 }
 0x200   : > { %1249 = vrot.lane.b32.xlu0 %v4439_v62, %s6586_s25  ;;  %1627 = vrot.lane.b32.xlu1 %v4439_v62, %s6587_s26 }
 0x204   : > { %1228 = vrot.lane.b32.xlu0 %v4439_v62, %s6589_s23  ;;  %1606 = vrot.lane.b32.xlu1 %v4439_v62, %s6590_s24 }
 0x208   : > { %1207 = vrot.lane.b32.xlu0 %v4439_v62, %s6591_s22  ;;  %1585 = vrot.lane.b32.xlu1 %v4439_v62, %s6592_s20 }
 0x20c   : > { %1186 = vrot.lane.b32.xlu0 %v4439_v62, %s6594_s21  ;;  %1564 = vrot.lane.b32.xlu1 %v4439_v62, %s6595_s15 }
 0x210   : > { %1501 = vrot.lane.b32.xlu0 %v4439_v62, %s6597_s16  ;;  %1543 = vrot.lane.b32.xlu1 %v4439_v62, %s6598_s18  ;;  %s6633_s16 = smov 29  }
 0x214   : > { %1480 = vrot.lane.b32.xlu0 %v4439_v62, %s6599_s12  ;;  %1522 = vrot.lane.b32.xlu1 %v4439_v62, %s6600_s29 }
 0x218   : > { %1459 = vrot.lane.b32.xlu0 %v4439_v62, %s6602_s0  ;;  %1161 = vrot.lane.b32.xlu1 %v4439_v62, %s6603_s1  ;;  %s6629_s1 = smov 18  }
 0x21c   : > { %1438 = vrot.lane.b32.xlu0 %v4439_v62, %s6606_s2  ;;  %1141 = vrot.lane.b32.xlu1 %v4439_v62, %s6607_s3  ;;  %s6627_s3 = smov 17  }
 0x220   : > { %1417 = vrot.lane.b32.xlu0 %v4439_v62, %s6608_s4  ;;  %1120 = vrot.lane.b32.xlu1 %v4439_v62, %s6609_s30  ;;  %s6623_s30 = smov 16  }
 0x224   : > { %1396 = vrot.lane.b32.xlu0 %v4439_v62, %s6612_s9  ;;  %1099 = vrot.lane.b32.xlu1 %v4439_v62, %s6613_s10  ;;  %s6622_s10 = smov 111  }
 0x228   : > { %1375 = vrot.lane.b32.xlu0 %v4439_v62, %s6616_s7  ;;  %1078 = vrot.lane.b32.xlu1 %v4439_v62, %s6617_s8  ;;  %s6626_s8 = smov 19  }
 0x22c   : > { %1354 = vrot.lane.b32.xlu0 %v4439_v62, %s6618_s6  ;;  %1057 = vrot.lane.b32.xlu1 %v4439_v62, %s6619_s5  ;;  %s6628_s5 = smov 30  }
 0x230   : > { %1333 = vrot.lane.b32.xlu0 %v4439_v62, %s6622_s10  ;;  %1036 = vrot.lane.b32.xlu1 %v4439_v62, %s6623_s30  ;;  %s6632_s30 = smov 32  }
 0x234   : > { %975 = vrot.lane.b32.xlu0 %v4451_v5, %s6626_s8  ;;  %1015 = vrot.lane.b32.xlu1 %v4439_v62, %s6627_s3  ;;  %s6636_s8 = smov 34   ;;  %s6639_s3 = smov 33  }
 0x238   : > { %933 = vrot.lane.b32.xlu0 %v4451_v5, %s6628_s5  ;;  %996 = vrot.lane.b32.xlu1 %v4451_v5, %s6629_s1  ;;  %s6637_s5 = smov 31   ;;  %s6638_s1 = smov 45  }
 0x23c   : > { %891 = vrot.lane.b32.xlu0 %v4451_v5, %s6632_s30  ;;  %954 = vrot.lane.b32.xlu1 %v4451_v5, %s6633_s16  ;;  %s6642_s30 = smov 35   ;;  %s6672_s16 = smov 14  }
 0x240   : > { %849 = vrot.lane.b32.xlu0 %v4451_v5, %s6636_s8  ;;  %912 = vrot.lane.b32.xlu1 %v4451_v5, %s6637_s5  ;;  %s6643_s8 = smov 46   ;;  %s6676_s5 = smov 16  }
 0x244   : > { %807 = vrot.lane.b32.xlu0 %v4451_v5, %s6638_s1  ;;  %870 = vrot.lane.b32.xlu1 %v4451_v5, %s6639_s3  ;;  %s6667_s1 = smov 13   ;;  %s6670_s3 = sld [smem:[#allocation59_spill]] }
 0x248   : > { %757 = vrot.lane.b32.xlu0 %v4451_v5, %s6577_s13  ;;  %828 = vrot.lane.b32.xlu1 %v4451_v5, %s6642_s30  ;;  %s6644_s13 = smov 48   ;;  %s6664_s30 = smov 3  }
 0x24a   : > { %v4633_v52 = vpop.permute.xlu0 %952  ;;  %v4635_v53 = vpop.permute.xlu1 %994 }
 0x24c   : > { %707 = vrot.lane.b32.xlu0 %v4451_v5, %s6579_s11  ;;  %782 = vrot.lane.b32.xlu1 %v4451_v5, %s6643_s8  ;;  %s6645_s11 = smov 50   ;;  %s6677_s8 = smov 17  }
 0x24e   : > { %v4641_v54 = vpop.permute.xlu0 %910  ;;  %v4643_v55 = vpop.permute.xlu1 %973 }
 0x250   : > { %657 = vrot.lane.b32.xlu0 %v4451_v5, %s6582_s14  ;;  %732 = vrot.lane.b32.xlu1 %v4451_v5, %s6644_s13  ;;  %s6460_s14 = smov 77   ;;  %s6658_s13 = smov 1  }
 0x252   : > { %v4649_v56 = vpop.permute.xlu0 %868  ;;  %v4651_v57 = vpop.permute.xlu1 %931 }
 0x254   : > { %1314 = vrot.lane.b32.xlu0 %v4451_v5, %s6578_s19  ;;  %682 = vrot.lane.b32.xlu1 %v4451_v5, %s6645_s11  ;;  %s6661_s11 = smov 2  }
 0x256   : > { %v4657_v58 = vpop.permute.xlu0 %826  ;;  %v4659_v59 = vpop.permute.xlu1 %889 }
 0x258   : > { %1650 = vrot.lane.b32.xlu0 %v4451_v5, %s6584_s28  ;;  %1482 = vrot.lane.b32.xlu1 %v4451_v5, %s6599_s12 }
 0x25a   : > { %v4665_v60 = vpop.permute.xlu0 %780  ;;  %v4667_v61 = vpop.permute.xlu1 %847 }
 0x25c   : > { %1293 = vrot.lane.b32.xlu0 %v4451_v5, %s6581_s17  ;;  %1461 = vrot.lane.b32.xlu1 %v4451_v5, %s6602_s0 }
 0x25e   : > { %v4673_v63 = vpop.permute.xlu0 %730  ;;  %v4675_v1 = vpop.permute.xlu1 %805 }
 0x260   : > { %1629 = vrot.lane.b32.xlu0 %v4451_v5, %s6587_s26  ;;  %1440 = vrot.lane.b32.xlu1 %v4451_v5, %s6606_s2 }
 0x262   : > { %v4681_v2 = vpop.permute.xlu0 %680  ;;  %v4683_v4 = vpop.permute.xlu1 %755 }
 0x264   : > { %1272 = vrot.lane.b32.xlu0 %v4451_v5, %s6583_s27  ;;  %1419 = vrot.lane.b32.xlu1 %v4451_v5, %s6608_s4 }
 0x266   : > { %v4689_v0 = vpop.permute.xlu0 %1312  ;;  %v4691_v50 = vpop.permute.xlu1 %705 }
 0x268   : > { %1608 = vrot.lane.b32.xlu0 %v4451_v5, %s6590_s24  ;;  %1398 = vrot.lane.b32.xlu1 %v4451_v5, %s6612_s9 }
 0x26a   : > { %v4697_v47 = vpop.permute.xlu0 %1291  ;;  %v4699_v45 = vpop.permute.xlu1 %655 }
 0x26c   : > { %1251 = vrot.lane.b32.xlu0 %v4451_v5, %s6586_s25  ;;  %1377 = vrot.lane.b32.xlu1 %v4451_v5, %s6616_s7 }
 0x26e   : > { %v4705_v43 = vpop.permute.xlu0 %1270  ;;  %v4707_v41 = vpop.permute.xlu1 %1648 }
 0x270   : > { %1587 = vrot.lane.b32.xlu0 %v4451_v5, %s6592_s20  ;;  %1356 = vrot.lane.b32.xlu1 %v4451_v5, %s6618_s6 }
 0x272   : > { %v4713_v51 = vpop.permute.xlu0 %1249  ;;  %v4715_v48 = vpop.permute.xlu1 %1627 }
 0x274   : > { %1230 = vrot.lane.b32.xlu0 %v4451_v5, %s6589_s23  ;;  %1335 = vrot.lane.b32.xlu1 %v4451_v5, %s6622_s10 }
 0x276   : > { %v4721_v39 = vpop.permute.xlu0 %1228  ;;  %v4723_v46 = vpop.permute.xlu1 %1606 }
 0x278   : > { %1566 = vrot.lane.b32.xlu0 %v4451_v5, %s6595_s15  ;;  %1671 = vrot.lane.b32.xlu1 %v4451_v5, %s6460_s14 }
 0x27a   : > { %v4729_v44 = vpop.permute.xlu0 %1207  ;;  %v4731_v36 = vpop.permute.xlu1 %1585 }
 0x27b   : > { %6646 = vst [vmem:[#allocation32_spill] sm:$0xff] %v4729_v44 }
 0x27c   : > { %1209 = vrot.lane.b32.xlu0 %v4451_v5, %s6591_s22  ;;  %1669 = vrot.lane.b32.xlu1 %v4439_v62, %s6460_s14  ;;  %s6655_s14 = smov 94  }
 0x27e   : > { %v4737_v42 = vpop.permute.xlu0 %1186  ;;  %v4739_v40 = vpop.permute.xlu1 %1564 }
 0x27f   : > { %6647 = vst [vmem:[#allocation33_spill] sm:$0xff] %v4737_v42  ;;  %6648 = vst [vmem:[#allocation34_spill] sm:$0xff] %v4739_v40  ;;  %v4217_v42 = vmov 1983009808  }
 0x280   : > { %1545 = vrot.lane.b32.xlu0 %v4451_v5, %s6598_s18  ;;  %v1792_v21 = vunpack.c.l.s4 %v4217_v42 }
 0x282   : > { %v4743_v32 = vpop.permute.xlu0 %1501  ;;  %v4745_v38 = vpop.permute.xlu1 %1543 }
 0x283   : > { %6649 = vst [vmem:[#allocation35_spill] sm:$0xff] %v4743_v32  ;;  %6650 = vst [vmem:[#allocation36_spill] sm:$0xff] %v4745_v38 }
 0x284   : > { %1188 = vrot.lane.b32.xlu0 %v4451_v5, %s6594_s21 }
 0x286   : > { %v4749_v33 = vpop.permute.xlu0 %1480  ;;  %v4751_v30 = vpop.permute.xlu1 %1522 }
 0x287   : > { %6651 = vst [vmem:[#allocation37_spill] sm:$0xff] %v4749_v33  ;;  %6652 = vst [vmem:[#allocation38_spill] sm:$0xff] %v4751_v30 }
 0x288   : > { %1524 = vrot.lane.b32.xlu0 %v4451_v5, %s6600_s29 }
 0x28a   : > { %v4755_v25 = vpop.permute.xlu0 %1459  ;;  %v4757_v62 = vpop.permute.xlu1 %1161 }
 0x28b   : > { %6653 = vst [vmem:[#allocation39_spill] sm:$0xff] %v4755_v25  ;;  %6654 = vst [vmem:[#allocation40_spill] sm:$0xff] %v4757_v62  ;;  %v568_v25 = vlaneseq }
 0x28c   : > { %1503 = vrot.lane.b32.xlu0 %v4451_v5, %s6655_s14 }
 0x28d   : > { %v1795_v14 = vshrl.u32 %v568_v25, 7  ;;  %v569_v42 = vand.u32 127, %v568_v25 }
 0x28e   : > { %v4761_v32 = vpop.permute.xlu0 %1438  ;;  %v4763_v23 = vpop.permute.xlu1 %1141 }
 0x28f   : > { %6656 = vst [vmem:[#allocation41_spill] sm:$0xff] %v4761_v32  ;;  %6657 = vst [vmem:[#allocation42_spill] sm:$0xff] %v4763_v23  ;;  %v1793_v32 = vunpack.c.0.s8 %v1792_v21  ;;  %v1684_v21 = vld [vmem:[%s6670_s3] sm:$0xff]  ;;  %s6673_s3 = smov 15  }
 0x290   : > { %1163 = vrot.lane.b32.xlu0 %v4451_v5, %s6658_s13 }
 0x292   : > { %v4767_v33 = vpop.permute.xlu0 %1417  ;;  %v4769_v30 = vpop.permute.xlu1 %1120 }
 0x293   : > { %6659 = vst [vmem:[#allocation43_spill] sm:$0xff] %v4767_v33  ;;  %6660 = vst [vmem:[#allocation44_spill] sm:$0xff] %v4769_v30  ;;  %v4783_v30 = vsub.s32 %v1793_v32, %v1795_v14  ;;  %v570_v14 = vadd.s32 128, %v569_v42  ;;  %v1790_v32 = vcombine.high %v1684_v21, %v1684_v21 }
 0x294   : > { %1143 = vrot.lane.b32.xlu0 %v4451_v5, %s6661_s11 }
 0x296   : > { %v4773_v62 = vpop.permute.xlu0 %1396  ;;  %v4775_v38 = vpop.permute.xlu1 %1099 }
 0x297   : > { %6662 = vst [vmem:[#allocation45_spill] sm:$0xff] %v4773_v62  ;;  %6663 = vst [vmem:[#allocation46_spill] sm:$0xff] %v4775_v38  ;;  %v4795_v38 = vrot.slane %v1684_v21, %v4783_v30 }
 0x298   : > { %1122 = vrot.lane.b32.xlu0 %v4451_v5, %s6664_s30 }
 0x299   : > { %6671 = vst [vmem:[#allocation51_spill] sm:$0xff] %v4795_v38 }
 0x29a   : > { %v4779_v23 = vpop.permute.xlu0 %1375  ;;  %v4781_v33 = vpop.permute.xlu1 %1078 }
 0x29b   : > { %6665 = vst [vmem:[#allocation47_spill] sm:$0xff] %v4779_v23  ;;  %6666 = vst [vmem:[#allocation48_spill] sm:$0xff] %v4781_v33  ;;  %v1805_v33 = vcombine.high %v4795_v38, %v4795_v38  ;;  %v4810_v23 = vand.u32 15, %v570_v14  ;;  %v4816_v38 = vand.u32 15, %v569_v42 }
 0x29c   : > { %1101 = vrot.lane.b32.xlu0 %v4451_v5, %s6667_s1  ;;  %s6736_s1 = smov 14  }
 0x29d   : > { %1876 = vmatprep.mubr.f32.mxu0 %v1805_v33  ;;  %6674 = vst [vmem:[#allocation52_spill] sm:$0xff] %v4810_v23  ;;  %6675 = vst [vmem:[#allocation53_spill] sm:$0xff] %v4816_v38  ;;  %vm6509_vm10 = vcmp.ge.s32.totalorder %v4810_v23, 2  ;;  %vm601_vm11 = vcmp.ge.s32.totalorder %v4816_v38, 2  ;;  %vm596_vm13 = vcmp.ge.s32.totalorder %v4810_v23, 3  ;;  %vm595_vm14 = vcmp.ge.s32.totalorder %v4816_v38, 3 }
 0x29e   : > { %v4787_v44 = vpop.permute.xlu0 %1354  ;;  %v4789_v62 = vpop.permute.xlu1 %1057  ;;  %vm6501_vm3 = vcmp.lt.s32.totalorder %v4816_v38, 13  ;;  %vm628_vm5 = vcmp.lt.s32.totalorder %v4810_v23, 14  ;;  %vm627_vm6 = vcmp.lt.s32.totalorder %v4816_v38, 14  ;;  %vm622_vm8 = vcmp.lt.s32.totalorder %v4810_v23, 15 }
 0x29f   : > { %6668 = vst [vmem:[#allocation49_spill] sm:$0xff] %v4787_v44  ;;  %6669 = vst [vmem:[#allocation50_spill] sm:$0xff] %v4789_v62  ;;  %v4806_v62 = vrot.slane %v1790_v32, %v4783_v30 }
 0x2a0   : > { %1080 = vrot.lane.b32.xlu0 %v4451_v5, %s6672_s16  ;;  %s6680_s16 = sld [smem:[#allocation60_spill]] }
 0x2a1   : > { %v1806_v12 = vcombine.high %v4806_v62, %v4806_v62 }
 0x2a2   : > { %v4801_v25 = vpop.permute.xlu0 %1333  ;;  %v4803_v44 = vpop.permute.xlu1 %1036 }
 0x2a3   : > { %3936 = vmatprep.mubr.msk.f32.mxu1 %vm342_vm0, %v1806_v12  ;;  %v999_v12 = vsel %vm6469_vm9, %v4475_v9, %v4635_v53  ;;  %vm634_vm0 = vcmp.lt.s32.totalorder %v4810_v23, 13  ;;  %v978_v9 = vsel %vm6470_vm12, %v4403_v15, %v4643_v55  ;;  %v957_v15 = vsel %vm6472_vm15, %v4487_v11, %v4633_v52 }
 0x2a4   : > { %1059 = vrot.lane.b32.xlu0 %v4451_v5, %s6673_s3  ;;  %v936_v11 = vsel %vm6471_vm4, %v4405_v16, %v4651_v57 }
 0x2a6   : > { %v976_v21 = vpop.permute.xlu0 %975  ;;  %v4814_v40 = vpop.permute.xlu1 %1015 }
 0x2a7   : > { %v979_v42 = vsel %vm6470_vm12, %v4643_v55, %v976_v21  ;;  %v6679_v55 = vmov 0.0   ;;  %vm6476_vm12 = vcmask 261120  }
 0x2a8   : > { %1038 = vrot.lane.b32.xlu0 %v4451_v5, %s6676_s5  ;;  %s6742_s5 = smov 16  }
 0x2aa   : > { %v934_v33 = vpop.permute.xlu0 %933  ;;  %v997_v32 = vpop.permute.xlu1 %996 }
 0x2ab   : > { %v1000_v14 = vsel %vm6469_vm9, %v4635_v53, %v997_v32  ;;  %vm621_vm9 = vcmp.lt.s32.totalorder %v4816_v38, 15 }
 0x2ac   : > { %1017 = vrot.lane.b32.xlu0 %v4451_v5, %s6677_s8  ;;  %3948 = vmatprep.subr.msk.mxu0 %vm6509_vm10, %v1000_v14  ;;  %s6678_s8 = smov 77   ;;  %v937_v14 = vsel %vm6471_vm4, %v4651_v57, %v934_v33  ;;  %vm6481_vm4 = vcmask 269312  }
 0x2ad   : > { %3949 = vmatpush1.msk.msra.mxu0 %vm601_vm11, %v999_v12  ;;  %v1783_v12 = vld [vmem:[%s6680_s16] sm:$0x3]  ;;  %s6737_s16 = smov 13  }
 0x2ae   : > { %v892_v53 = vpop.permute.xlu0 %891  ;;  %3950 = vmatprep.subr.msk.mxu0 %vm596_vm13, %v979_v42  ;;  %v955_v32 = vpop.permute.xlu1 %954 }
 0x2af   : > { %v958_v21 = vsel %vm6472_vm15, %v4633_v52, %v955_v32  ;;  %3951 = vmatpush1.msk.msra.mxu0 %vm595_vm14, %v978_v9  ;;  %v915_v9 = vsel %vm6473_vm7, %v4495_v13, %v4641_v54  ;;  %v895_v16 = vsel %vm6476_vm12, %v4659_v59, %v892_v53  ;;  %vm608_vm15 = vcmp.ge.s32.totalorder %v4810_v23, 1 }
 0x2b0   : > { %1673 = vrot.lane.b32.xlu0 %v6679_v55, %s6678_s8  ;;  %3952 = vmatprep.subr.msk.mxu0 %vm634_vm0, %v958_v21  ;;  %v894_v13 = vsel %vm6476_vm12, %v4407_v17, %v4659_v59  ;;  %v873_v53 = vsel %vm6481_vm4, %v4507_v20, %v4649_v56  ;;  %v852_v17 = vsel %vm6477_vm1, %v4409_v18, %v4667_v61  ;;  %vm6479_vm12 = vcmask 367616  }
 0x2b1   : > { %3953 = vmatpush1.msk.msra.mxu0 %vm6501_vm3, %v957_v15 }
 0x2b2   : > { %v850_v52 = vpop.permute.xlu0 %849  ;;  %3954 = vmatprep.subr.msk.mxu0 %vm628_vm5, %v937_v14  ;;  %v913_v42 = vpop.permute.xlu1 %912 }
 0x2b3   : > { %v916_v33 = vsel %vm6473_vm7, %v4641_v54, %v913_v42  ;;  %3955 = vmatpush1.msk.msra.mxu0 %vm627_vm6, %v936_v11  ;;  %vm607_vm7 = vcmp.ge.s32.totalorder %v4816_v38, 1  ;;  %v853_v21 = vsel %vm6477_vm1, %v4667_v61, %v850_v52  ;;  %vm6480_vm1 = vcmask 375808  }
 0x2b4   : > { %1786 = vperm.xlu0 %4091, %v1783_v12   ;;  %3956 = vmatprep.subr.msk.mxu0 %vm622_vm8, %v916_v33  ;;  %v810_v61 = vsel %vm6479_vm12, %v4411_v19, %v4675_v1 }
 0x2b5   : > { %3957 = vmatpush1.msk.msra.mxu0 %vm621_vm9, %v915_v9 }
 0x2b6   : > { %v808_v57 = vpop.permute.xlu0 %807  ;;  %1822 = vmatprep.subr.mxu0 %v895_v16  ;;  %v871_v32 = vpop.permute.xlu1 %870 }
 0x2b7   : > { %v874_v54 = vsel %vm6481_vm4, %v4649_v56, %v871_v32  ;;  %1823 = vmatpush1.msra.mxu0 %v894_v13  ;;  %v831_v56 = vsel %vm6478_vm2, %v4515_v22, %v4657_v58  ;;  %v811_v18 = vsel %vm6479_vm12, %v4675_v1, %v808_v57  ;;  %vm6483_vm12 = vcmask 392192  }
 0x2b8   : > { %3958 = vmatprep.subr.msk.mxu0 %vm608_vm15, %v874_v54  ;;  %vm6486_vm4 = vcmask 408576  }
 0x2b9   : > { %3959 = vmatpush1.msk.msra.mxu0 %vm607_vm7, %v873_v53 }
 0x2ba   : > { %v758_v59 = vpop.permute.xlu0 %757  ;;  %3960 = vmatprep.subr.msk.mxu0 %vm6509_vm10, %v853_v21  ;;  %v829_v15 = vpop.permute.xlu1 %828 }
 0x2bb   : > { %v832_v20 = vsel %vm6478_vm2, %v4657_v58, %v829_v15  ;;  %3961 = vmatpush1.msk.msra.mxu0 %vm601_vm11, %v852_v17  ;;  %vm6482_vm2 = vcmask 384000   ;;  %v785_v58 = vsel %vm6480_vm1, %v4527_v24, %v4665_v60  ;;  %v6682_v15 = vld [vmem:[#allocation10_spill] sm:$0xff] }
 0x2bc   : > { %3962 = vmatprep.subr.msk.mxu0 %vm596_vm13, %v832_v20  ;;  %v761_v19 = vsel %vm6482_vm2, %v4683_v4, %v758_v59  ;;  %v760_v1 = vsel %vm6482_vm2, %v4413_v26, %v4683_v4  ;;  %vm6485_vm2 = vcmask 416768  }
 0x2bd   : > { %3963 = vmatpush1.msk.msra.mxu0 %vm595_vm14, %v831_v56  ;;  %v6683_v56 = vld [vmem:[#allocation32_spill] sm:$0xff] }
 0x2be   : > { %v708_v55 = vpop.permute.xlu0 %707  ;;  %3964 = vmatprep.subr.msk.mxu0 %vm634_vm0, %v811_v18  ;;  %v783_v14 = vpop.permute.xlu1 %782 }
 0x2bf   : > { %v786_v22 = vsel %vm6480_vm1, %v4665_v60, %v783_v14  ;;  %3965 = vmatpush1.msk.msra.mxu0 %vm6501_vm3, %v810_v61  ;;  %vm6484_vm1 = vcmask 400384   ;;  %v735_v60 = vsel %vm6483_vm12, %v4535_v27, %v4673_v63  ;;  %v685_v27 = vsel %vm6486_vm4, %v4547_v31, %v4681_v2  ;;  %v6684_v61 = vld [vmem:[#allocation11_spill] sm:$0xff] }
 0x2c0   : > { %3966 = vmatprep.subr.msk.mxu0 %vm628_vm5, %v786_v22  ;;  %v711_v26 = vsel %vm6484_vm1, %v4691_v50, %v708_v55  ;;  %v710_v4 = vsel %vm6484_vm1, %v4415_v28, %v4691_v50  ;;  %vm6487_vm1 = vcmask 916480   ;;  %v660_v50 = vsel %vm6485_vm2, %v4417_v29, %v4699_v45  ;;  %v6685_v22 = vld [vmem:[#allocation36_spill] sm:$0xff] }
 0x2c1   : > { %3967 = vmatpush1.msk.msra.mxu0 %vm627_vm6, %v785_v58 }
 0x2c2   : > { %v658_v12 = vpop.permute.xlu0 %657  ;;  %3968 = vmatprep.subr.msk.mxu0 %vm622_vm8, %v761_v19  ;;  %v733_v11 = vpop.permute.xlu1 %732  ;;  %v6686_v19 = vld [vmem:[#allocation12_spill] sm:$0xff] }
 0x2c3   : > { %3969 = vmatpush1.msk.msra.mxu0 %vm621_vm9, %v760_v1  ;;  %v736_v24 = vsel %vm6483_vm12, %v4673_v63, %v733_v11  ;;  %vm6489_vm12 = vcmask 637952   ;;  %v661_v28 = vsel %vm6485_vm2, %v4699_v45, %v658_v12  ;;  %vm6488_vm2 = vcmask 924672  }
 0x2c4   : > { %1836 = vmatprep.subr.mxu0 %v736_v24  ;;  %v6687_v24 = vld [vmem:[#allocation33_spill] sm:$0xff] }
 0x2c5   : > { %1837 = vmatpush1.msra.mxu0 %v735_v60 }
 0x2c6   : > { %v1315_v52 = vpop.permute.xlu0 %1314  ;;  %3970 = vmatprep.subr.msk.mxu0 %vm608_vm15, %v711_v26  ;;  %v683_v42 = vpop.permute.xlu1 %682  ;;  %v6688_v26 = vld [vmem:[#allocation13_spill] sm:$0xff] }
 0x2c7   : > { %v686_v33 = vsel %vm6486_vm4, %v4681_v2, %v683_v42  ;;  %3971 = vmatpush1.msk.msra.mxu0 %vm607_vm7, %v710_v4  ;;  %v1320_v2 = vsel %vm6487_vm1, %v1315_v52, %v4419_v34  ;;  %v1319_v29 = vsel %vm6487_vm1, %v4689_v0, %v1315_v52  ;;  %vm6500_vm4 = vcmask 646144  }
 0x2c8   : > { %3972 = vmatprep.subr.msk.mxu0 %vm6509_vm10, %v686_v33  ;;  %vm6490_vm1 = vcmask 932864   ;;  %v6689_v33 = vld [vmem:[#allocation38_spill] sm:$0xff] }
 0x2c9   : > { %3973 = vmatpush1.msk.msra.mxu0 %vm601_vm11, %v685_v27 }
 0x2ca   : > { %v1651_v63 = vpop.permute.xlu0 %1650  ;;  %3974 = vmatprep.subr.msk.mxu0 %vm596_vm13, %v661_v28  ;;  %v6690_v28 = vld [vmem:[#allocation8_spill] sm:$0xff] }
 0x2cb   : > { %v1655_v31 = vsel %vm6489_vm12, %v4707_v41, %v1651_v63  ;;  %3975 = vmatpush1.msk.msra.mxu0 %vm595_vm14, %v660_v50  ;;  %v1656_v9 = vsel %vm6489_vm12, %v1651_v63, %v4421_v35  ;;  %vm6492_vm12 = vcmask 941056   ;;  %v6691_v50 = vld [vmem:[#allocation14_spill] sm:$0xff] }
 0x2cc   : > { %1844 = vmatprep.subr.mxu0 %v1320_v2  ;;  %4002 = vmatprep.subr.msk.mxu1 %vm628_vm5, %v1656_v9  ;;  %v6692_v2 = vld [vmem:[#allocation35_spill] sm:$0xff] }
 0x2cd   : > { %1845 = vmatpush2.msra.mxu0 %v1319_v29  ;;  %4003 = vmatpush1.msk.msra.mxu1 %vm627_vm6, %v1655_v31  ;;  %v6693_v29 = vld [vmem:[#allocation15_spill] sm:$0xff] }
 0x2ce   : > { %v1294_v41 = vpop.permute.xlu0 %1293 }
 0x2cf   : > { %v1298_v45 = vsel %vm6488_vm2, %v4697_v47, %v1294_v41  ;;  %v1299_v34 = vsel %vm6488_vm2, %v1294_v41, %v4423_v37  ;;  %vm6491_vm2 = vcmask 654336  }
 0x2d0   : > { %3976 = vmatprep.subr.msk.mxu0 %vm608_vm15, %v1299_v34  ;;  %v6694_v34 = vld [vmem:[#allocation17_spill] sm:$0xff] }
 0x2d1   : > { %3977 = vmatpush2.msk.msra.mxu0 %vm607_vm7, %v1298_v45 }
 0x2d2   : > { %v1630_v0 = vpop.permute.xlu0 %1629 }
 0x2d3   : > { %v1634_v35 = vsel %vm6500_vm4, %v4715_v48, %v1630_v0  ;;  %v1635_v16 = vsel %vm6500_vm4, %v1630_v0, %v4429_v49  ;;  %vm6504_vm4 = vcmask 7168  }
 0x2d4   : > { %4004 = vmatprep.subr.msk.mxu1 %vm622_vm8, %v1635_v16 }
 0x2d5   : > { %4005 = vmatpush1.msk.msra.mxu1 %vm621_vm9, %v1634_v35  ;;  %v6695_v35 = vld [vmem:[#allocation37_spill] sm:$0xff] }
 0x2d6   : > { %v1273_v37 = vpop.permute.xlu0 %1272 }
 0x2d7   : > { %v1277_v47 = vsel %vm6490_vm1, %v4705_v43, %v1273_v37  ;;  %v1278_v57 = vsel %vm6490_vm1, %v1273_v37, %v4447_v3  ;;  %vm6493_vm1 = vcmask 662528  }
 0x2d8   : > { %3978 = vmatprep.subr.msk.mxu0 %vm6509_vm10, %v1278_v57 }
 0x2d9   : > { %3979 = vmatpush2.msk.msra.mxu0 %vm601_vm11, %v1277_v47  ;;  %v6696_v47 = vld [vmem:[#allocation40_spill] sm:$0xff] }
 0x2da   : > { %v1609_v49 = vpop.permute.xlu0 %1608 }
 0x2db   : > { %v1614_v48 = vsel %vm6491_vm2, %v1609_v49, %v4457_v6  ;;  %v1613_v32 = vsel %vm6491_vm2, %v4723_v46, %v1609_v49  ;;  %v1483_v6 = vpop.permute.xlu1 %1482  ;;  %vm6494_vm2 = vcmask 1022976   ;;  %v6697_v49 = vld [vmem:[#allocation19_spill] sm:$0xff] }
 0x2dc   : > { %1887 = vmatprep.subr.mxu1 %v1614_v48 }
 0x2dd   : > { %1888 = vmatpush1.msra.mxu1 %v1613_v32  ;;  %v6698_v32 = vld [vmem:[#allocation16_spill] sm:$0xff] }
 0x2de   : > { %v1252_v43 = vpop.permute.xlu0 %1251 }
 0x2df   : > { %v1256_v3 = vsel %vm6492_vm12, %v4713_v51, %v1252_v43  ;;  %v1257_v13 = vsel %vm6492_vm12, %v1252_v43, %v4467_v7  ;;  %v1462_v17 = vpop.permute.xlu1 %1461  ;;  %vm6495_vm12 = vcmask 670720   ;;  %v1166_v43 = vsel %vm6504_vm4, %v6698_v32, %v6696_v47 }
 0x2e0   : > { %3980 = vmatprep.subr.msk.mxu0 %vm596_vm13, %v1257_v13 }
 0x2e1   : > { %3981 = vmatpush2.msk.msra.mxu0 %vm595_vm14, %v1256_v3  ;;  %v6699_v3 = vld [vmem:[#allocation39_spill] sm:$0xff] }
 0x2e2   : > { %v1588_v54 = vpop.permute.xlu0 %1587 }
 0x2e3   : > { %v1592_v46 = vsel %vm6493_vm1, %v4731_v36, %v1588_v54  ;;  %v1593_v53 = vsel %vm6493_vm1, %v1588_v54, %v4473_v8  ;;  %v6681_v36 = vld [vmem:[#allocation34_spill] sm:$0xff]  ;;  %vm6496_vm1 = vcmask 1031168  }
 0x2e4   : > { %4006 = vmatprep.subr.msk.mxu1 %vm608_vm15, %v1593_v53 }
 0x2e5   : > { %4007 = vmatpush1.msk.msra.mxu1 %vm607_vm7, %v1592_v46  ;;  %v6701_v46 = vld [vmem:[#allocation41_spill] sm:$0xff] }
 0x2e6   : > { %v1231_v7 = vpop.permute.xlu0 %1230 }
 0x2e7   : > { %v1235_v51 = vsel %vm6494_vm2, %v4721_v39, %v1231_v7  ;;  %v1236_v21 = vsel %vm6494_vm2, %v1231_v7, %v4485_v10  ;;  %v1441_v10 = vpop.permute.xlu1 %1440  ;;  %vm6498_vm2 = vcmask 678912  }
 0x2e8   : > { %3982 = vmatprep.subr.msk.mxu0 %vm634_vm0, %v1236_v21  ;;  %v6702_v21 = vld [vmem:[#allocation42_spill] sm:$0xff] }
 0x2e9   : > { %3983 = vmatpush2.msk.msra.mxu0 %vm6501_vm3, %v1235_v51 }
 0x2ea   : > { %v1567_v8 = vpop.permute.xlu0 %1566 }
 0x2eb   : > { %v1571_v59 = vsel %vm6495_vm12, %v6681_v36, %v1567_v8  ;;  %v1572_v20 = vsel %vm6495_vm12, %v1567_v8, %v6682_v15  ;;  %v1420_v12 = vpop.permute.xlu1 %1419  ;;  %vm6497_vm12 = vcmask 1039360  }
 0x2ec   : > { %4008 = vmatprep.subr.msk.mxu1 %vm6509_vm10, %v1572_v20  ;;  %v6707_v20 = vld [vmem:[#allocation43_spill] sm:$0xff] }
 0x2ed   : > { %4009 = vmatpush1.msk.msra.mxu1 %vm601_vm11, %v1571_v59  ;;  %v6705_v59 = vld [vmem:[#allocation18_spill] sm:$0xff] }
 0x2ee   : > { %v1210_v39 = vpop.permute.xlu0 %1209 }
 0x2ef   : > { %v1214_v18 = vsel %vm6496_vm1, %v6683_v56, %v1210_v39  ;;  %v1215_v55 = vsel %vm6496_vm1, %v1210_v39, %v6684_v61  ;;  %vm6499_vm1 = vcmask 760832   ;;  %v1399_v52 = vpop.permute.xlu1 %1398  ;;  %v6708_v39 = vld [vmem:[#allocation25_spill] sm:$0xff] }
 0x2f0   : > { %3984 = vmatprep.subr.msk.mxu0 %vm628_vm5, %v1215_v55 }
 0x2f1   : > { %3985 = vmatpush2.msk.msra.mxu0 %vm627_vm6, %v1214_v18  ;;  %v6709_v18 = vld [vmem:[#allocation45_spill] sm:$0xff] }
 0x2f2   : > { %v1546_v14 = vpop.permute.xlu0 %1545 }
 0x2f3   : > { %v1550_v58 = vsel %vm6498_vm2, %v6685_v22, %v1546_v14  ;;  %v1551_v1 = vsel %vm6498_vm2, %v1546_v14, %v6686_v19  ;;  %vm6503_vm2 = vcmask 777216   ;;  %v1378_v45 = vpop.permute.xlu1 %1377  ;;  %v6710_v14 = vld [vmem:[#allocation44_spill] sm:$0xff] }
 0x2f4   : > { %4010 = vmatprep.subr.msk.mxu1 %vm596_vm13, %v1551_v1  ;;  %v1488_v0 = vsel %vm6503_vm2, %v1483_v6, %v6694_v34  ;;  %v1487_v16 = vsel %vm6503_vm2, %v6695_v35, %v1483_v6  ;;  %v6700_v6 = vld [vmem:[#allocation21_spill] sm:$0xff]  ;;  %vm6508_vm2 = vcmask 809984   ;;  %v6712_v1 = vld [vmem:[#allocation20_spill] sm:$0xff] }
 0x2f5   : > { %4011 = vmatpush1.msk.msra.mxu1 %vm595_vm14, %v1550_v58  ;;  %v1404_v56 = vsel %vm6508_vm2, %v1399_v52, %v6708_v39  ;;  %v1403_v61 = vsel %vm6508_vm2, %v6709_v18, %v1399_v52  ;;  %v6711_v58 = vld [vmem:[#allocation27_spill] sm:$0xff]  ;;  %vm6511_vm2 = vcmask 105472   ;;  %v6716_v52 = vld [vmem:[#allocation49_spill] sm:$0xff] }
 0x2f6   : > { %v1189_v11 = vpop.permute.xlu0 %1188 }
 0x2f7   : > { %v1193_v60 = vsel %vm6497_vm12, %v6687_v24, %v1189_v11  ;;  %v1194_v4 = vsel %vm6497_vm12, %v1189_v11, %v6688_v26  ;;  %vm6502_vm12 = vcmask 769024   ;;  %v1357_v7 = vpop.permute.xlu1 %1356  ;;  %v6713_v11 = vld [vmem:[#allocation47_spill] sm:$0xff]  ;;  %v6715_v26 = vld [vmem:[#allocation29_spill] sm:$0xff] }
 0x2f8   : > { %3986 = vmatprep.subr.msk.mxu0 %vm622_vm8, %v1194_v4 }
 0x2f9   : > { %3987 = vmatpush2.msk.msra.mxu0 %vm621_vm9, %v1193_v60 }
 0x2fa   : > { %v1525_v42 = vpop.permute.xlu0 %1524  ;;  %1858 = vmatprep.subr.mxu0 %v4451_v5 }
 0x2fb   : > { %v1529_v27 = vsel %vm6499_vm1, %v6689_v33, %v1525_v42  ;;  %1859 = vmatpush2.msra.mxu0 %v6690_v28  ;;  %v1530_v63 = vsel %vm6499_vm1, %v1525_v42, %v6691_v50  ;;  %vm6505_vm1 = vcmask 785408   ;;  %v1336_v60 = vpop.permute.xlu1 %1335 }
 0x2fc   : > { %4012 = vmatprep.subr.msk.mxu1 %vm634_vm0, %v1530_v63  ;;  %v1467_v48 = vsel %vm6505_vm1, %v1462_v17, %v6697_v49  ;;  %v1466_v13 = vsel %vm6505_vm1, %v6699_v3, %v1462_v17  ;;  %v6704_v17 = vld [vmem:[#allocation23_spill] sm:$0xff] }
 0x2fd   : > { %4013 = vmatpush1.msk.msra.mxu1 %vm6501_vm3, %v1529_v27  ;;  %vm6506_vm3 = vcmask 793600   ;;  %v6717_v27 = vld [vmem:[#allocation46_spill] sm:$0xff]  ;;  %v6718_v63 = vld [vmem:[#allocation31_spill] sm:$0xff] }
 0x2fe   : > { %v1504_v31 = vpop.permute.xlu0 %1503  ;;  %v1446_v54 = vsel %vm6506_vm3, %v1441_v10, %v6700_v6  ;;  %v1445_v53 = vsel %vm6506_vm3, %v6701_v46, %v1441_v10  ;;  %vm1381_vm3 = vcmask 891904  }
 0x2ff   : > { %v1508_v9 = vsel %vm6502_vm12, %v6692_v2, %v1504_v31  ;;  %v1509_v41 = vsel %vm6502_vm12, %v1504_v31, %v6693_v29  ;;  %vm6507_vm12 = vcmask 801792   ;;  %v1383_v19 = vsel %vm1381_vm3, %v1378_v45, %v6711_v58  ;;  %v6719_v2 = vld [vmem:[#allocation22_spill] sm:$0xff] }
 0x300   : > { %4014 = vmatprep.subr.msk.mxu1 %vm628_vm5, %v1509_v41  ;;  %v1425_v36 = vsel %vm6507_vm12, %v1420_v12, %v6704_v17  ;;  %v1424_v10 = vsel %vm6507_vm12, %v6707_v20, %v1420_v12  ;;  %v1382_v24 = vsel %vm1381_vm3, %v6713_v11, %v1378_v45  ;;  %vm6557_vm12 = vcmask 908288   ;;  %v6721_v45 = vld [vmem:[#allocation48_spill] sm:$0xff] }
 0x301   : > { %4015 = vmatpush1.msk.msra.mxu1 %vm627_vm6, %v1508_v9  ;;  %v1341_v31 = vsel %vm6557_vm12, %v1336_v60, %v6718_v63  ;;  %v1104_v9 = vsel %vm6511_vm2, %v6719_v2, %v6717_v27  ;;  %v1340_v29 = vsel %vm6557_vm12, %v4801_v25, %v1336_v60  ;;  %vm6817_vm12 = vcmask 1041408  }
 0x302   : > { %v1164_v37 = vpop.permute.xlu0 %1163  ;;  %4016 = vmatprep.subr.msk.mxu1 %vm622_vm8, %v1488_v0  ;;  %v6722_v0 = vld [vmem:[#allocation24_spill] sm:$0xff] }
 0x303   : > { %v1167_v57 = vsel %vm6504_vm4, %v6696_v47, %v1164_v37  ;;  %4017 = vmatpush1.msk.msra.mxu1 %vm621_vm9, %v1487_v16  ;;  %vm6703_vm4 = vcmask 15360   ;;  %v6723_v16 = vld [vmem:[#allocation50_spill] sm:$0xff] }
 0x304   : > { %3988 = vmatprep.subr.msk.mxu0 %vm608_vm15, %v1167_v57  ;;  %1901 = vmatprep.subr.mxu1 %v1467_v48  ;;  %vm6706_vm1 = vmmov %vm6703_vm4  ;;  %v6724_v47 = vld [vmem:[#allocation26_spill] sm:$0xff]  ;;  %v1672_v48 = vpop.permute.xlu1 %1671 }
 0x305   : > { %3989 = vmatpush2.msk.msra.mxu0 %vm607_vm7, %v1166_v43  ;;  %1902 = vmatpush1.msra.mxu1 %v1466_v13  ;;  %v1145_v15 = vsel %vm6706_vm1, %v6705_v59, %v6702_v21  ;;  %vm1360_vm1 = vcmask 900096   ;;  %v6725_v43 = vld [vmem:[#allocation28_spill] sm:$0xff] }
 0x306   : > { %v1144_v51 = vpop.permute.xlu0 %1143  ;;  %4018 = vmatprep.subr.msk.mxu1 %vm608_vm15, %v1446_v54  ;;  %v1362_v4 = vsel %vm1360_vm1, %v1357_v7, %v6715_v26  ;;  %v1361_v42 = vsel %vm1360_vm1, %v6716_v52, %v1357_v7  ;;  %v6726_v54 = vld [vmem:[#allocation30_spill] sm:$0xff] }
 0x307   : > { %v1146_v8 = vsel %vm6703_vm4, %v6702_v21, %v1144_v51  ;;  %4019 = vmatpush1.msk.msra.mxu1 %vm607_vm7, %v1445_v53  ;;  %vm6510_vm4 = vcmask 23552  }
 0x308   : > { %3990 = vmatprep.subr.msk.mxu0 %vm6509_vm10, %v1146_v8  ;;  %4020 = vmatprep.subr.msk.mxu1 %vm6509_vm10, %v1425_v36  ;;  %v1125_v12 = vsel %vm6510_vm4, %v6712_v1, %v6710_v14  ;;  %vm6714_vm10 = vcmp.lt.s32.totalorder %v4816_v38, 13  ;;  %v1670_v53 = vpop.permute.xlu1 %1669 }
 0x309   : > { %3991 = vmatpush2.msk.msra.mxu0 %vm601_vm11, %v1145_v15  ;;  %4021 = vmatpush1.msk.msra.mxu1 %vm601_vm11, %v1424_v10 }
 0x30a   : > { %v1123_v55 = vpop.permute.xlu0 %1122  ;;  %4022 = vmatprep.subr.msk.mxu1 %vm596_vm13, %v1404_v56 }
 0x30b   : > { %v1126_v22 = vsel %vm6510_vm4, %v6710_v14, %v1123_v55  ;;  %4023 = vmatpush1.msk.msra.mxu1 %vm595_vm14, %v1403_v61  ;;  %vm6720_vm4 = vcmp.lt.s32.totalorder %v4816_v38, 13 }
 0x30c   : > { %3992 = vmatprep.subr.msk.mxu0 %vm596_vm13, %v1126_v22  ;;  %4024 = vmatprep.subr.msk.mxu1 %vm634_vm0, %v1383_v19 }
 0x30d   : > { %3993 = vmatpush2.msk.msra.mxu0 %vm595_vm14, %v1125_v12  ;;  %4025 = vmatpush1.msk.msra.mxu1 %vm6714_vm10, %v1382_v24  ;;  %vm6512_vm10 = vcmask 113664  }
 0x30e   : > { %v1102_v33 = vpop.permute.xlu0 %1101  ;;  %4026 = vmatprep.subr.msk.mxu1 %vm628_vm5, %v1362_v4  ;;  %v1083_v25 = vsel %vm6512_vm10, %v6722_v0, %v6721_v45 }
 0x30f   : > { %v1105_v50 = vsel %vm6511_vm2, %v6717_v27, %v1102_v33  ;;  %4027 = vmatpush1.msk.msra.mxu1 %vm627_vm6, %v1361_v42  ;;  %vm6513_vm2 = vcmask 121856  }
 0x310   : > { %3994 = vmatprep.subr.msk.mxu0 %vm634_vm0, %v1105_v50  ;;  %4028 = vmatprep.subr.msk.mxu1 %vm622_vm8, %v1341_v31  ;;  %v1062_v57 = vsel %vm6513_vm2, %v6724_v47, %v6723_v16 }
 0x311   : > { %3995 = vmatpush2.msk.msra.mxu0 %vm6720_vm4, %v1104_v9  ;;  %4029 = vmatpush1.msk.msra.mxu1 %vm621_vm9, %v1340_v29  ;;  %vm6556_vm4 = vcmask 130048  }
 0x312   : > { %v1081_v41 = vpop.permute.xlu0 %1080  ;;  %v1041_v3 = vsel %vm6556_vm4, %v6725_v43, %v4803_v44 }
 0x313   : > { %v1084_v34 = vsel %vm6512_vm10, %v6721_v45, %v1081_v41  ;;  %vm6514_vm10 = vcmask 138240  }
 0x314   : > { %3996 = vmatprep.subr.msk.mxu0 %vm628_vm5, %v1084_v34  ;;  %v1020_v46 = vsel %vm6514_vm10, %v6726_v54, %v4814_v40 }
 0x315   : > { %3997 = vmatpush2.msk.msra.mxu0 %vm627_vm6, %v1083_v25 }
 0x316   : > { %v1060_v35 = vpop.permute.xlu0 %1059 }
 0x317   : > { %v1063_v37 = vsel %vm6513_vm2, %v6723_v16, %v1060_v35  ;;  %vm1675_vm2 = vcmask 629760  }
 0x318   : > { %3998 = vmatprep.subr.msk.mxu0 %vm622_vm8, %v1063_v37  ;;  %v1676_v21 = vsel %vm1675_vm2, %v1670_v53, %v1672_v48 }
 0x319   : > { %3999 = vmatpush2.msk.msra.mxu0 %vm621_vm9, %v1062_v57 }
 0x31a   : > { %v1039_v49 = vpop.permute.xlu0 %1038 }
 0x31b   : > { %v1042_v32 = vsel %vm6556_vm4, %v4803_v44, %v1039_v49  ;;  %v6727_v44 = vld [vmem:[#allocation51_spill] sm:$0xff] }
 0x31c   : > { %1872 = vmatprep.subr.mxu0 %v1042_v32 }
 0x31d   : > { %1873 = vmatpush2.msra.mxu0 %v1041_v3 }
 0x31e   : > { %v1018_v13 = vpop.permute.xlu0 %1017 }
 0x31f   : > { %v1021_v6 = vsel %vm6514_vm10, %v4814_v40, %v1018_v13  ;;  %vm6728_vm10 = vcmp.lt.s32.totalorder %v4816_v38, 13  ;;  %v4158_v40 = vld [vmem:[#allocation4] sm:$0xff] }
 0x320   : > { %4000 = vmatprep.subr.msk.mxu0 %vm608_vm15, %v1021_v6 }
 0x321   : > { %4001 = vmatpush2.msk.msra.mxu0 %vm607_vm7, %v1020_v46 }
 0x322   : > { %v1674_v7 = vpop.permute.xlu0 %1673  ;;  %1877 = vmatmul.mubr.f32.vlgmr.msra.gmra.mxu0 %v6727_v44 }
 0x323   : > { %v1677_v51 = vsel %vm1675_vm2, %v1672_v48, %v1674_v7 }
 0x324   : > { %4030 = vmatprep.subr.msk.mxu1 %vm634_vm0, %v1677_v51 }
 0x325   : > { %4031 = vmatpush2.msk.msra.mxu1 %vm6728_vm10, %v1676_v21  ;;  %vm6792_vm10 = vcmask 646144  }
 0x326   : > { %1948 = vmatmul.mubr.f32.vlgmr.msra.gmra.mxu1 %v4806_v62  ;;  %vm6793_vm4 = vmmov %vm6792_vm10 }
 0x327   : > { %3843 = vmatprep.mubr.f32.mxu1 %v4158_v40 }
 0x32f   : > { %v1787_v17 = vpop.permute.xlu0 %1786 }
 0x3e2   : > { %v1878_v8 = vpop.f32.mrf.mxu0 }
 0x3e3   : > { %v1879_v59 = vadd.f32 %v1878_v8, %v1787_v17 }
 0x3e4   : > { %v1880_v36 = vpop.f32.mrf.mxu0 }
 0x3e5   : > { %v1881_v20 = vadd.f32 %v1880_v36, %v1787_v17 }
 0x3e6   : > { %v1949_v15 = vpop.f32.mrf.mxu1 }
 0x3e7   : > { %v1950_v10 = vadd.f32 %v1949_v15, %v1879_v59 }
 0x3e8   : > { %v1951_v39 = vpop.f32.mrf.mxu1 }
 0x3e9   : > { %v1952_v56 = vadd.f32 %v1951_v39, %v1881_v20  ;;  %v1954_v18 = vmax.f32 %v1950_v10, 0.0 }
 0x3eb   : > { %v1955_v61 = vmax.f32 %v1952_v56, 0.0 }
 0x3ed   : > { %v1959_v55 = vcombine.low %v1954_v18, %v1955_v61 }
 0x3ef   : > { %3937 = vst.sshfl [vmem:[#allocation4 + $0x2] sm:$0x33 pattern:$0x76325410] %v1959_v55 }
 0x3f6   : > { %v5226_v14 = vld [vmem:[#allocation4 + $0x2] sm:$0x3f] }
 0x3f7   : > { %v5228_v22 = vld [vmem:[#allocation4 + $0x2] sm:$0x3f]  ;;  %v5232_v62 = vrot.slane %v5226_v14, %v4783_v30 }
 0x3f8   : > { %v5236_v58 = vrot.slane %v5228_v22, %v4783_v30  ;;  %v5238_v19 = vld [vmem:[#allocation4 + $0x2] sm:$0x3f] }
 0x3f9   : > { %v5240_v1 = vld [vmem:[#allocation4 + $0x2] sm:$0x3f]  ;;  %3685 = vrot.lane.b32.xlu0 %v5232_v62, %s6584_s28  ;;  %v5248_v12 = vrot.slane %v5238_v19, %v4783_v30 }
 0x3fa   : > { %3647 = vrot.lane.b32.xlu1 %v5236_v58, %s6587_s26  ;;  %v5252_v11 = vrot.slane %v5240_v1, %v4783_v30  ;;  %v5254_v24 = vld [vmem:[#allocation4 + $0x2] sm:$0x3f] }
 0x3fb   : > { %v5256_v60 = vld [vmem:[#allocation4 + $0x2] sm:$0x3f]  ;;  %v5264_v26 = vrot.slane %v5254_v24, %v4783_v30 }
 0x3fc   : > { %v5268_v4 = vrot.slane %v5256_v60, %v4783_v30  ;;  %v5270_v52 = vld [vmem:[#allocation4 + $0x2] sm:$0x3f] }
 0x3fd   : > { %3609 = vrot.lane.b32.xlu0 %v5252_v11, %s6590_s24  ;;  %v5272_v42 = vld [vmem:[#allocation4 + $0x2] sm:$0x3f]  ;;  %v5280_v33 = vrot.slane %v5270_v52, %v4783_v30 }
 0x3fe   : > { %3723 = vrot.lane.b32.xlu1 %v5248_v12, %s6678_s8  ;;  %v5284_v27 = vrot.slane %v5272_v42, %v4783_v30  ;;  %v5286_v50 = vld [vmem:[#allocation4 + $0x2] sm:$0x3f] }
 0x3ff   : > { %v5288_v63 = vld [vmem:[#allocation4 + $0x2] sm:$0x3f]  ;;  %v5296_v2 = vrot.slane %v5286_v50, %v4783_v30 }
 0x400   : > { %v3938_v31 = vld.sshfl [vmem:[#allocation4 + $0x2] sm:$0x33 pattern:$0x76325410]  ;;  %v5300_v9 = vrot.slane %v5288_v63, %v4783_v30 }
 0x401   : > { %3501 = vrot.lane.b32.xlu0 %v5264_v26, %s6598_s18  ;;  %2859 = vst [vmem:[#allocation5 + $0x88] sm:$0x3] %v3938_v31  ;;  %v5302_v29 = vld [vmem:[#allocation4 + $0x2] sm:$0x3f]  ;;  %v2854_v56 = vcombine.high %v3938_v31, %v3938_v31 }
 0x402   : > { %3463 = vrot.lane.b32.xlu1 %v5268_v4, %s6600_s29  ;;  %v5304_v41 = vld [vmem:[#allocation4 + $0x2] sm:$0x3f]  ;;  %v5312_v45 = vrot.slane %v5302_v29, %v4783_v30 }
 0x403   : > { %v5316_v34 = vrot.slane %v5304_v41, %v4783_v30  ;;  %v5318_v0 = vld [vmem:[#allocation4 + $0x2] sm:$0x3f]  ;;  %2860 = vst [vmem:[#allocation5 + $0x70] sm:$0x3] %v2854_v56 }
 0x404   : > { %v5320_v25 = vld [vmem:[#allocation4 + $0x2] sm:$0x3f]  ;;  %v5328_v35 = vrot.slane %v5318_v0, %v4783_v30 }
 0x405   : > { %3577 = vrot.lane.b32.xlu0 %v5280_v33, %s6592_s20  ;;  %v5332_v16 = vrot.slane %v5320_v25, %v4783_v30  ;;  %v5334_v37 = vld [vmem:[#allocation4 + $0x2] sm:$0x3f] }
 0x406   : > { %3539 = vrot.lane.b32.xlu1 %v5284_v27, %s6595_s15  ;;  %v5336_v47 = vld [vmem:[#allocation4 + $0x2] sm:$0x3f]  ;;  %v5344_v57 = vrot.slane %v5334_v37, %v4783_v30 }
 0x407   : > { %v5348_v49 = vrot.slane %v5336_v47, %v4783_v30  ;;  %v5350_v48 = vld [vmem:[#allocation4 + $0x2] sm:$0x3f] }
 0x408   : > { %v5352_v32 = vld [vmem:[#allocation4 + $0x2] sm:$0x3f]  ;;  %v5360_v43 = vrot.slane %v5350_v48, %v4783_v30 }
 0x409   : > { %3393 = vrot.lane.b32.xlu0 %v5296_v2, %s6599_s12  ;;  %v5364_v3 = vrot.slane %v5352_v32, %v4783_v30  ;;  %v5366_v13 = vld [vmem:[#allocation4 + $0x2] sm:$0x3f] }
 0x40a   : > { %3317 = vrot.lane.b32.xlu1 %v5300_v9, %s6606_s2  ;;  %v5368_v6 = vld [vmem:[#allocation4 + $0x2] sm:$0x3f]  ;;  %v5376_v54 = vrot.slane %v5366_v13, %v4783_v30 }
 0x40b   : > { %v5380_v46 = vrot.slane %v5368_v6, %v4783_v30  ;;  %v5382_v53 = vld [vmem:[#allocation4 + $0x2] sm:$0x3f] }
 0x40c   : > { %v5384_v7 = vld [vmem:[#allocation4 + $0x2] sm:$0x3f]  ;;  %v5392_v44 = vrot.slane %v5382_v53, %v4783_v30 }
 0x40d   : > { %3355 = vrot.lane.b32.xlu0 %v5312_v45, %s6602_s0  ;;  %v5396_v51 = vrot.slane %v5384_v7, %v4783_v30  ;;  %v5398_v21 = vld [vmem:[#allocation4 + $0x2] sm:$0x3f] }
 0x40e   : > { %3431 = vrot.lane.b32.xlu1 %v5316_v34, %s6655_s14  ;;  %v5400_v40 = vld [vmem:[#allocation4 + $0x2] sm:$0x3f]  ;;  %v5408_v8 = vrot.slane %v5398_v21, %v4783_v30 }
 0x40f   : > { %v5412_v17 = vrot.slane %v5400_v40, %v4783_v30  ;;  %v5414_v36 = vld [vmem:[#allocation4] sm:$0x3f] }
 0x410   : > { %v5416_v59 = vld [vmem:[#allocation4] sm:$0x3f]  ;;  %v5424_v15 = vrot.slane %v5414_v36, %v4783_v30 }
 0x411   : > { %3209 = vrot.lane.b32.xlu0 %v5328_v35, %s6616_s7  ;;  %v5428_v20 = vrot.slane %v5416_v59, %v4783_v30  ;;  %v5430_v10 = vld [vmem:[#allocation4] sm:$0x3f] }
 0x412   : > { %3171 = vrot.lane.b32.xlu1 %v5332_v16, %s6618_s6  ;;  %v5432_v39 = vld [vmem:[#allocation4] sm:$0x3f]  ;;  %v5440_v18 = vrot.slane %v5430_v10, %v4783_v30 }
 0x413   : > { %v5444_v61 = vrot.slane %v5432_v39, %v4783_v30  ;;  %v5446_v55 = vld [vmem:[#allocation4] sm:$0x3f] }
 0x414   : > { %6730 = vst [vmem:[#allocation10_spill] sm:$0xff] %v5446_v55  ;;  %v5448_v5 = vld [vmem:[#allocation4] sm:$0x3f]  ;;  %v5456_v31 = vrot.slane %v5446_v55, %v4783_v30 }
 0x415   : > { %3285 = vrot.lane.b32.xlu0 %v5344_v57, %s6608_s4  ;;  %6729 = vst [vmem:[#allocation34_spill] sm:$0xff] %v5444_v61  ;;  %6731 = vst [vmem:[#allocation32_spill] sm:$0xff] %v5448_v5  ;;  %v5460_v56 = vrot.slane %v5448_v5, %v4783_v30  ;;  %v5462_v28 = vld [vmem:[#allocation4] sm:$0x3f] }
 0x416   : > { %3247 = vrot.lane.b32.xlu1 %v5348_v49, %s6612_s9  ;;  %6732 = vst [vmem:[#allocation11_spill] sm:$0xff] %v5456_v31  ;;  %6734 = vst [vmem:[#allocation12_spill] sm:$0xff] %v5462_v28  ;;  %v5464_v23 = vld [vmem:[#allocation4] sm:$0x3f]  ;;  %v5472_v38 = vrot.slane %v5462_v28, %v4783_v30 }
 0x417   : > { %6733 = vst [vmem:[#allocation36_spill] sm:$0xff] %v5460_v56  ;;  %6735 = vst [vmem:[#allocation33_spill] sm:$0xff] %v5464_v23  ;;  %v5476_v55 = vrot.slane %v5464_v23, %v4783_v30  ;;  %v5478_v5 = vld [vmem:[#allocation4] sm:$0x3f] }
 0x418   : > { %6738 = vst [vmem:[#allocation13_spill] sm:$0xff] %v5472_v38  ;;  %6740 = vst [vmem:[#allocation14_spill] sm:$0xff] %v5478_v5  ;;  %v5494_v23 = vld [vmem:[#allocation4] sm:$0x3f] }
 0x419   : > { %3063 = vrot.lane.b32.xlu0 %v5360_v43, %s6581_s17  ;;  %6739 = vst [vmem:[#allocation38_spill] sm:$0xff] %v5476_v55  ;;  %6746 = vst [vmem:[#allocation37_spill] sm:$0xff] %v5494_v23 }
 0x41a   : > { %3025 = vrot.lane.b32.xlu1 %v5364_v3, %s6583_s27 }
 0x41d   : > { %3101 = vrot.lane.b32.xlu0 %v5376_v54, %s6578_s19 }
 0x41e   : > { %3139 = vrot.lane.b32.xlu1 %v5380_v46, %s6622_s10 }
 0x421   : > { %2917 = vrot.lane.b32.xlu0 %v5392_v44, %s6591_s22 }
 0x422   : > { %2879 = vrot.lane.b32.xlu1 %v5396_v51, %s6594_s21 }
 0x425   : > { %2993 = vrot.lane.b32.xlu0 %v5408_v8, %s6586_s25 }
 0x426   : > { %2955 = vrot.lane.b32.xlu1 %v5412_v17, %s6589_s23 }
 0x429   : > { %2787 = vrot.lane.b32.xlu0 %v5424_v15, %s6661_s11 }
 0x42a   : > { %2749 = vrot.lane.b32.xlu1 %v5428_v20, %s6664_s30 }
 0x42d   : > { %2641 = vrot.lane.b32.xlu0 %v5444_v61, %s6673_s3  ;;  %v5480_v61 = vld [vmem:[#allocation4] sm:$0x3f]  ;;  %s6743_s3 = smov 29  }
 0x42e   : > { %2825 = vrot.lane.b32.xlu1 %v5440_v18, %s6658_s13  ;;  %6741 = vst [vmem:[#allocation35_spill] sm:$0xff] %v5480_v61  ;;  %v5492_v28 = vrot.slane %v5480_v61, %v4783_v30  ;;  %v5510_v61 = vld [vmem:[#allocation4] sm:$0x3f] }
 0x42f   : > { %6752 = vst [vmem:[#allocation39_spill] sm:$0xff] %v5510_v61 }
 0x430   : > { %6745 = vst [vmem:[#allocation17_spill] sm:$0xff] %v5492_v28 }
 0x431   : > { %2717 = vrot.lane.b32.xlu0 %v5460_v56, %s6737_s16  ;;  %v5488_v56 = vrot.slane %v5478_v5, %v4783_v30  ;;  %s6748_s16 = smov 19  }
 0x432   : > { %2679 = vrot.lane.b32.xlu1 %v5456_v31, %s6736_s1  ;;  %v5496_v31 = vld [vmem:[#allocation4] sm:$0x3f]  ;;  %s6749_s1 = smov 18  }
 0x433   : > { %6744 = vst [vmem:[#allocation15_spill] sm:$0xff] %v5488_v56  ;;  %6747 = vst [vmem:[#allocation40_spill] sm:$0xff] %v5496_v31  ;;  %v5508_v5 = vrot.slane %v5496_v31, %v4783_v30  ;;  %v5526_v31 = vld [vmem:[#allocation4] sm:$0x3f] }
 0x434   : > { %6758 = vst [vmem:[#allocation23_spill] sm:$0xff] %v5526_v31 }
 0x435   : > { %2457 = vrot.lane.b32.xlu0 %v5476_v55, %s6743_s3  ;;  %v5504_v55 = vrot.slane %v5494_v23, %v4783_v30  ;;  %6751 = vst [vmem:[#allocation16_spill] sm:$0xff] %v5508_v5  ;;  %s6754_s3 = smov 17  }
 0x436   : > { %2603 = vrot.lane.b32.xlu1 %v5472_v38, %s6742_s5  ;;  %v5512_v38 = vld [vmem:[#allocation4] sm:$0x3f]  ;;  %s6755_s5 = smov 33  }
 0x437   : > { %6750 = vst [vmem:[#allocation19_spill] sm:$0xff] %v5504_v55  ;;  %6753 = vst [vmem:[#allocation21_spill] sm:$0xff] %v5512_v38  ;;  %v5524_v23 = vrot.slane %v5512_v38, %v4783_v30  ;;  %v5542_v38 = vld [vmem:[#allocation4] sm:$0x3f] }
 0x438   : > { %6764 = vst [vmem:[#allocation45_spill] sm:$0xff] %v5542_v38 }
 0x439   : > { %2533 = vrot.lane.b32.xlu0 %v5492_v28, %s6749_s1  ;;  %v5520_v28 = vrot.slane %v5510_v61, %v4783_v30  ;;  %6757 = vst [vmem:[#allocation42_spill] sm:$0xff] %v5524_v23  ;;  %s6760_s1 = smov 31  }
 0x43a   : > { %2495 = vrot.lane.b32.xlu1 %v5488_v56, %s6748_s16  ;;  %v5528_v56 = vld [vmem:[#allocation4] sm:$0x3f]  ;;  %s6761_s16 = smov 30  }
 0x43b   : > { %6756 = vst [vmem:[#allocation41_spill] sm:$0xff] %v5520_v28  ;;  %6759 = vst [vmem:[#allocation18_spill] sm:$0xff] %v5528_v56  ;;  %v5540_v61 = vrot.slane %v5528_v56, %v4783_v30  ;;  %v5558_v56 = vld [vmem:[#allocation4] sm:$0x3f] }
 0x43c   : > { %6769 = vst [vmem:[#allocation20_spill] sm:$0xff] %v5558_v56 }
 0x43d   : > { %2311 = vrot.lane.b32.xlu0 %v5508_v5, %s6755_s5  ;;  %v5536_v5 = vrot.slane %v5526_v31, %v4783_v30  ;;  %6763 = vst [vmem:[#allocation25_spill] sm:$0xff] %v5540_v61  ;;  %s6766_s5 = smov 32  }
 0x43e   : > { %2571 = vrot.lane.b32.xlu1 %v5504_v55, %s6754_s3  ;;  %v5544_v55 = vld [vmem:[#allocation4] sm:$0x3f]  ;;  %s6767_s3 = smov 46  }
 0x43f   : > { %6762 = vst [vmem:[#allocation43_spill] sm:$0xff] %v5536_v5  ;;  %6765 = vst [vmem:[#allocation44_spill] sm:$0xff] %v5544_v55  ;;  %v5556_v31 = vrot.slane %v5544_v55, %v4783_v30  ;;  %v5574_v55 = vld [vmem:[#allocation4] sm:$0x3f] }
 0x440   : > { %6775 = vst [vmem:[#allocation46_spill] sm:$0xff] %v5574_v55 }
 0x441   : > { %2425 = vrot.lane.b32.xlu0 %v5524_v23, %s6761_s16  ;;  %v5552_v23 = vrot.slane %v5542_v38, %v4783_v30  ;;  %6768 = vst [vmem:[#allocation27_spill] sm:$0xff] %v5556_v31  ;;  %s6771_s16 = smov 45  }
 0x442   : > { %2387 = vrot.lane.b32.xlu1 %v5520_v28, %s6760_s1  ;;  %v5560_v28 = vld [vmem:[#allocation4] sm:$0x3f]  ;;  %s6772_s1 = smov 35  }
 0x443   : > { %6770 = vst [vmem:[#allocation47_spill] sm:$0xff] %v5560_v28  ;;  %v5572_v38 = vrot.slane %v5560_v28, %v4783_v30  ;;  %v3631_v28 = vcombine.high %v5228_v22, %v5228_v22  ;;  %v3684_v22 = vcombine.high %v5232_v62, %v5232_v62  ;;  %v3608_v62 = vcombine.high %v5252_v11, %v5252_v11 }
 0x445   : > { %2165 = vrot.lane.b32.xlu0 %v5540_v61, %s6767_s3  ;;  %v5568_v61 = vrot.slane %v5558_v56, %v4783_v30  ;;  %6774 = vst [vmem:[#allocation49_spill] sm:$0xff] %v5572_v38  ;;  %s6777_s3 = smov 34  }
 0x446   : > { %2349 = vrot.lane.b32.xlu1 %v5536_v5, %s6766_s5  ;;  %v5576_v5 = vld [vmem:[#allocation4] sm:$0x3f]  ;;  %s6778_s5 = smov 50  }
 0x447   : > { %6773 = vst [vmem:[#allocation29_spill] sm:$0xff] %v5568_v61  ;;  %6776 = vst [vmem:[#allocation31_spill] sm:$0xff] %v5576_v5  ;;  %v5588_v56 = vrot.slane %v5576_v5, %v4783_v30 }
 0x449   : > { %2241 = vrot.lane.b32.xlu0 %v5556_v31, %s6772_s1  ;;  %v5584_v31 = vrot.slane %v5574_v55, %v4783_v30  ;;  %6779 = vst [vmem:[#allocation22_spill] sm:$0xff] %v5588_v56  ;;  %s6780_s1 = smov 49   ;;  %v3669_v55 = vcombine.high %v5226_v14, %v5226_v14 }
 0x44a   : > { %2203 = vrot.lane.b32.xlu1 %v5552_v23, %s6771_s16  ;;  %s6781_s16 = smov 47  }
 0x44b   : > { %v3683_v5 = vrot.slane %v3669_v55, %v4783_v30 }
 0x44d   : > { %2019 = vrot.lane.b32.xlu0 %v5572_v38, %s6778_s5  ;;  %v3646_v38 = vcombine.high %v5236_v58, %v5236_v58 }
 0x44e   : > { %2279 = vrot.lane.b32.xlu1 %v5568_v61, %s6777_s3  ;;  %v3645_v61 = vrot.slane %v3631_v28, %v4783_v30  ;;  %v3722_v28 = vcombine.high %v5248_v12, %v5248_v12  ;;  %v3485_v12 = vcombine.high %v5254_v24, %v5254_v24 }
 0x450   : > { %v3499_v11 = vrot.slane %v3485_v12, %v4783_v30 }
 0x451   : > { %2133 = vrot.lane.b32.xlu0 %v5588_v56, %s6781_s16  ;;  %v3707_v56 = vcombine.high %v5238_v19, %v5238_v19 }
 0x452   : > { %2057 = vrot.lane.b32.xlu1 %v5584_v31, %s6780_s1 }
 0x453   : > { %v3721_v14 = vrot.slane %v3707_v56, %v4783_v30  ;;  %v3538_v56 = vcombine.high %v5284_v27, %v5284_v27 }
 0x455   : > { %3651 = vrot.lane.b32.xlu0 %v3645_v61, %s6587_s26  ;;  %v3523_v61 = vcombine.high %v5272_v42, %v5272_v42 }
 0x456   : > { %3649 = vrot.lane.b32.xlu1 %v3646_v38, %s6587_s26  ;;  %v3593_v38 = vcombine.high %v5240_v1, %v5240_v1  ;;  %v3462_v1 = vcombine.high %v5268_v4, %v5268_v4  ;;  %s6856_s26 = smov 35  }
 0x457   : > { %v3537_v24 = vrot.slane %v3523_v61, %v4783_v30 }
 0x458   : > { %v3607_v58 = vrot.slane %v3593_v38, %v4783_v30  ;;  %v3301_v38 = vcombine.high %v5288_v63, %v5288_v63 }
 0x459   : > { %3689 = vrot.lane.b32.xlu0 %v3683_v5, %s6584_s28  ;;  %v3447_v5 = vcombine.high %v5256_v60, %v5256_v60  ;;  %v3500_v60 = vcombine.high %v5264_v26, %v5264_v26 }
 0x45a   : > { %3687 = vrot.lane.b32.xlu1 %v3684_v22, %s6584_s28  ;;  %v3561_v22 = vcombine.high %v5270_v52, %v5270_v52  ;;  %s6877_s28 = smov 51  }
 0x45b   : > { %v3461_v19 = vrot.slane %v3447_v5, %v4783_v30  ;;  %v3377_v5 = vcombine.high %v5286_v50, %v5286_v50 }
 0x45d   : > { %3727 = vrot.lane.b32.xlu0 %v3721_v14, %s6678_s8  ;;  %v3576_v14 = vcombine.high %v5280_v33, %v5280_v33 }
 0x45e   : > { %3725 = vrot.lane.b32.xlu1 %v3722_v28, %s6678_s8  ;;  %v3575_v28 = vrot.slane %v3561_v22, %v4783_v30  ;;  %s6951_s8 = sld [smem:[#allocation63_spill]] }
 0x461   : > { %3613 = vrot.lane.b32.xlu0 %v3607_v58, %s6590_s24  ;;  %v3315_v58 = vrot.slane %v3301_v38, %v4783_v30  ;;  %v3193_v38 = vcombine.high %v5318_v0, %v5318_v0 }
 0x462   : > { %3611 = vrot.lane.b32.xlu1 %v3608_v62, %s6590_s24  ;;  %v3316_v62 = vcombine.high %v5300_v9, %v5300_v9  ;;  %v3415_v9 = vcombine.high %v5304_v41, %v5304_v41  ;;  %s6849_s24 = smov 46  }
 0x465   : > { %3465 = vrot.lane.b32.xlu0 %v3462_v1, %s6600_s29  ;;  %v3391_v1 = vrot.slane %v3377_v5, %v4783_v30  ;;  %v3231_v5 = vcombine.high %v5336_v47, %v5336_v47 }
 0x466   : > { %3467 = vrot.lane.b32.xlu1 %v3461_v19, %s6600_s29  ;;  %v3392_v19 = vcombine.high %v5296_v2, %v5296_v2  ;;  %v3339_v2 = vcombine.high %v5302_v29, %v5302_v29 }
 0x469   : > { %3503 = vrot.lane.b32.xlu0 %v3500_v60, %s6598_s18  ;;  %v3429_v60 = vrot.slane %v3415_v9, %v4783_v30  ;;  %v3269_v9 = vcombine.high %v5334_v37, %v5334_v37 }
 0x46a   : > { %3505 = vrot.lane.b32.xlu1 %v3499_v11, %s6598_s18  ;;  %v3430_v11 = vcombine.high %v5316_v34, %v5316_v34  ;;  %v3155_v34 = vcombine.high %v5320_v25, %v5320_v25 }
 0x46b   : > { %v5638_v4 = vpop.permute.xlu0 %3685 }
 0x46c   : > { %v5640_v55 = vpop.permute.xlu1 %3647 }
 0x46d   : > { %3541 = vrot.lane.b32.xlu0 %v3538_v56, %s6595_s15  ;;  %v3354_v56 = vcombine.high %v5312_v45, %v5312_v45 }
 0x46e   : > { %3543 = vrot.lane.b32.xlu1 %v3537_v24, %s6595_s15  ;;  %v3353_v24 = vrot.slane %v3339_v2, %v4783_v30  ;;  %v3009_v2 = vcombine.high %v5352_v32, %v5352_v32  ;;  %s6829_s15 = smov 33  }
 0x46f   : > { %v5651_v42 = vpop.permute.xlu0 %3609 }
 0x470   : > { %v5649_v26 = vpop.permute.xlu1 %3723 }
 0x471   : > { %3579 = vrot.lane.b32.xlu0 %v3576_v14, %s6592_s20  ;;  %v3170_v14 = vcombine.high %v5332_v16, %v5332_v16 }
 0x472   : > { %3581 = vrot.lane.b32.xlu1 %v3575_v28, %s6592_s20  ;;  %v3169_v28 = vrot.slane %v3155_v34, %v4783_v30  ;;  %v3047_v34 = vcombine.high %v5350_v48, %v5350_v48  ;;  %s6949_s20 = sld [smem:[#allocation7_spill]] }
 0x473   : > { %v5660_v52 = vpop.permute.xlu0 %3501 }
 0x474   : > { %v5662_v27 = vpop.permute.xlu1 %3463 }
 0x475   : > { %3321 = vrot.lane.b32.xlu0 %v3315_v58, %s6606_s2  ;;  %v3208_v58 = vcombine.high %v5328_v35, %v5328_v35 }
 0x476   : > { %3319 = vrot.lane.b32.xlu1 %v3316_v62, %s6606_s2  ;;  %v3207_v62 = vrot.slane %v3193_v38, %v4783_v30  ;;  %s6789_s2 = smov 14  }
 0x477   : > { %v5671_v33 = vpop.permute.xlu0 %3577 }
 0x478   : > { %v5673_v63 = vpop.permute.xlu1 %3539 }
 0x479   : > { %3397 = vrot.lane.b32.xlu0 %v3391_v1, %s6599_s12  ;;  %v3246_v1 = vcombine.high %v5348_v49, %v5348_v49 }
 0x47a   : > { %3395 = vrot.lane.b32.xlu1 %v3392_v19, %s6599_s12  ;;  %v3245_v19 = vrot.slane %v3231_v5, %v4783_v30  ;;  %s6880_s12 = sld [smem:[#allocation62_spill]] }
 0x47b   : > { %v5682_v50 = vpop.permute.xlu0 %3393 }
 0x47c   : > { %v5684_v12 = vpop.permute.xlu1 %3317 }
 0x47d   : > { %3435 = vrot.lane.b32.xlu0 %v3429_v60, %s6655_s14  ;;  %v3284_v60 = vcombine.high %v5344_v57, %v5344_v57 }
 0x47e   : > { %3433 = vrot.lane.b32.xlu1 %v3430_v11, %s6655_s14  ;;  %v3283_v11 = vrot.slane %v3269_v9, %v4783_v30 }
 0x47f   : > { %v5693_v41 = vpop.permute.xlu0 %3355 }
 0x480   : > { %v5695_v61 = vpop.permute.xlu1 %3431 }
 0x481   : > { %3357 = vrot.lane.b32.xlu0 %v3354_v56, %s6602_s0  ;;  %v3023_v56 = vrot.slane %v3009_v2, %v4783_v30 }
 0x482   : > { %3359 = vrot.lane.b32.xlu1 %v3353_v24, %s6602_s0  ;;  %v3024_v24 = vcombine.high %v5364_v3, %v5364_v3  ;;  %v3123_v3 = vcombine.high %v5368_v6, %v5368_v6  ;;  %s6784_s0 = smov 15  }
 0x483   : > { %v5704_v29 = vpop.permute.xlu0 %3209 }
 0x484   : > { %v5706_v22 = vpop.permute.xlu1 %3171 }
 0x485   : > { %3173 = vrot.lane.b32.xlu0 %v3170_v14, %s6618_s6  ;;  %v3061_v14 = vrot.slane %v3047_v34, %v4783_v30  ;;  %v2939_v34 = vcombine.high %v5400_v40, %v5400_v40 }
 0x486   : > { %3175 = vrot.lane.b32.xlu1 %v3169_v28, %s6618_s6  ;;  %v3062_v28 = vcombine.high %v5360_v43, %v5360_v43  ;;  %v3085_v43 = vcombine.high %v5366_v13, %v5366_v13  ;;  %s6801_s6 = smov 16  }
 0x487   : > { %v5715_v45 = vpop.permute.xlu0 %3285 }
 0x488   : > { %v5717_v25 = vpop.permute.xlu1 %3247 }
 0x489   : > { %3211 = vrot.lane.b32.xlu0 %v3208_v58, %s6616_s7  ;;  %v3137_v58 = vrot.slane %v3123_v3, %v4783_v30  ;;  %v2977_v3 = vcombine.high %v5398_v21, %v5398_v21 }
 0x48a   : > { %3213 = vrot.lane.b32.xlu1 %v3207_v62, %s6616_s7  ;;  %v3138_v62 = vcombine.high %v5380_v46, %v5380_v46  ;;  %v2863_v46 = vcombine.high %v5384_v7, %v5384_v7  ;;  %s6805_s7 = smov 29  }
 0x48b   : > { %v5726_v0 = vpop.permute.xlu0 %3063 }
 0x48c   : > { %v5728_v16 = vpop.permute.xlu1 %3025 }
 0x48d   : > { %3249 = vrot.lane.b32.xlu0 %v3246_v1, %s6612_s9  ;;  %v3099_v1 = vrot.slane %v3085_v43, %v4783_v30  ;;  %v2733_v43 = vcombine.high %v5416_v59, %v5416_v59 }
 0x48e   : > { %3251 = vrot.lane.b32.xlu1 %v3245_v19, %s6612_s9  ;;  %v3100_v19 = vcombine.high %v5376_v54, %v5376_v54  ;;  %v2901_v54 = vcombine.high %v5382_v53, %v5382_v53  ;;  %s6810_s9 = smov 19  }
 0x48f   : > { %v5737_v35 = vpop.permute.xlu0 %3101 }
 0x490   : > { %v5739_v47 = vpop.permute.xlu1 %3139 }
 0x491   : > { %3287 = vrot.lane.b32.xlu0 %v3284_v60, %s6608_s4  ;;  %v2878_v60 = vcombine.high %v5396_v51, %v5396_v51 }
 0x492   : > { %3289 = vrot.lane.b32.xlu1 %v3283_v11, %s6608_s4  ;;  %v2877_v11 = vrot.slane %v2863_v46, %v4783_v30  ;;  %v2771_v46 = vcombine.high %v5414_v36, %v5414_v36  ;;  %s6796_s4 = smov 13  }
 0x493   : > { %v5748_v37 = vpop.permute.xlu0 %2917 }
 0x494   : > { %v5750_v49 = vpop.permute.xlu1 %2879 }
 0x495   : > { %3029 = vrot.lane.b32.xlu0 %v3023_v56, %s6583_s27  ;;  %v2916_v56 = vcombine.high %v5392_v44, %v5392_v44 }
 0x496   : > { %3027 = vrot.lane.b32.xlu1 %v3024_v24, %s6583_s27  ;;  %v2915_v24 = vrot.slane %v2901_v54, %v4783_v30  ;;  %s6874_s27 = smov 48  }
 0x497   : > { %v5759_v57 = vpop.permute.xlu0 %2993 }
 0x498   : > { %v5761_v32 = vpop.permute.xlu1 %2955 }
 0x499   : > { %3067 = vrot.lane.b32.xlu0 %v3061_v14, %s6581_s17  ;;  %v2954_v14 = vcombine.high %v5412_v17, %v5412_v17 }
 0x49a   : > { %3065 = vrot.lane.b32.xlu1 %v3062_v28, %s6581_s17  ;;  %v2953_v28 = vrot.slane %v2939_v34, %v4783_v30  ;;  %s6950_s17 = sshll.u32 %s6949_s20, 4 }
 0x49b   : > { %v5770_v48 = vpop.permute.xlu0 %2787 }
 0x49c   : > { %v5772_v38 = vpop.permute.xlu1 %2749 }
 0x49d   : > { %3143 = vrot.lane.b32.xlu0 %v3137_v58, %s6622_s10  ;;  %v2992_v58 = vcombine.high %v5408_v8, %v5408_v8 }
 0x49e   : > { %3141 = vrot.lane.b32.xlu1 %v3138_v62, %s6622_s10  ;;  %v2991_v62 = vrot.slane %v2977_v3, %v4783_v30  ;;  %s6823_s10 = smov 17  }
 0x49f   : > { %v5783_v5 = vpop.permute.xlu0 %2641 }
 0x4a0   : > { %v5781_v6 = vpop.permute.xlu1 %2825 }
 0x4a1   : > { %3105 = vrot.lane.b32.xlu0 %v3099_v1, %s6578_s19  ;;  %v2747_v1 = vrot.slane %v2733_v43, %v4783_v30 }
 0x4a2   : > { %3103 = vrot.lane.b32.xlu1 %v3100_v19, %s6578_s19  ;;  %v2748_v19 = vcombine.high %v5428_v20, %v5428_v20  ;;  %v2809_v20 = vcombine.high %v5430_v10, %v5430_v10  ;;  %s6947_s19 = sld [smem:[#allocation61_spill]] }
 0x4a3   : > { %v5794_v9 = vpop.permute.xlu0 %2717 }
 0x4a4   : > { %v5792_v13 = vpop.permute.xlu1 %2679 }
 0x4a5   : > { %2881 = vrot.lane.b32.xlu0 %v2878_v60, %s6594_s21  ;;  %v2785_v60 = vrot.slane %v2771_v46, %v4783_v30  ;;  %v6788_v46 = vld [vmem:[#allocation32_spill] sm:$0xff] }
 0x4a6   : > { %2883 = vrot.lane.b32.xlu1 %v2877_v11, %s6594_s21  ;;  %v2786_v11 = vcombine.high %v5424_v15, %v5424_v15  ;;  %v2625_v15 = vcombine.high %v5432_v39, %v5432_v39  ;;  %s6834_s21 = smov 31  }
 0x4a7   : > { %v5805_v2 = vpop.permute.xlu0 %2457 }
 0x4a8   : > { %v5803_v7 = vpop.permute.xlu1 %2603 }
 0x4a9   : > { %2919 = vrot.lane.b32.xlu0 %v2916_v56, %s6591_s22  ;;  %v2823_v56 = vrot.slane %v2809_v20, %v4783_v30 }
 0x4aa   : > { %2921 = vrot.lane.b32.xlu1 %v2915_v24, %s6591_s22  ;;  %v2824_v24 = vcombine.high %v5440_v18, %v5440_v18  ;;  %s6839_s22 = smov 30  }
 0x4ab   : > { %v5816_v51 = vpop.permute.xlu0 %2533 }
 0x4ac   : > { %v5814_v53 = vpop.permute.xlu1 %2495 }
 0x4ad   : > { %2957 = vrot.lane.b32.xlu0 %v2954_v14, %s6589_s23  ;;  %v6782_v14 = vld [vmem:[#allocation34_spill] sm:$0xff] }
 0x4ae   : > { %2959 = vrot.lane.b32.xlu1 %v2953_v28, %s6589_s23  ;;  %v2639_v28 = vrot.slane %v2625_v15, %v4783_v30  ;;  %v2640_v3 = vcombine.high %v6782_v14, %v6782_v14  ;;  %s6844_s23 = smov 32  }
 0x4af   : > { %v5827_v40 = vpop.permute.xlu0 %2311 }
 0x4b0   : > { %v5825_v44 = vpop.permute.xlu1 %2571 }
 0x4b1   : > { %2995 = vrot.lane.b32.xlu0 %v2992_v58, %s6586_s25 }
 0x4b2   : > { %2997 = vrot.lane.b32.xlu1 %v2991_v62, %s6586_s25  ;;  %v6783_v62 = vld [vmem:[#allocation10_spill] sm:$0xff]  ;;  %s6853_s25 = smov 45  }
 0x4b3   : > { %v5838_v17 = vpop.permute.xlu0 %2425  ;;  %v2663_v18 = vcombine.high %v6783_v62, %v6783_v62 }
 0x4b4   : > { %v5836_v21 = vpop.permute.xlu1 %2387 }
 0x4b5   : > { %2753 = vrot.lane.b32.xlu0 %v2747_v1, %s6664_s30  ;;  %v2677_v43 = vrot.slane %v2663_v18, %v4783_v30  ;;  %v6794_v18 = vld [vmem:[#allocation53_spill] sm:$0xff] }
 0x4b6   : > { %2751 = vrot.lane.b32.xlu1 %v2748_v19, %s6664_s30  ;;  %v6787_v19 = vld [vmem:[#allocation11_spill] sm:$0xff]  ;;  %s6816_s30 = smov 18  }
 0x4b7   : > { %v5849_v59 = vpop.permute.xlu0 %2165  ;;  %v2678_v1 = vcombine.high %v6787_v19, %v6787_v19  ;;  %v6795_v19 = vld [vmem:[#allocation52_spill] sm:$0xff] }
 0x4b8   : > { %v5847_v8 = vpop.permute.xlu1 %2349 }
 0x4b9   : > { %2791 = vrot.lane.b32.xlu0 %v2785_v60, %s6661_s11 }
 0x4ba   : > { %2789 = vrot.lane.b32.xlu1 %v2786_v11, %s6661_s11  ;;  %v2701_v11 = vcombine.high %v6788_v46, %v6788_v46 }
 0x4bb   : > { %v5860_v54 = vpop.permute.xlu0 %2241 }
 0x4bc   : > { %v5858_v36 = vpop.permute.xlu1 %2203 }
 0x4bd   : > { %2829 = vrot.lane.b32.xlu0 %v2823_v56, %s6658_s13  ;;  %v6790_v56 = vld [vmem:[#allocation36_spill] sm:$0xff] }
 0x4be   : > { %2827 = vrot.lane.b32.xlu1 %v2824_v24, %s6658_s13  ;;  %v2715_v24 = vrot.slane %v2701_v11, %v4783_v30  ;;  %v2716_v15 = vcombine.high %v6790_v56, %v6790_v56 }
 0x4bf   : > { %v5871_v34 = vpop.permute.xlu0 %2019 }
 0x4c0   : > { %v5869_v10 = vpop.permute.xlu1 %2279 }
 0x4c1   : > { %2643 = vrot.lane.b32.xlu0 %v2640_v3, %s6784_s0 }
 0x4c2   : > { %2645 = vrot.lane.b32.xlu1 %v2639_v28, %s6784_s0  ;;  %v6791_v28 = vld [vmem:[#allocation12_spill] sm:$0xff] }
 0x4c3   : > { %v5882_v58 = vpop.permute.xlu0 %2133  ;;  %v2587_v14 = vcombine.high %v6791_v28, %v6791_v28 }
 0x4c4   : > { %v5880_v39 = vpop.permute.xlu1 %2057  ;;  %6786 = vst [vmem:[#allocation24_spill] sm:$0xff] %v5882_v58 }
 0x4c5   : > { %6785 = vst [vmem:[#allocation48_spill] sm:$0xff] %v5880_v39  ;;  %2681 = vrot.lane.b32.xlu0 %v2678_v1, %s6789_s2  ;;  %v2601_v28 = vrot.slane %v2587_v14, %v4783_v30  ;;  %v6797_v39 = vld [vmem:[#allocation13_spill] sm:$0xff] }
 0x4c6   : > { %2683 = vrot.lane.b32.xlu1 %v2677_v43, %s6789_s2 }
 0x4c7   : > { %v3652_v20 = vpop.permute.xlu0 %3651 }
 0x4c8   : > { %v3650_v60 = vpop.permute.xlu1 %3649 }
 0x4c9   : > { %v3653_v3 = vsel %vm6792_vm10, %v5640_v55, %v3650_v60  ;;  %v3654_v62 = vsel %vm6793_vm4, %v3650_v60, %v3652_v20  ;;  %2719 = vrot.lane.b32.xlu0 %v2716_v15, %s6796_s4  ;;  %v2602_v55 = vcombine.high %v6797_v39, %v6797_v39  ;;  %v6798_v60 = vld [vmem:[#allocation33_spill] sm:$0xff]  ;;  %vm6799_vm4 = vcmask 637952  }
 0x4ca   : > { %v3657_v43 = vsel %vm621_vm9, %v3653_v3, 0.0  ;;  %v3658_v1 = vsel %vm622_vm8, %v3654_v62, 0.0  ;;  %2721 = vrot.lane.b32.xlu1 %v2715_v24, %s6796_s4  ;;  %v2441_v20 = vcombine.high %v6798_v60, %v6798_v60  ;;  %vm6800_vm10 = vmmov %vm6799_vm4 }
 0x4cb   : > { %v3661_v46 = vrot.slane %v3657_v43, 4  ;;  %v3662_v11 = vrot.slane %v3658_v1, 4  ;;  %v3690_v58 = vpop.permute.xlu0 %3689 }
 0x4cc   : > { %v3688_v56 = vpop.permute.xlu1 %3687 }
 0x4cd   : > { %3665 = vst [vmem:[#allocation5 + $0x98] sm:$0x30] %v3661_v46  ;;  %3666 = vst [vmem:[#allocation5 + $0x18] sm:$0x30] %v3662_v11  ;;  %v3691_v3 = vsel %vm6799_vm4, %v5638_v4, %v3688_v56  ;;  %v3692_v24 = vsel %vm6800_vm10, %v3688_v56, %v3690_v58  ;;  %2605 = vrot.lane.b32.xlu0 %v2602_v55, %s6801_s6  ;;  %v6802_v46 = vld [vmem:[#allocation38_spill] sm:$0xff]  ;;  %v2455_v4 = vrot.slane %v2441_v20, %v4783_v30 }
 0x4ce   : > { %v3695_v15 = vsel %vm627_vm6, %v3691_v3, 0.0  ;;  %v3696_v62 = vsel %vm628_vm5, %v3692_v24, 0.0  ;;  %2607 = vrot.lane.b32.xlu1 %v2601_v28, %s6801_s6  ;;  %v2456_v11 = vcombine.high %v6802_v46, %v6802_v46  ;;  %v6803_v58 = vld [vmem:[#allocation14_spill] sm:$0xff]  ;;  %vm6804_vm4 = vcmp.lt.s32.totalorder %v6794_v18, 13 }
 0x4cf   : > { %v3699_v39 = vrot.slane %v3695_v15, 2  ;;  %v3700_v14 = vrot.slane %v3696_v62, 2  ;;  %v3728_v1 = vpop.permute.xlu0 %3727  ;;  %v2479_v56 = vcombine.high %v6803_v58, %v6803_v58  ;;  %v6806_v15 = vld [vmem:[#allocation15_spill] sm:$0xff] }
 0x4d0   : > { %v3726_v43 = vpop.permute.xlu1 %3725  ;;  %v2494_v62 = vcombine.high %v6806_v15, %v6806_v15 }
 0x4d1   : > { %3703 = vst [vmem:[#allocation5 + $0x98] sm:$0xc0] %v3699_v39  ;;  %3704 = vst [vmem:[#allocation5 + $0x18] sm:$0xc0] %v3700_v14  ;;  %v3729_v60 = vsel %vm1675_vm2, %v5649_v26, %v3726_v43  ;;  %v3730_v28 = vsel %vm1675_vm2, %v3726_v43, %v3728_v1  ;;  %2461 = vrot.lane.b32.xlu0 %v2455_v4, %s6805_s7  ;;  %v2493_v26 = vrot.slane %v2479_v56, %v4783_v30  ;;  %v6807_v39 = vld [vmem:[#allocation35_spill] sm:$0xff]  ;;  %vm6808_vm2 = vcmask 654336  }
 0x4d2   : > { %v3733_v55 = vsel %vm6804_vm4, %v3729_v60, 0.0  ;;  %v3734_v3 = vsel %vm634_vm0, %v3730_v28, 0.0  ;;  %2459 = vrot.lane.b32.xlu1 %v2456_v11, %s6805_s7  ;;  %v2517_v14 = vcombine.high %v6807_v39, %v6807_v39  ;;  %vm6809_vm10 = vmmov %vm6808_vm2  ;;  %v6811_v60 = vld [vmem:[#allocation17_spill] sm:$0xff]  ;;  %vm6813_vm4 = vcmask 760832  }
 0x4d3   : > { %3735 = vst [vmem:[#allocation5 + $0xc0] sm:$0x3] %v3733_v55  ;;  %3736 = vst [vmem:[#allocation5 + $0x68] sm:$0x3] %v3734_v3  ;;  %v3614_v24 = vpop.permute.xlu0 %3613  ;;  %v2532_v56 = vcombine.high %v6811_v60, %v6811_v60  ;;  %v6812_v55 = vld [vmem:[#allocation37_spill] sm:$0xff] }
 0x4d4   : > { %v3612_v20 = vpop.permute.xlu1 %3611  ;;  %v2531_v28 = vrot.slane %v2517_v14, %v4783_v30 }
 0x4d5   : > { %v3615_v43 = vsel %vm6808_vm2, %v5651_v42, %v3612_v20  ;;  %v3616_v1 = vsel %vm6809_vm10, %v3612_v20, %v3614_v24  ;;  %2499 = vrot.lane.b32.xlu0 %v2493_v26, %s6810_s9  ;;  %v2555_v42 = vcombine.high %v6812_v55, %v6812_v55  ;;  %vm6814_vm2 = vmmov %vm6813_vm4  ;;  %vm6815_vm10 = vcmp.lt.s32.totalorder %v6794_v18, 13 }
 0x4d6   : > { %v3623_v46 = vrot.slane %v3615_v43, 6  ;;  %v3624_v11 = vrot.slane %v3616_v1, 6  ;;  %2497 = vrot.lane.b32.xlu1 %v2494_v62, %s6810_s9  ;;  %v6819_v1 = vld [vmem:[#allocation19_spill] sm:$0xff] }
 0x4d7   : > { %v3466_v58 = vpop.permute.xlu0 %3465 }
 0x4d8   : > { %3627 = vst [vmem:[#allocation5 + $0x98] sm:$0xc] %v3623_v46  ;;  %3628 = vst [vmem:[#allocation5 + $0x18] sm:$0xc] %v3624_v11  ;;  %v3468_v4 = vpop.permute.xlu1 %3467  ;;  %v3469_v3 = vsel %vm6813_vm4, %v5662_v27, %v3466_v58  ;;  %v2570_v46 = vcombine.high %v6819_v1, %v6819_v1  ;;  %v2569_v11 = vrot.slane %v2555_v42, %v4783_v30 }
 0x4d9   : > { %v3470_v20 = vsel %vm6814_vm2, %v3466_v58, %v3468_v4  ;;  %v3473_v24 = vsel %vm6815_vm10, %v3469_v3, 0.0  ;;  %2537 = vrot.lane.b32.xlu0 %v2531_v28, %s6816_s30  ;;  %vm6818_vm4 = vmmov %vm6817_vm12  ;;  %v6820_v4 = vld [vmem:[#allocation40_spill] sm:$0xff]  ;;  %vm6821_vm2 = vcmask 678912  }
 0x4da   : > { %v3474_v15 = vsel %vm634_vm0, %v3470_v20, 0.0  ;;  %2535 = vrot.lane.b32.xlu1 %v2532_v56, %s6816_s30  ;;  %v3763_v62 = vld [vmem:[#allocation5 + $0x68] sm:$0x3]  ;;  %v3762_v26 = vld [vmem:[#allocation5 + $0xc0] sm:$0x3]  ;;  %v3477_v39 = vrot.slane %v3473_v24, 6  ;;  %v2295_v58 = vcombine.high %v6820_v4, %v6820_v4  ;;  %vm6822_vm10 = vmmov %vm6821_vm2 }
 0x4db   : > { %v3478_v14 = vrot.slane %v3474_v15, 6  ;;  %3939 = vmatprep.subr.msk.mxu1 %vm6817_vm12, %v3763_v62  ;;  %v3504_v27 = vpop.permute.xlu0 %3503  ;;  %v6824_v62 = vld [vmem:[#allocation16_spill] sm:$0xff]  ;;  %vm6826_vm12 = vcmask 670720  }
 0x4dc   : > { %v3506_v43 = vpop.permute.xlu1 %3505  ;;  %3940 = vmatpush1.msk.msra.mxu1 %vm6818_vm4, %v3762_v26  ;;  %3481 = vst [vmem:[#allocation5 + $0xa0] sm:$0xc] %v3477_v39  ;;  %v3507_v60 = vsel %vm6821_vm2, %v5660_v52, %v3504_v27  ;;  %v2309_v15 = vrot.slane %v2295_v58, %v4783_v30  ;;  %v2310_v52 = vcombine.high %v6824_v62, %v6824_v62  ;;  %v6825_v26 = vld [vmem:[#allocation39_spill] sm:$0xff]  ;;  %vm6827_vm4 = vmmov %vm6826_vm12  ;;  %vm6828_vm2 = vcmp.ge.s32.totalorder %v6795_v19, 2 }
 0x4dd   : > { %3482 = vst [vmem:[#allocation5 + $0x90] sm:$0xc] %v3478_v14  ;;  %v3508_v56 = vsel %vm6822_vm10, %v3504_v27, %v3506_v43  ;;  %v3511_v28 = vsel %vm595_vm14, %v3507_v60, 0.0  ;;  %2575 = vrot.lane.b32.xlu0 %v2569_v11, %s6823_s10  ;;  %v2371_v39 = vcombine.high %v6825_v26, %v6825_v26  ;;  %vm6832_vm10 = vcmask 662528   ;;  %v6835_v26 = vld [vmem:[#allocation42_spill] sm:$0xff] }
 0x4de   : > { %v3512_v55 = vsel %vm596_vm13, %v3508_v56, 0.0  ;;  %2573 = vrot.lane.b32.xlu1 %v2570_v46, %s6823_s10  ;;  %v3515_v42 = vrot.slane %v3511_v28, 4  ;;  %v6830_v56 = vld [vmem:[#allocation41_spill] sm:$0xff] }
 0x4df   : > { %v3516_v3 = vrot.slane %v3512_v55, 4  ;;  %v3542_v24 = vpop.permute.xlu0 %3541  ;;  %v2385_v60 = vrot.slane %v2371_v39, %v4783_v30  ;;  %v6831_v28 = vld [vmem:[#allocation21_spill] sm:$0xff]  ;;  %v6836_v39 = vld [vmem:[#allocation23_spill] sm:$0xff] }
 0x4e0   : > { %v3544_v20 = vpop.permute.xlu1 %3543  ;;  %3519 = vst [vmem:[#allocation5 + $0xa0] sm:$0x30] %v3515_v42  ;;  %v3545_v14 = vsel %vm6826_vm12, %v5673_v63, %v3542_v24  ;;  %v2386_v63 = vcombine.high %v6830_v56, %v6830_v56  ;;  %v2409_v55 = vcombine.high %v6831_v28, %v6831_v28  ;;  %vm6833_vm12 = vmmov %vm6832_vm10  ;;  %v6840_v56 = vld [vmem:[#allocation43_spill] sm:$0xff]  ;;  %v6841_v28 = vld [vmem:[#allocation18_spill] sm:$0xff] }
 0x4e1   : > { %3520 = vst [vmem:[#allocation5 + $0x90] sm:$0x30] %v3516_v3  ;;  %v3546_v43 = vsel %vm6827_vm4, %v3542_v24, %v3544_v20  ;;  %v3549_v27 = vsel %vm601_vm11, %v3545_v14, 0.0  ;;  %2313 = vrot.lane.b32.xlu0 %v2310_v52, %s6829_s15  ;;  %v2333_v14 = vcombine.high %v6836_v39, %v6836_v39  ;;  %vm6837_vm4 = vcmask 793600   ;;  %v6845_v39 = vld [vmem:[#allocation25_spill] sm:$0xff] }
 0x4e2   : > { %v3550_v1 = vsel %vm6828_vm2, %v3546_v43, 0.0  ;;  %2315 = vrot.lane.b32.xlu1 %v2309_v15, %s6829_s15  ;;  %v3553_v46 = vrot.slane %v3549_v27, 2  ;;  %v2423_v52 = vrot.slane %v2409_v55, %v4783_v30  ;;  %vm6838_vm2 = vmmov %vm6837_vm4  ;;  %v2149_v55 = vcombine.high %v6841_v28, %v6841_v28 }
 0x4e3   : > { %v3554_v11 = vrot.slane %v3550_v1, 2  ;;  %v3580_v58 = vpop.permute.xlu0 %3579 }
 0x4e4   : > { %v3582_v4 = vpop.permute.xlu1 %3581  ;;  %3557 = vst [vmem:[#allocation5 + $0xa0] sm:$0xc0] %v3553_v46  ;;  %v3583_v42 = vsel %vm6832_vm10, %v5671_v33, %v3580_v58  ;;  %v2424_v33 = vcombine.high %v6835_v26, %v6835_v26  ;;  %vm6842_vm10 = vcmask 777216  }
 0x4e5   : > { %3558 = vst [vmem:[#allocation5 + $0x90] sm:$0xc0] %v3554_v11  ;;  %v3584_v3 = vsel %vm6833_vm12, %v3580_v58, %v3582_v4  ;;  %v3587_v20 = vsel %vm607_vm7, %v3583_v42, 0.0  ;;  %2389 = vrot.lane.b32.xlu0 %v2386_v63, %s6834_s21  ;;  %v2348_v63 = vcombine.high %v6840_v56, %v6840_v56  ;;  %vm6843_vm12 = vmmov %vm6842_vm10 }
 0x4e6   : > { %v3588_v24 = vsel %vm608_vm15, %v3584_v3, 0.0  ;;  %2391 = vrot.lane.b32.xlu1 %v2385_v60, %s6834_s21  ;;  %3589 = vst [vmem:[#allocation5 + $0x98] sm:$0x3] %v3587_v20 }
 0x4e7   : > { %3590 = vst [vmem:[#allocation5 + $0x18] sm:$0x3] %v3588_v24  ;;  %v3322_v62 = vpop.permute.xlu0 %3321 }
 0x4e8   : > { %v3320_v15 = vpop.permute.xlu1 %3319 }
 0x4e9   : > { %v3323_v43 = vsel %vm6837_vm4, %v5684_v12, %v3320_v15  ;;  %v3324_v27 = vsel %vm6838_vm2, %v3320_v15, %v3322_v62  ;;  %2427 = vrot.lane.b32.xlu0 %v2424_v33, %s6839_s22  ;;  %v2347_v12 = vrot.slane %v2333_v14, %v4783_v30  ;;  %v2164_v14 = vcombine.high %v6845_v39, %v6845_v39 }
 0x4ea   : > { %v3327_v1 = vsel %vm607_vm7, %v3323_v43, 0.0  ;;  %v3328_v46 = vsel %vm608_vm15, %v3324_v27, 0.0  ;;  %2429 = vrot.lane.b32.xlu1 %v2423_v52, %s6839_s22  ;;  %v2163_v43 = vrot.slane %v2149_v55, %v4783_v30  ;;  %v6846_v27 = vld [vmem:[#allocation45_spill] sm:$0xff]  ;;  %vm6847_vm4 = vcmask 769024  }
 0x4eb   : > { %v3331_v11 = vrot.slane %v3327_v1, 6  ;;  %v3332_v4 = vrot.slane %v3328_v46, 6  ;;  %v3398_v60 = vpop.permute.xlu0 %3397  ;;  %v2187_v1 = vcombine.high %v6846_v27, %v6846_v27  ;;  %vm6848_vm2 = vmmov %vm6847_vm4 }
 0x4ec   : > { %v3396_v58 = vpop.permute.xlu1 %3395 }
 0x4ed   : > { %3335 = vst [vmem:[#allocation5 + $0x58] sm:$0xc] %v3331_v11  ;;  %3336 = vst [vmem:[#allocation5 + $0xc8] sm:$0xc] %v3332_v4  ;;  %v3399_v42 = vsel %vm6842_vm10, %v5682_v50, %v3396_v58  ;;  %v3400_v3 = vsel %vm6843_vm12, %v3396_v58, %v3398_v60  ;;  %2353 = vrot.lane.b32.xlu0 %v2347_v12, %s6844_s23  ;;  %v3760_v62 = vld [vmem:[#allocation5 + $0x98] sm:$0xff]  ;;  %v6850_v12 = vld [vmem:[#allocation44_spill] sm:$0xff] }
 0x4ee   : > { %v3403_v20 = vsel %vm621_vm9, %v3399_v42, 0.0  ;;  %v3404_v24 = vsel %vm622_vm8, %v3400_v3, 0.0  ;;  %2351 = vrot.lane.b32.xlu1 %v2348_v63, %s6844_s23  ;;  %v3761_v15 = vld [vmem:[#allocation5 + $0x18] sm:$0xff]  ;;  %v2202_v63 = vcombine.high %v5552_v23, %v5552_v23  ;;  %v2225_v28 = vcombine.high %v6850_v12, %v6850_v12 }
 0x4ef   : > { %v3407_v52 = vrot.slane %v3403_v20, 2  ;;  %v3408_v26 = vrot.slane %v3404_v24, 2  ;;  %3787 = vmatprep.subr.mxu1 %v3761_v15  ;;  %v3436_v50 = vpop.permute.xlu0 %3435  ;;  %vm6851_vm10 = vcmask 785408   ;;  %v6854_v15 = vld [vmem:[#allocation27_spill] sm:$0xff] }
 0x4f0   : > { %v3434_v33 = vpop.permute.xlu1 %3433  ;;  %3788 = vmatpush1.msra.mxu1 %v3760_v62  ;;  %vm6852_vm12 = vmmov %vm6851_vm10  ;;  %v2240_v62 = vcombine.high %v6854_v15, %v6854_v15 }
 0x4f1   : > { %3411 = vst [vmem:[#allocation5 + $0x58] sm:$0xc0] %v3407_v52  ;;  %3412 = vst [vmem:[#allocation5 + $0xc8] sm:$0xc0] %v3408_v26  ;;  %v3437_v46 = vsel %vm6847_vm4, %v5695_v61, %v3434_v33  ;;  %v3438_v11 = vsel %vm6848_vm2, %v3434_v33, %v3436_v50  ;;  %2169 = vrot.lane.b32.xlu0 %v2163_v43, %s6849_s24  ;;  %v2201_v61 = vrot.slane %v2187_v1, %v4783_v30  ;;  %v6855_v26 = vld [vmem:[#allocation20_spill] sm:$0xff]  ;;  %vm6865_vm2 = vcmask 801792  }
 0x4f2   : > { %v3441_v4 = vsel %vm627_vm6, %v3437_v46, 0.0  ;;  %v3442_v58 = vsel %vm628_vm5, %v3438_v11, 0.0  ;;  %2167 = vrot.lane.b32.xlu1 %v2164_v14, %s6849_s24  ;;  %v2239_v52 = vrot.slane %v2225_v28, %v4783_v30 }
 0x4f3   : > { %3443 = vst [vmem:[#allocation5 + $0xa0] sm:$0x3] %v3441_v4  ;;  %3444 = vst [vmem:[#allocation5 + $0x90] sm:$0x3] %v3442_v58  ;;  %v3358_v56 = vpop.permute.xlu0 %3357  ;;  %v6857_v4 = vld [vmem:[#allocation29_spill] sm:$0xff] }
 0x4f4   : > { %v3360_v60 = vpop.permute.xlu1 %3359  ;;  %v3361_v55 = vsel %vm6851_vm10, %v5693_v41, %v3358_v56  ;;  %v2263_v41 = vcombine.high %v6855_v26, %v6855_v26  ;;  %v2278_v58 = vcombine.high %v6857_v4, %v6857_v4  ;;  %vm6866_vm10 = vmmov %vm6865_vm2 }
 0x4f5   : > { %v3362_v42 = vsel %vm6852_vm12, %v3358_v56, %v3360_v60  ;;  %v3369_v3 = vrot.slane %v3361_v55, 4  ;;  %2207 = vrot.lane.b32.xlu0 %v2201_v61, %s6853_s25  ;;  %v6858_v56 = vld [vmem:[#allocation47_spill] sm:$0xff]  ;;  %vm6867_vm12 = vcmp.ge.s32.totalorder %v6795_v19, 2 }
 0x4f6   : > { %v3370_v20 = vrot.slane %v3362_v42, 4  ;;  %2205 = vrot.lane.b32.xlu1 %v2202_v63, %s6853_s25  ;;  %v2277_v60 = vrot.slane %v2263_v41, %v4783_v30  ;;  %v2003_v63 = vcombine.high %v6858_v56, %v6858_v56 }
 0x4f7   : > { %3373 = vst [vmem:[#allocation5 + $0x58] sm:$0x30] %v3369_v3  ;;  %v3174_v23 = vpop.permute.xlu0 %3173 }
 0x4f8   : > { %3374 = vst [vmem:[#allocation5 + $0xc8] sm:$0x30] %v3370_v20  ;;  %v3176_v24 = vpop.permute.xlu1 %3175  ;;  %v3177_v33 = vsel %vm1360_vm1, %v5706_v22, %v3174_v23 }
 0x4f9   : > { %v3178_v50 = vsel %vm1360_vm1, %v3174_v23, %v3176_v24  ;;  %v3181_v39 = vsel %vm627_vm6, %v3177_v33, 0.0  ;;  %2245 = vrot.lane.b32.xlu0 %v2239_v52, %s6856_s26  ;;  %vm6859_vm1 = vcmp.lt.s32.totalorder %v6794_v18, 13  ;;  %v6860_v23 = vld [vmem:[#allocation49_spill] sm:$0xff] }
 0x4fa   : > { %v3182_v14 = vsel %vm628_vm5, %v3178_v50, 0.0  ;;  %2243 = vrot.lane.b32.xlu1 %v2240_v62, %s6856_s26  ;;  %v3759_v43 = vld [vmem:[#allocation5 + $0x90] sm:$0xff]  ;;  %v3758_v27 = vld [vmem:[#allocation5 + $0xa0] sm:$0xff]  ;;  %v3185_v1 = vrot.slane %v3181_v39, 6  ;;  %v2018_v15 = vcombine.high %v6860_v23, %v6860_v23 }
 0x4fb   : > { %v3186_v46 = vrot.slane %v3182_v14, 6  ;;  %3789 = vmatprep.subr.mxu1 %v3759_v43  ;;  %v3212_v22 = vpop.permute.xlu0 %3211  ;;  %v6861_v62 = vld [vmem:[#allocation46_spill] sm:$0xff] }
 0x4fc   : > { %v3214_v11 = vpop.permute.xlu1 %3213  ;;  %3790 = vmatpush1.msra.mxu1 %v3758_v27  ;;  %3189 = vst [vmem:[#allocation5 + $0x20] sm:$0xc] %v3185_v1  ;;  %v3215_v61 = vsel %vm1381_vm3, %v5704_v29, %v3212_v22  ;;  %v2017_v29 = vrot.slane %v2003_v63, %v4783_v30  ;;  %v2041_v52 = vcombine.high %v6861_v62, %v6861_v62 }
 0x4fd   : > { %3190 = vst [vmem:[#allocation5 + $0xb8] sm:$0xc] %v3186_v46  ;;  %v3216_v12 = vsel %vm1381_vm3, %v3212_v22, %v3214_v11  ;;  %v3219_v28 = vsel %vm6859_vm1, %v3215_v61, 0.0  ;;  %2283 = vrot.lane.b32.xlu0 %v2277_v60, %s6777_s3  ;;  %vm6862_vm3 = vcmask 809984   ;;  %v2056_v1 = vcombine.high %v5584_v31, %v5584_v31  ;;  %v6864_v46 = vld [vmem:[#allocation31_spill] sm:$0xff]  ;;  %v6868_v61 = vld [vmem:[#allocation22_spill] sm:$0xff] }
 0x4fe   : > { %v3220_v55 = vsel %vm634_vm0, %v3216_v12, 0.0  ;;  %2281 = vrot.lane.b32.xlu1 %v2278_v58, %s6777_s3  ;;  %v3223_v42 = vrot.slane %v3219_v28, 4  ;;  %vm6863_vm4 = vmmov %vm6862_vm3  ;;  %v2117_v11 = vcombine.high %v6864_v46, %v6864_v46  ;;  %v2077_v58 = vld [vmem:[#allocation4] sm:$0x3f]  ;;  %vm6869_vm1 = vcmask 932864  }
 0x4ff   : > { %v3224_v3 = vrot.slane %v3220_v55, 4  ;;  %v3250_v24 = vpop.permute.xlu0 %3249  ;;  %v2086_v28 = vrot.slane %v2077_v58, %v4783_v30  ;;  %v2079_v55 = vcombine.high %v2077_v58, %v2077_v58 }
 0x500   : > { %v3252_v20 = vpop.permute.xlu1 %3251  ;;  %3227 = vst [vmem:[#allocation5 + $0x20] sm:$0x30] %v3223_v42  ;;  %v3253_v26 = vsel %vm6862_vm3, %v5717_v25, %v3250_v24  ;;  %v2055_v25 = vrot.slane %v2041_v52, %v4783_v30  ;;  %v2131_v12 = vrot.slane %v2117_v11, %v4783_v30  ;;  %vm6870_vm3 = vmmov %vm6869_vm1 }
 0x501   : > { %3228 = vst [vmem:[#allocation5 + $0xb8] sm:$0x30] %v3224_v3  ;;  %v3254_v41 = vsel %vm6863_vm4, %v3250_v24, %v3252_v20  ;;  %v3257_v33 = vsel %vm595_vm14, %v3253_v26, 0.0  ;;  %2021 = vrot.lane.b32.xlu0 %v2018_v15, %s6778_s5  ;;  %v1969_v20 = vld [vmem:[#allocation4] sm:$0x3f]  ;;  %vm6871_vm4 = vmmov %vm6867_vm12  ;;  %v2094_v26 = vcombine.high %v2086_v28, %v2086_v28 }
 0x502   : > { %v3258_v50 = vsel %vm596_vm13, %v3254_v41, 0.0  ;;  %2023 = vrot.lane.b32.xlu1 %v2017_v29, %s6778_s5  ;;  %v3261_v39 = vrot.slane %v3257_v33, 2  ;;  %v1978_v41 = vrot.slane %v1969_v20, %v4783_v30  ;;  %v1971_v33 = vcombine.high %v1969_v20, %v1969_v20 }
 0x503   : > { %v3262_v14 = vrot.slane %v3258_v50, 2  ;;  %v3288_v27 = vpop.permute.xlu0 %3287 }
 0x504   : > { %v3290_v43 = vpop.permute.xlu1 %3289  ;;  %3265 = vst [vmem:[#allocation5 + $0x20] sm:$0xc0] %v3261_v39  ;;  %v3291_v22 = vsel %vm6865_vm2, %v5715_v45, %v3288_v27  ;;  %v2132_v45 = vcombine.high %v6868_v61, %v6868_v61  ;;  %vm6872_vm2 = vcmask 924672  }
 0x505   : > { %3266 = vst [vmem:[#allocation5 + $0xb8] sm:$0xc0] %v3262_v14  ;;  %v3292_v4 = vsel %vm6866_vm10, %v3288_v27, %v3290_v43  ;;  %v3295_v60 = vsel %vm601_vm11, %v3291_v22, 0.0  ;;  %2059 = vrot.lane.b32.xlu0 %v2056_v1, %s6780_s1  ;;  %vm6873_vm10 = vmmov %vm6872_vm2  ;;  %v1986_v22 = vcombine.high %v1978_v41, %v1978_v41 }
 0x506   : > { %v3296_v56 = vsel %vm6867_vm12, %v3292_v4, 0.0  ;;  %2061 = vrot.lane.b32.xlu1 %v2055_v25, %s6780_s1  ;;  %3297 = vst [vmem:[#allocation5 + $0x58] sm:$0x3] %v3295_v60  ;;  %v1985_v4 = vrot.slane %v1971_v33, %v4783_v30  ;;  %vm6875_vm12 = vcmask 908288   ;;  %s332_s1 = scalar_lea.vmem %s6951_s8, %s6950_s17 }
 0x507   : > { %3298 = vst [vmem:[#allocation5 + $0xc8] sm:$0x3] %v3296_v56  ;;  %v3030_v63 = vpop.permute.xlu0 %3029 }
 0x508   : > { %v3028_v31 = vpop.permute.xlu1 %3027 }
 0x509   : > { %v3031_v42 = vsel %vm6869_vm1, %v5728_v16, %v3028_v31  ;;  %v3032_v3 = vsel %vm6870_vm3, %v3028_v31, %v3030_v63  ;;  %2135 = vrot.lane.b32.xlu0 %v2132_v45, %s6781_s16  ;;  %v2093_v16 = vrot.slane %v2079_v55, %v4783_v30  ;;  %vm6876_vm1 = vmmov %vm6875_vm12  ;;  %vm6878_vm3 = vcmask 916480   ;;  %v3764_v55 = vld [vmem:[%s6880_s12] sm:$0xff] }
 0x50a   : > { %v3035_v24 = vsel %vm601_vm11, %v3031_v42, 0.0  ;;  %v3036_v23 = vsel %vm6871_vm4, %v3032_v3, 0.0  ;;  %2137 = vrot.lane.b32.xlu1 %v2131_v12, %s6781_s16  ;;  %vm6879_vm4 = vmmov %vm6878_vm3 }
 0x50b   : > { %v3039_v15 = vrot.slane %v3035_v24, 6  ;;  %v3040_v29 = vrot.slane %v3036_v23, 6  ;;  %v3068_v52 = vpop.permute.xlu0 %3067 }
 0x50c   : > { %v3066_v62 = vpop.permute.xlu1 %3065 }
 0x50d   : > { %3043 = vst [vmem:[#allocation5 + $0x8] sm:$0xc] %v3039_v15  ;;  %3044 = vst [vmem:[#allocation5 + $0x38] sm:$0xc] %v3040_v29  ;;  %v3069_v50 = vsel %vm6872_vm2, %v5726_v0, %v3066_v62  ;;  %v3070_v39 = vsel %vm6873_vm10, %v3066_v62, %v3068_v52  ;;  %2097 = vrot.lane.b32.xlu0 %v2094_v26, %s6874_s27  ;;  %v3756_v1 = vld [vmem:[#allocation5 + $0x58] sm:$0xff]  ;;  %vm6881_vm2 = vcmask 1039360  }
 0x50e   : > { %v3073_v14 = vsel %vm607_vm7, %v3069_v50, 0.0  ;;  %v3074_v43 = vsel %vm608_vm15, %v3070_v39, 0.0  ;;  %2099 = vrot.lane.b32.xlu1 %v2093_v16, %s6874_s27  ;;  %v3757_v27 = vld [vmem:[#allocation5 + $0xc8] sm:$0xff]  ;;  %vm6882_vm10 = vmmov %vm6881_vm2 }
 0x50f   : > { %v3077_v25 = vrot.slane %v3073_v14, 4  ;;  %v3078_v46 = vrot.slane %v3074_v43, 4  ;;  %3791 = vmatprep.subr.mxu1 %v3757_v27  ;;  %v3144_v0 = vpop.permute.xlu0 %3143 }
 0x510   : > { %v3142_v11 = vpop.permute.xlu1 %3141  ;;  %3792 = vmatpush1.msra.mxu1 %v3756_v1 }
 0x511   : > { %3081 = vst [vmem:[#allocation5 + $0x8] sm:$0x30] %v3077_v25  ;;  %3082 = vst [vmem:[#allocation5 + $0x38] sm:$0x30] %v3078_v46  ;;  %v3145_v58 = vsel %vm6875_vm12, %v5739_v47, %v3142_v11  ;;  %v3146_v60 = vsel %vm6876_vm1, %v3142_v11, %v3144_v0  ;;  %1991 = vrot.lane.b32.xlu0 %v1985_v4, %s6877_s28  ;;  %vm6883_vm12 = vcmask 1031168  }
 0x512   : > { %v3149_v56 = vsel %vm621_vm9, %v3145_v58, 0.0  ;;  %v3150_v31 = vsel %vm622_vm8, %v3146_v60, 0.0  ;;  %1989 = vrot.lane.b32.xlu1 %v1986_v22, %s6877_s28  ;;  %vm6884_vm1 = vmmov %vm6883_vm12 }
 0x513   : > { %3151 = vst [vmem:[#allocation5 + $0x20] sm:$0x3] %v3149_v56  ;;  %3152 = vst [vmem:[#allocation5 + $0xb8] sm:$0x3] %v3150_v31  ;;  %v3106_v63 = vpop.permute.xlu0 %3105 }
 0x514   : > { %v3104_v30 = vpop.permute.xlu1 %3103 }
 0x515   : > { %v3107_v61 = vsel %vm6878_vm3, %v5737_v35, %v3104_v30  ;;  %v3108_v47 = vsel %vm6879_vm4, %v3104_v30, %v3106_v63  ;;  %1987 = vrot.lane.b32.xlu0 %v1978_v41, %s6877_s28  ;;  %vm6885_vm3 = vcmask 1022976  }
 0x516   : > { %v3115_v45 = vrot.slane %v3107_v61, 2  ;;  %v3116_v12 = vrot.slane %v3108_v47, 2  ;;  %2095 = vrot.lane.b32.xlu1 %v2086_v28, %s6874_s27  ;;  %vm6886_vm4 = vmmov %vm6885_vm3 }
 0x517   : > { %v2882_v3 = vpop.permute.xlu0 %2881 }
 0x518   : > { %3119 = vst [vmem:[#allocation5 + $0x8] sm:$0xc0] %v3115_v45  ;;  %3120 = vst [vmem:[#allocation5 + $0x38] sm:$0xc0] %v3116_v12  ;;  %v2884_v42 = vpop.permute.xlu1 %2883  ;;  %v2885_v20 = vsel %vm6881_vm2, %v5750_v49, %v2882_v3  ;;  %vm6887_vm2 = vcmp.lt.s32.totalorder %v6794_v18, 13 }
 0x519   : > { %v2886_v35 = vsel %vm6882_vm10, %v2882_v3, %v2884_v42  ;;  %v2889_v24 = vsel %vm621_vm9, %v2885_v20, 0.0  ;;  %vm6888_vm10 = vcmask 941056  }
 0x51a   : > { %v2890_v28 = vsel %vm622_vm8, %v2886_v35, 0.0  ;;  %v3755_v23 = vld [vmem:[#allocation5 + $0xb8] sm:$0xff]  ;;  %v3754_v15 = vld [vmem:[#allocation5 + $0x20] sm:$0xff]  ;;  %3767 = vperm.xlu1 %4092, %v3764_v55   ;;  %v2893_v29 = vrot.slane %v2889_v24, 6 }
 0x51b   : > { %v2894_v62 = vrot.slane %v2890_v28, 6  ;;  %3793 = vmatprep.subr.mxu1 %v3755_v23  ;;  %v2920_v26 = vpop.permute.xlu0 %2919 }
 0x51c   : > { %v2922_v52 = vpop.permute.xlu1 %2921  ;;  %3794 = vmatpush1.msra.mxu1 %v3754_v15  ;;  %2897 = vst [vmem:[#allocation5 + $0x88] sm:$0xc] %v2893_v29  ;;  %v2923_v49 = vsel %vm6883_vm12, %v5748_v37, %v2920_v26  ;;  %vm6889_vm12 = vmmov %vm6888_vm10 }
 0x51d   : > { %2898 = vst [vmem:[#allocation5 + $0x70] sm:$0xc] %v2894_v62  ;;  %v2924_v16 = vsel %vm6884_vm1, %v2920_v26, %v2922_v52  ;;  %v2927_v41 = vsel %vm627_vm6, %v2923_v49, 0.0  ;;  %vm6890_vm1 = vcmask 23552  }
 0x51e   : > { %v2928_v33 = vsel %vm628_vm5, %v2924_v16, 0.0  ;;  %v2931_v50 = vrot.slane %v2927_v41, 4 }
 0x51f   : > { %v2932_v39 = vrot.slane %v2928_v33, 4  ;;  %v2958_v43 = vpop.permute.xlu0 %2957 }
 0x520   : > { %v2960_v14 = vpop.permute.xlu1 %2959  ;;  %2935 = vst [vmem:[#allocation5 + $0x88] sm:$0x30] %v2931_v50  ;;  %v2961_v27 = vsel %vm6885_vm3, %v5761_v32, %v2958_v43  ;;  %vm6891_vm3 = vmmov %vm6890_vm1 }
 0x521   : > { %2936 = vst [vmem:[#allocation5 + $0x70] sm:$0x30] %v2932_v39  ;;  %v2962_v1 = vsel %vm6886_vm4, %v2958_v43, %v2960_v14  ;;  %v2965_v37 = vsel %vm6887_vm2, %v2961_v27, 0.0  ;;  %vm6892_vm4 = vcmask 15360  }
 0x522   : > { %v2966_v25 = vsel %vm634_vm0, %v2962_v1, 0.0  ;;  %v2969_v46 = vrot.slane %v2965_v37, 2  ;;  %vm6893_vm2 = vmmov %vm6892_vm4 }
 0x523   : > { %v2970_v11 = vrot.slane %v2966_v25, 2  ;;  %v2996_v22 = vpop.permute.xlu0 %2995 }
 0x524   : > { %v2998_v0 = vpop.permute.xlu1 %2997  ;;  %2973 = vst [vmem:[#allocation5 + $0x88] sm:$0xc0] %v2969_v46  ;;  %v2999_v4 = vsel %vm6888_vm10, %v5759_v57, %v2996_v22  ;;  %vm6894_vm10 = vcmp.ge.s32.totalorder %v6795_v19, 2 }
 0x525   : > { %2974 = vst [vmem:[#allocation5 + $0x70] sm:$0xc0] %v2970_v11  ;;  %v3000_v58 = vsel %vm6889_vm12, %v2996_v22, %v2998_v0  ;;  %v3003_v32 = vsel %vm595_vm14, %v2999_v4, 0.0  ;;  %vm6895_vm12 = vcmask 7168  }
 0x526   : > { %v3004_v60 = vsel %vm596_vm13, %v3000_v58, 0.0  ;;  %3005 = vst [vmem:[#allocation5 + $0x8] sm:$0x3] %v3003_v32 }
 0x527   : > { %3006 = vst [vmem:[#allocation5 + $0x38] sm:$0x3] %v3004_v60  ;;  %v2754_v31 = vpop.permute.xlu0 %2753 }
 0x528   : > { %v2752_v56 = vpop.permute.xlu1 %2751 }
 0x529   : > { %v2755_v30 = vsel %vm6890_vm1, %v5772_v38, %v2752_v56  ;;  %v2756_v63 = vsel %vm6891_vm3, %v2752_v56, %v2754_v31  ;;  %vm6896_vm1 = vmmov %vm6895_vm12  ;;  %vm6897_vm3 = vcmask 121856  }
 0x52a   : > { %v2759_v57 = vsel %vm595_vm14, %v2755_v30, 0.0  ;;  %v2760_v61 = vsel %vm596_vm13, %v2756_v63, 0.0 }
 0x52b   : > { %v2763_v47 = vrot.slane %v2759_v57, 6  ;;  %v2764_v45 = vrot.slane %v2760_v61, 6  ;;  %v2792_v55 = vpop.permute.xlu0 %2791  ;;  %v3750_v26 = vld [vmem:[#allocation5 + $0x88] sm:$0xff] }
 0x52c   : > { %v2790_v12 = vpop.permute.xlu1 %2789  ;;  %v3751_v62 = vld [vmem:[#allocation5 + $0x70] sm:$0xff] }
 0x52d   : > { %2767 = vst [vmem:[#allocation5 + $0x50] sm:$0xc] %v2763_v47  ;;  %2768 = vst [vmem:[#allocation5 + $0x30] sm:$0xc] %v2764_v45  ;;  %v2793_v42 = vsel %vm6892_vm4, %v5770_v48, %v2790_v12  ;;  %v2794_v3 = vsel %vm6893_vm2, %v2790_v12, %v2792_v55  ;;  %v3752_v24 = vld [vmem:[#allocation5 + $0x8] sm:$0xff]  ;;  %vm6899_vm2 = vcmask 113664  }
 0x52e   : > { %v2797_v38 = vsel %vm601_vm11, %v2793_v42, 0.0  ;;  %v2798_v20 = vsel %vm6894_vm10, %v2794_v3, 0.0  ;;  %v3753_v35 = vld [vmem:[#allocation5 + $0x38] sm:$0xff]  ;;  %vm6898_vm4 = vmmov %vm6897_vm3 }
 0x52f   : > { %v2801_v28 = vrot.slane %v2797_v38, 4  ;;  %v2802_v23 = vrot.slane %v2798_v20, 4  ;;  %3795 = vmatprep.subr.mxu1 %v3753_v35  ;;  %v2830_v29 = vpop.permute.xlu0 %2829  ;;  %vm6900_vm10 = vmmov %vm6899_vm2 }
 0x530   : > { %v2828_v15 = vpop.permute.xlu1 %2827  ;;  %3796 = vmatpush1.msra.mxu1 %v3752_v24 }
 0x531   : > { %2805 = vst [vmem:[#allocation5 + $0x50] sm:$0x30] %v2801_v28  ;;  %2806 = vst [vmem:[#allocation5 + $0x30] sm:$0x30] %v2802_v23  ;;  %v2831_v48 = vsel %vm6895_vm12, %v5781_v6, %v2828_v15  ;;  %v2832_v52 = vsel %vm6896_vm1, %v2828_v15, %v2830_v29  ;;  %3797 = vmatprep.subr.mxu1 %v3751_v62  ;;  %vm6901_vm12 = vcmask 105472  }
 0x532   : > { %v2835_v49 = vsel %vm607_vm7, %v2831_v48, 0.0  ;;  %v2836_v16 = vsel %vm608_vm15, %v2832_v52, 0.0  ;;  %3798 = vmatpush1.msra.mxu1 %v3750_v26  ;;  %vm6902_vm1 = vmmov %vm6901_vm12 }
 0x533   : > { %v2839_v41 = vrot.slane %v2835_v49, 2  ;;  %v2840_v33 = vrot.slane %v2836_v16, 2  ;;  %v2644_v39 = vpop.permute.xlu0 %2643 }
 0x534   : > { %v2646_v50 = vpop.permute.xlu1 %2645  ;;  %v2647_v6 = vsel %vm6897_vm3, %v5783_v5, %v2644_v39  ;;  %vm6903_vm3 = vcmp.lt.s32.totalorder %v6794_v18, 13 }
 0x535   : > { %2843 = vst [vmem:[#allocation5 + $0x50] sm:$0xc0] %v2839_v41  ;;  %2844 = vst [vmem:[#allocation5 + $0x30] sm:$0xc0] %v2840_v33  ;;  %v2648_v14 = vsel %vm6898_vm4, %v2644_v39, %v2646_v50  ;;  %v2651_v43 = vsel %vm621_vm9, %v2647_v6, 0.0  ;;  %vm6904_vm4 = vcmask 130048  }
 0x536   : > { %v2652_v27 = vsel %vm622_vm8, %v2648_v14, 0.0  ;;  %v2655_v1 = vrot.slane %v2651_v43, 4 }
 0x537   : > { %v2656_v37 = vrot.slane %v2652_v27, 4  ;;  %v2682_v46 = vpop.permute.xlu0 %2681 }
 0x538   : > { %v2684_v25 = vpop.permute.xlu1 %2683  ;;  %2659 = vst [vmem:[#allocation5 + $0x80] sm:$0x30] %v2655_v1  ;;  %v2685_v11 = vsel %vm6899_vm2, %v5792_v13, %v2682_v46  ;;  %vm6905_vm2 = vmmov %vm6904_vm4 }
 0x539   : > { %2660 = vst [vmem:[#allocation5 + $0xa8] sm:$0x30] %v2656_v37  ;;  %v2686_v0 = vsel %vm6900_vm10, %v2682_v46, %v2684_v25  ;;  %v2689_v5 = vsel %vm627_vm6, %v2685_v11, 0.0  ;;  %vm6906_vm10 = vcmask 236544  }
 0x53a   : > { %v2690_v22 = vsel %vm628_vm5, %v2686_v0, 0.0  ;;  %v2693_v4 = vrot.slane %v2689_v5, 2 }
 0x53b   : > { %v2694_v58 = vrot.slane %v2690_v22, 2  ;;  %v2720_v60 = vpop.permute.xlu0 %2719 }
 0x53c   : > { %v2722_v32 = vpop.permute.xlu1 %2721  ;;  %2697 = vst [vmem:[#allocation5 + $0x80] sm:$0xc0] %v2693_v4  ;;  %v2723_v56 = vsel %vm6901_vm12, %v5794_v9, %v2720_v60  ;;  %vm6907_vm12 = vmmov %vm6906_vm10 }
 0x53d   : > { %2698 = vst [vmem:[#allocation5 + $0xa8] sm:$0xc0] %v2694_v58  ;;  %v2724_v31 = vsel %vm6902_vm1, %v2720_v60, %v2722_v32  ;;  %v2727_v13 = vsel %vm6903_vm3, %v2723_v56, 0.0  ;;  %vm6908_vm1 = vmmov %vm6903_vm3  ;;  %vm6909_vm3 = vcmask 154624  }
 0x53e   : > { %v2728_v30 = vsel %vm634_vm0, %v2724_v31, 0.0  ;;  %2729 = vst [vmem:[#allocation5 + $0x50] sm:$0x3] %v2727_v13 }
 0x53f   : > { %2730 = vst [vmem:[#allocation5 + $0x30] sm:$0x3] %v2728_v30  ;;  %v2606_v57 = vpop.permute.xlu0 %2605 }
 0x540   : > { %v2608_v63 = vpop.permute.xlu1 %2607  ;;  %v2609_v61 = vsel %vm6904_vm4, %v5803_v7, %v2606_v57  ;;  %vm6910_vm4 = vmmov %vm6909_vm3 }
 0x541   : > { %v2610_v47 = vsel %vm6905_vm2, %v2606_v57, %v2608_v63  ;;  %v2617_v45 = vrot.slane %v2609_v61, 6  ;;  %vm6911_vm2 = vcmask 146432  }
 0x542   : > { %v2618_v12 = vrot.slane %v2610_v47, 6 }
 0x543   : > { %2621 = vst [vmem:[#allocation5 + $0x80] sm:$0xc] %v2617_v45  ;;  %v2462_v55 = vpop.permute.xlu0 %2461 }
 0x544   : > { %2622 = vst [vmem:[#allocation5 + $0xa8] sm:$0xc] %v2618_v12  ;;  %v2460_v9 = vpop.permute.xlu1 %2459 }
 0x545   : > { %v2463_v42 = vsel %vm6906_vm10, %v5805_v2, %v2460_v9  ;;  %v2464_v3 = vsel %vm6907_vm12, %v2460_v9, %v2462_v55  ;;  %v3748_v35 = vld [vmem:[#allocation5 + $0x50] sm:$0xff]  ;;  %vm6912_vm10 = vmmov %vm6911_vm2  ;;  %vm6913_vm12 = vcmp.ge.s32.totalorder %v6795_v19, 2 }
 0x546   : > { %v2467_v38 = vsel %vm6908_vm1, %v2463_v42, 0.0  ;;  %v2468_v20 = vsel %vm634_vm0, %v2464_v3, 0.0  ;;  %v3749_v7 = vld [vmem:[#allocation5 + $0x30] sm:$0xff]  ;;  %vm6914_vm1 = vcmask 138240  }
 0x547   : > { %v2471_v24 = vrot.slane %v2467_v38, 6  ;;  %v2472_v28 = vrot.slane %v2468_v20, 6  ;;  %3799 = vmatprep.subr.mxu1 %v3749_v7  ;;  %v2500_v15 = vpop.permute.xlu0 %2499 }
 0x548   : > { %v2498_v23 = vpop.permute.xlu1 %2497  ;;  %3800 = vmatpush1.msra.mxu1 %v3748_v35 }
 0x549   : > { %2475 = vst [vmem:[#allocation5 + $0x40] sm:$0xc] %v2471_v24  ;;  %2476 = vst [vmem:[#allocation5 + $0x78] sm:$0xc] %v2472_v28  ;;  %v2501_v2 = vsel %vm6909_vm3, %v5814_v53, %v2498_v23  ;;  %v2502_v29 = vsel %vm6910_vm4, %v2498_v23, %v2500_v15  ;;  %vm6916_vm4 = vcmask 269312  }
 0x54a   : > { %v2505_v62 = vsel %vm595_vm14, %v2501_v2, 0.0  ;;  %v2506_v48 = vsel %vm596_vm13, %v2502_v29, 0.0  ;;  %vm6915_vm3 = vmmov %vm6914_vm1 }
 0x54b   : > { %v2509_v52 = vrot.slane %v2505_v62, 4  ;;  %v2510_v26 = vrot.slane %v2506_v48, 4  ;;  %v2538_v16 = vpop.permute.xlu0 %2537 }
 0x54c   : > { %v2536_v49 = vpop.permute.xlu1 %2535 }
 0x54d   : > { %2513 = vst [vmem:[#allocation5 + $0x40] sm:$0x30] %v2509_v52  ;;  %2514 = vst [vmem:[#allocation5 + $0x78] sm:$0x30] %v2510_v26  ;;  %v2539_v41 = vsel %vm6911_vm2, %v5816_v51, %v2536_v49  ;;  %v2540_v33 = vsel %vm6912_vm10, %v2536_v49, %v2538_v16  ;;  %vm6918_vm10 = vcmask 252928  }
 0x54e   : > { %v2543_v53 = vsel %vm601_vm11, %v2539_v41, 0.0  ;;  %v2544_v50 = vsel %vm6913_vm12, %v2540_v33, 0.0  ;;  %vm6917_vm2 = vmmov %vm6916_vm4 }
 0x54f   : > { %v2547_v39 = vrot.slane %v2543_v53, 2  ;;  %v2548_v6 = vrot.slane %v2544_v50, 2  ;;  %v2576_v43 = vpop.permute.xlu0 %2575  ;;  %vm6919_vm12 = vmmov %vm6918_vm10 }
 0x550   : > { %v2574_v14 = vpop.permute.xlu1 %2573 }
 0x551   : > { %2551 = vst [vmem:[#allocation5 + $0x40] sm:$0xc0] %v2547_v39  ;;  %2552 = vst [vmem:[#allocation5 + $0x78] sm:$0xc0] %v2548_v6  ;;  %v2577_v27 = vsel %vm6914_vm1, %v5825_v44, %v2574_v14  ;;  %v2578_v1 = vsel %vm6915_vm3, %v2574_v14, %v2576_v43  ;;  %vm6920_vm1 = vcmask 244736  }
 0x552   : > { %v2581_v51 = vsel %vm607_vm7, %v2577_v27, 0.0  ;;  %v2582_v37 = vsel %vm608_vm15, %v2578_v1, 0.0  ;;  %vm6921_vm3 = vmmov %vm6920_vm1 }
 0x553   : > { %2583 = vst [vmem:[#allocation5 + $0x80] sm:$0x3] %v2581_v51  ;;  %2584 = vst [vmem:[#allocation5 + $0xa8] sm:$0x3] %v2582_v37  ;;  %v2314_v46 = vpop.permute.xlu0 %2313 }
 0x554   : > { %v2316_v25 = vpop.permute.xlu1 %2315  ;;  %v2317_v11 = vsel %vm6916_vm4, %v5827_v40, %v2314_v46  ;;  %vm6922_vm4 = vcmask 261120  }
 0x555   : > { %v2318_v0 = vsel %vm6917_vm2, %v2314_v46, %v2316_v25  ;;  %v2321_v44 = vsel %vm607_vm7, %v2317_v11, 0.0  ;;  %vm6923_vm2 = vmmov %vm6922_vm4 }
 0x556   : > { %v2322_v5 = vsel %vm608_vm15, %v2318_v0, 0.0  ;;  %v2325_v22 = vrot.slane %v2321_v44, 6 }
 0x557   : > { %v2326_v4 = vrot.slane %v2322_v5, 6  ;;  %v2390_v32 = vpop.permute.xlu0 %2389 }
 0x558   : > { %v2392_v58 = vpop.permute.xlu1 %2391  ;;  %2329 = vst [vmem:[#allocation5 + $0x60] sm:$0xc] %v2325_v22  ;;  %v2393_v60 = vsel %vm6918_vm10, %v5836_v21, %v2390_v32  ;;  %vm6924_vm10 = vcmask 375808  }
 0x559   : > { %2330 = vst [vmem:[#allocation5 + $0x28] sm:$0xc] %v2326_v4  ;;  %v2394_v56 = vsel %vm6919_vm12, %v2390_v32, %v2392_v58  ;;  %v2397_v40 = vsel %vm621_vm9, %v2393_v60, 0.0  ;;  %vm6925_vm12 = vmmov %vm6924_vm10 }
 0x55a   : > { %v2398_v31 = vsel %vm622_vm8, %v2394_v56, 0.0  ;;  %v3747_v13 = vld [vmem:[#allocation5 + $0xa8] sm:$0xff]  ;;  %v3746_v30 = vld [vmem:[#allocation5 + $0x80] sm:$0xff]  ;;  %v2401_v63 = vrot.slane %v2397_v40, 2  ;;  %v6937_v56 = vld [vmem:[#allocation48_spill] sm:$0xff] }
 0x55b   : > { %v2402_v57 = vrot.slane %v2398_v31, 2  ;;  %3801 = vmatprep.subr.mxu1 %v3747_v13  ;;  %v2428_v47 = vpop.permute.xlu0 %2427 }
 0x55c   : > { %v2430_v61 = vpop.permute.xlu1 %2429  ;;  %3802 = vmatpush1.msra.mxu1 %v3746_v30  ;;  %2405 = vst [vmem:[#allocation5 + $0x60] sm:$0xc0] %v2401_v63  ;;  %v2431_v21 = vsel %vm6920_vm1, %v5838_v17, %v2428_v47  ;;  %vm6926_vm1 = vcmask 367616  }
 0x55d   : > { %2406 = vst [vmem:[#allocation5 + $0x28] sm:$0xc0] %v2402_v57  ;;  %v2432_v45 = vsel %vm6921_vm3, %v2428_v47, %v2430_v61  ;;  %v2435_v12 = vsel %vm627_vm6, %v2431_v21, 0.0  ;;  %vm6927_vm3 = vmmov %vm6926_vm1 }
 0x55e   : > { %v2436_v9 = vsel %vm628_vm5, %v2432_v45, 0.0  ;;  %2437 = vst [vmem:[#allocation5 + $0x40] sm:$0x3] %v2435_v12  ;;  %v6940_v45 = vld [vmem:[#allocation24_spill] sm:$0xff] }
 0x55f   : > { %2438 = vst [vmem:[#allocation5 + $0x78] sm:$0x3] %v2436_v9  ;;  %v2354_v42 = vpop.permute.xlu0 %2353 }
 0x560   : > { %v2352_v55 = vpop.permute.xlu1 %2351 }
 0x561   : > { %v2355_v3 = vsel %vm6922_vm4, %v5847_v8, %v2352_v55  ;;  %v2356_v38 = vsel %vm6923_vm2, %v2352_v55, %v2354_v42 }
 0x562   : > { %v2363_v20 = vrot.slane %v2355_v3, 4  ;;  %v2364_v7 = vrot.slane %v2356_v38, 4 }
 0x563   : > { %v2170_v35 = vpop.permute.xlu0 %2169 }
 0x564   : > { %2367 = vst [vmem:[#allocation5 + $0x60] sm:$0x30] %v2363_v20  ;;  %2368 = vst [vmem:[#allocation5 + $0x28] sm:$0x30] %v2364_v7  ;;  %v2168_v17 = vpop.permute.xlu1 %2167 }
 0x565   : > { %v2171_v24 = vsel %vm6924_vm10, %v5849_v59, %v2168_v17  ;;  %v2172_v28 = vsel %vm6925_vm12, %v2168_v17, %v2170_v35  ;;  %v3744_v2 = vld [vmem:[#allocation5 + $0x40] sm:$0xff]  ;;  %vm6933_vm10 = vcmp.ge.s32.totalorder %v6795_v19, 2  ;;  %vm6934_vm12 = vcmask 408576   ;;  %v3737_v19 = vld [vmem:[%s6947_s19] sm:$0xff] }
 0x566   : > { %v2175_v23 = vsel %vm627_vm6, %v2171_v24, 0.0  ;;  %v2176_v15 = vsel %vm628_vm5, %v2172_v28, 0.0  ;;  %v3745_v8 = vld [vmem:[#allocation5 + $0x78] sm:$0xff]  ;;  %vm6928_vm6 = vcmp.lt.s32.totalorder %v6794_v18, 13  ;;  %vm6929_vm5 = vcmask 285696  }
 0x567   : > { %v2179_v29 = vrot.slane %v2175_v23, 6  ;;  %v2180_v62 = vrot.slane %v2176_v15, 6  ;;  %3803 = vmatprep.subr.mxu1 %v3745_v8  ;;  %v2208_v52 = vpop.permute.xlu0 %2207  ;;  %vm6930_vm4 = vmmov %vm6929_vm5 }
 0x568   : > { %v2206_v48 = vpop.permute.xlu1 %2205  ;;  %3804 = vmatpush1.msra.mxu1 %v3744_v2 }
 0x569   : > { %2183 = vst [vmem:[#allocation5 + $0x10] sm:$0xc] %v2179_v29  ;;  %2184 = vst [vmem:[#allocation5 + $0x48] sm:$0xc] %v2180_v62  ;;  %v2209_v59 = vsel %vm6926_vm1, %v5858_v36, %v2206_v48  ;;  %v2210_v26 = vsel %vm6927_vm3, %v2206_v48, %v2208_v52 }
 0x56a   : > { %v2213_v49 = vsel %vm6928_vm6, %v2209_v59, 0.0  ;;  %v2214_v16 = vsel %vm634_vm0, %v2210_v26, 0.0  ;;  %vm6931_vm0 = vcmask 277504   ;;  %vm6935_vm1 = vmmov %vm6934_vm12  ;;  %vm6938_vm6 = vcmask 400384  }
 0x56b   : > { %v2217_v41 = vrot.slane %v2213_v49, 4  ;;  %v2218_v33 = vrot.slane %v2214_v16, 4  ;;  %v2246_v50 = vpop.permute.xlu0 %2245  ;;  %vm6932_vm2 = vmmov %vm6931_vm0 }
 0x56c   : > { %v2244_v53 = vpop.permute.xlu1 %2243  ;;  %vm6936_vm3 = vmmov %vm6933_vm10 }
 0x56d   : > { %2221 = vst [vmem:[#allocation5 + $0x10] sm:$0x30] %v2217_v41  ;;  %2222 = vst [vmem:[#allocation5 + $0x48] sm:$0x30] %v2218_v33  ;;  %v2247_v39 = vsel %vm6929_vm5, %v5860_v54, %v2244_v53  ;;  %v2248_v6 = vsel %vm6930_vm4, %v2244_v53, %v2246_v50 }
 0x56e   : > { %v2251_v36 = vsel %vm595_vm14, %v2247_v39, 0.0  ;;  %v2252_v14 = vsel %vm596_vm13, %v2248_v6, 0.0  ;;  %vm6939_vm5 = vmmov %vm6938_vm6 }
 0x56f   : > { %v2255_v43 = vrot.slane %v2251_v36, 2  ;;  %v2256_v27 = vrot.slane %v2252_v14, 2  ;;  %v2284_v51 = vpop.permute.xlu0 %2283 }
 0x570   : > { %v2282_v1 = vpop.permute.xlu1 %2281 }
 0x571   : > { %2259 = vst [vmem:[#allocation5 + $0x10] sm:$0xc0] %v2255_v43  ;;  %2260 = vst [vmem:[#allocation5 + $0x48] sm:$0xc0] %v2256_v27  ;;  %v2285_v37 = vsel %vm6931_vm0, %v5869_v10, %v2282_v1  ;;  %v2286_v25 = vsel %vm6932_vm2, %v2282_v1, %v2284_v51  ;;  %v6952_v27 = vld [vmem:[#allocation8_spill] sm:$0xff] }
 0x572   : > { %v2289_v54 = vsel %vm601_vm11, %v2285_v37, 0.0  ;;  %v2290_v46 = vsel %vm6933_vm10, %v2286_v25, 0.0  ;;  %v6953_v37 = vld [vmem:[#allocation9_spill] sm:$0xff] }
 0x573   : > { %2291 = vst [vmem:[#allocation5 + $0x60] sm:$0x3] %v2289_v54  ;;  %2292 = vst [vmem:[#allocation5 + $0x28] sm:$0x3] %v2290_v46  ;;  %v2022_v11 = vpop.permute.xlu0 %2021 }
 0x574   : > { %v2024_v0 = vpop.permute.xlu1 %2023  ;;  %v2025_v44 = vsel %vm6934_vm12, %v5871_v34, %v2022_v11 }
 0x575   : > { %v2026_v5 = vsel %vm6935_vm1, %v2022_v11, %v2024_v0  ;;  %v2029_v10 = vsel %vm601_vm11, %v2025_v44, 0.0  ;;  %vm6941_vm11 = vcmask 384000  }
 0x576   : > { %v2030_v22 = vsel %vm6936_vm3, %v2026_v5, 0.0  ;;  %v2033_v4 = vrot.slane %v2029_v10, 6  ;;  %vm6942_vm4 = vmmov %vm6941_vm11 }
 0x577   : > { %v2034_v58 = vrot.slane %v2030_v22, 6  ;;  %v2060_v32 = vpop.permute.xlu0 %2059 }
 0x578   : > { %v2062_v60 = vpop.permute.xlu1 %2061  ;;  %2037 = vst [vmem:[#allocation5 + $0xb0] sm:$0xc] %v2033_v4  ;;  %v2063_v40 = vsel %vm6938_vm6, %v6937_v56, %v2060_v32 }
 0x579   : > { %2038 = vst [vmem:[#allocation5] sm:$0xc] %v2034_v58  ;;  %v2064_v31 = vsel %vm6939_vm5, %v2060_v32, %v2062_v60  ;;  %v2067_v34 = vsel %vm607_vm7, %v2063_v40, 0.0  ;;  %vm6944_vm7 = vcmask 416768  }
 0x57a   : > { %v2068_v13 = vsel %vm608_vm15, %v2064_v31, 0.0  ;;  %v3743_v30 = vld [vmem:[#allocation5 + $0x28] sm:$0xff]  ;;  %v3742_v63 = vld [vmem:[#allocation5 + $0x60] sm:$0xff]  ;;  %v2071_v57 = vrot.slane %v2067_v34, 4  ;;  %vm6943_vm15 = vcmask 392192  }
 0x57b   : > { %v2072_v61 = vrot.slane %v2068_v13, 4  ;;  %3805 = vmatprep.subr.mxu1 %v3743_v30  ;;  %v2136_v47 = vpop.permute.xlu0 %2135 }
 0x57c   : > { %3806 = vmatpush1.msra.mxu1 %v3742_v63  ;;  %v2138_v21 = vpop.permute.xlu1 %2137  ;;  %2075 = vst [vmem:[#allocation5 + $0xb0] sm:$0x30] %v2071_v57  ;;  %v2139_v12 = vsel %vm6941_vm11, %v6940_v45, %v2136_v47 }
 0x57d   : > { %2076 = vst [vmem:[#allocation5] sm:$0x30] %v2072_v61  ;;  %v2140_v9 = vsel %vm6942_vm4, %v2136_v47, %v2138_v21  ;;  %v2143_v55 = vsel %vm621_vm9, %v2139_v12, 0.0  ;;  %vm6945_vm9 = vmmov %vm6943_vm15 }
 0x57e   : > { %v2144_v42 = vsel %vm622_vm8, %v2140_v9, 0.0  ;;  %2145 = vst [vmem:[#allocation5 + $0x10] sm:$0x3] %v2143_v55  ;;  %vm6946_vm8 = vmmov %vm6944_vm7 }
 0x57f   : > { %2146 = vst [vmem:[#allocation5 + $0x48] sm:$0x3] %v2144_v42  ;;  %v2098_v3 = vpop.permute.xlu0 %2097 }
 0x580   : > { %v2100_v38 = vpop.permute.xlu1 %2099 }
 0x581   : > { %v2102_v20 = vsel %vm6943_vm15, %v2098_v3, %v2100_v38 }
 0x582   : > { %v2110_v7 = vrot.slane %v2102_v20, 2 }
 0x583   : > { %v1992_v35 = vpop.permute.xlu0 %1991 }
 0x584   : > { %2114 = vst [vmem:[#allocation5] sm:$0xc0] %v2110_v7  ;;  %v1990_v17 = vpop.permute.xlu1 %1989 }
 0x585   : > { %v1994_v24 = vsel %vm6944_vm7, %v1990_v17, %v1992_v35  ;;  %v3740_v15 = vld [vmem:[#allocation5 + $0x10] sm:$0xff] }
 0x586   : > { %v1998_v28 = vsel %vm596_vm13, %v1994_v24, 0.0  ;;  %v3741_v23 = vld [vmem:[#allocation5 + $0x48] sm:$0xff]  ;;  %vm6948_vm13 = vcmask 801792  }
 0x587   : > { %2000 = vst [vmem:[#allocation5] sm:$0x3] %v1998_v28  ;;  %3807 = vmatprep.subr.mxu1 %v3741_v23  ;;  %v1988_v2 = vpop.permute.xlu0 %1987 }
 0x588   : > { %3808 = vmatpush1.msra.mxu1 %v3740_v15  ;;  %v2096_v8 = vpop.permute.xlu1 %2095  ;;  %v1993_v62 = vsel %vm6946_vm8, %v1988_v2, %v1990_v17 }
 0x589   : > { %v2101_v29 = vsel %vm6945_vm9, %v2096_v8, %v2098_v3  ;;  %v1997_v52 = vsel %vm595_vm14, %v1993_v62, 0.0 }
 0x58a   : > { %v2109_v48 = vrot.slane %v2101_v29, 2  ;;  %1999 = vst [vmem:[#allocation5 + $0xb0] sm:$0x3] %v1997_v52 }
 0x58c   : > { %2113 = vst [vmem:[#allocation5 + $0xb0] sm:$0xc0] %v2109_v48 }
 0x58e   : > { %v3739_v59 = vld [vmem:[#allocation5] sm:$0xff] }
 0x58f   : > { %3809 = vmatprep.subr.mxu1 %v3739_v59 }
 0x593   : > { %v3738_v26 = vld [vmem:[#allocation5 + $0xb0] sm:$0xff] }
 0x594   : > { %3810 = vmatpush1.msra.mxu1 %v3738_v26 }
 0x595   : > { %3941 = vmatmul.mubr.msk.f32.vlgmr.msra.gmra.mxu1 %vm6948_vm13, %v3737_v19  ;;  %v3768_v49 = vpop.permute.xlu1 %3767 }
 0x655   : > { %v3845_v16 = vpop.f32.mrf.mxu1 }
 0x656   : > { %v3846_v41 = vadd.f32 %v3845_v16, %v3768_v49 }
 0x657   : > { %v3847_v33 = vpop.f32.mrf.mxu1 }
 0x658   : > { %v3942_v53 = vmul.f32 -1.442695, %v3846_v41  ;;  %v3848_v18 = vadd.f32 %v3847_v33, %v3768_v49 }
 0x65a   : > { %4150 = vpow2.f32 %v3942_v53  ;;  %v3943_v50 = vmul.f32 -1.442695, %v3848_v18 }
 0x65c   : > { %4152 = vpow2.f32 %v3943_v50 }
 0x667   : > { %v4151_v39 = vpop.eup %4150 }
 0x668   : > { %v3856_v6 = vadd.f32 1.0, %v4151_v39 }
 0x669   : > { %v4153_v36 = vpop.eup %4152 }
 0x66a   : > { %4154 = vrcp.f32 %v3856_v6  ;;  %v3857_v14 = vadd.f32 1.0, %v4153_v36 }
 0x66c   : > { %4156 = vrcp.f32 %v3857_v14 }
 0x677   : > { %v4155_v43 = vpop.eup %4154 }
 0x678   : > { %v3862_v1 = vmul.f32 %v4155_v43, %v6952_v27 }
 0x679   : > { %v4157_v51 = vpop.eup %4156 }
 0x67a   : > { %3864 = vst [vmem:[%s332_s1] sm:$0xff] %v3862_v1  ;;  %v3863_v25 = vmul.f32 %v4157_v51, %v6953_v37 }
 0x67c   : > { %3865 = vst [vmem:[%s332_s1 + $0x8] sm:$0xff] %v3863_v25 }
 0x67d PF: > { %s6954_s16 = sld [smem:[#allocation6_spill]] }
 0x683   : > { %s19_s30 = sadd.s32 1, %s6954_s16  }
 0x684   : > { %p16_p4 = scmp.ge.s32.totalorder %s19_s30, 4  }
 0x686   :  { %18 = sbr.rel (!%p16_p4) target bundleno = 11 (0xb), region = 86 }

</bundles_post_ra>
